<compile_context>
chip_gen: v7x
topology: tpu7x:2x2x1
jax: 0.10.0
libtpu: 0.0.40
codegen_flags: <defaults>
</compile_context>

<pallas_src>
import functools

import jax
import jax.numpy as jnp
from jax.experimental import pallas as pl
from jax.experimental.pallas import tpu as pltpu


# --------------------------------------------------------------------------
# Wrapper-side operator construction (pure layout / tiny math, runs in XLA)
# --------------------------------------------------------------------------

def _upsample_matrix(n_in, n_out):
    """1-D bilinear interpolation matrix (n_out, n_in), align_corners=True."""
    if n_in == 1:
        return jnp.ones((n_out, 1), jnp.float32)
    o = jnp.arange(n_out, dtype=jnp.float32)
    src = o * (n_in - 1) / (n_out - 1)
    i0f = jnp.floor(src)
    w1 = src - i0f
    i0 = jnp.clip(i0f.astype(jnp.int32), 0, n_in - 1)
    i1 = jnp.clip(i0 + 1, 0, n_in - 1)
    cols = jnp.arange(n_in)[None, :]
    m = ((cols == i0[:, None]).astype(jnp.float32) * (1.0 - w1)[:, None]
         + (cols == i1[:, None]).astype(jnp.float32) * w1[:, None])
    return m


def _band_weights(w, width):
    """Turn a (3,3,Ci,Co) HWIO conv weight into 3 block-banded matrices.

    band[dy][(w_in*Ci + ci), (w_out*Co + co)] = w[dy, dx, ci, co] with
    dx = w_in - w_out + 1 (zero outside the band), so that a stride-1 pad-1
    3x3 conv over an NHWC row-slab x (rows = H, cols = w*Ci + ci) is
        out[h] = sum_dy rowpad[h+dy] @ band[dy]
    (band truncation at the edges == zero padding along W).
    """
    _, _, ci, co = w.shape
    win = jnp.arange(width)[:, None]
    wout = jnp.arange(width)[None, :]
    bands = []
    for dy in range(3):
        acc = jnp.zeros((width, ci, width, co), jnp.float32)
        for dx in range(3):
            mask = ((win - wout) == (dx - 1)).astype(jnp.float32)
            acc = acc + mask[:, None, :, None] * w[dy, dx][None, :, None, :]
        bands.append(acc.reshape(width * ci, width * co))
    return jnp.stack(bands, axis=0)                      # (3, width*Ci, width*Co)


def _shifted_upsample_rows(ry, Ho):
    """Stack the three vertically shifted H-upsample operators into (3*Ho, H).

    Row block dy of the result equals rowpad[dy : dy+Ho] where rowpad is the
    zero-padded (Ho+2, H) version of ry, so  (RS @ x1)[dy*Ho + h] is exactly the
    zero-padded, H-upsampled row (h + dy) the 3x3 conv needs.
    """
    H = ry.shape[1]
    ry_pad = jnp.zeros((Ho + 2, H), jnp.float32).at[1:Ho + 1].set(ry)
    return jnp.concatenate(
        [ry_pad[0:Ho], ry_pad[1:Ho + 1], ry_pad[2:Ho + 2]], axis=0)


# --------------------------------------------------------------------------
# Fused UpBlock kernel
# --------------------------------------------------------------------------

def _upblock_kernel(x1_ref, x0_ref, rs_ref,
                    swu_ref, bu_ref,
                    w1_ref, b1_ref,
                    w2_ref, b2_ref,
                    au_ref, a1_ref, a2_ref,
                    o_ref,
                    pad_ref,
                    *, H, W, Ci, Co):
    Ho, Wo = 2 * H, 2 * W
    f32 = jnp.float32

    au = au_ref[0, 0]
    a1 = a1_ref[0, 0]
    a2 = a2_ref[0, 0]

    # ---- bilinear x2 H-upsample for the three conv row-shifts: ONE MXU matmul ----
    # u3[dy*Ho + h] = zero-padded, H-upsampled row (h + dy) of feat1.
    u3 = jnp.dot(rs_ref[...], x1_ref[0], preferred_element_type=f32)   # (3*Ho, W*Ci)

    # up-conv (W-upsample + 3x3 band folded into swu) + bias + PReLU + skip add
    t = jnp.dot(u3[0:Ho], swu_ref[0], preferred_element_type=f32)
    t = t + jnp.dot(u3[Ho:2 * Ho], swu_ref[1], preferred_element_type=f32)
    t = t + jnp.dot(u3[2 * Ho:3 * Ho], swu_ref[2], preferred_element_type=f32)
    t = t + bu_ref[...]
    t = jnp.where(t >= 0.0, t, au * t)
    t = t + x0_ref[0]                                                   # (Ho, Wo*Co)

    # Row-padded scratch for the ResBlock convs: only boundary rows need zeroing
    # (they stay zero across both convs).
    zero_row = jnp.zeros((1, Wo * Co), f32)
    pad_ref[pl.ds(0, 1), :] = zero_row
    pad_ref[pl.ds(Ho + 1, 1), :] = zero_row

    def band_conv(w_ref, b_ref):
        acc = jnp.dot(pad_ref[pl.ds(0, Ho), :], w_ref[0], preferred_element_type=f32)
        acc = acc + jnp.dot(pad_ref[pl.ds(1, Ho), :], w_ref[1], preferred_element_type=f32)
        acc = acc + jnp.dot(pad_ref[pl.ds(2, Ho), :], w_ref[2], preferred_element_type=f32)
        return acc + b_ref[...]

    # ResBlock: conv1 + PReLU
    pad_ref[pl.ds(1, Ho), :] = t
    h = band_conv(w1_ref, b1_ref)
    h = jnp.where(h >= 0.0, h, a1 * h)

    # ResBlock: conv2 + residual (identity downsample, in_ch == out_ch) + PReLU
    pad_ref[pl.ds(1, Ho), :] = h
    h = band_conv(w2_ref, b2_ref)
    h = h + t
    h = jnp.where(h >= 0.0, h, a2 * h)

    # TODO(synk): norm=True (per-pixel LayerNorm over channels) not implemented;
    # the module default norm=False (identity) is what is implemented here.
    o_ref[0] = h.astype(o_ref.dtype)


def upblock_pallas(params, feat1_nchw, feat0_nchw):
    """feat1: (B, in_ch, H, W), feat0: (B, out_ch, 2H, 2W), NCHW. Returns NCHW."""
    B, Ci, H, W = feat1_nchw.shape
    Co = params["up_w"].shape[-1]
    Ho, Wo = 2 * H, 2 * W
    assert feat0_nchw.shape == (B, Co, Ho, Wo)

    # Layout plumbing (outside the kernel): NCHW -> lane-dense NHWC row slabs.
    x1 = jnp.transpose(feat1_nchw, (0, 2, 3, 1)).reshape(B, H, W * Ci)
    x0 = jnp.transpose(feat0_nchw, (0, 2, 3, 1)).reshape(B, Ho, Wo * Co)

    hi = jax.lax.Precision.HIGHEST
    ry = _upsample_matrix(H, Ho)                                  # (Ho, H)
    rx = _upsample_matrix(W, Wo)                                  # (Wo, W)
    rs = _shifted_upsample_rows(ry, Ho)                           # (3*Ho, H)

    # W-direction upsample as a slab operator S[(w,ci),(wo,ci')] = Rx[wo,w]*delta
    s = (rx.T[:, None, :, None]
         * jnp.eye(Ci, dtype=jnp.float32)[None, :, None, :]).reshape(W * Ci, Wo * Ci)

    band_up = _band_weights(params["up_w"], Wo)                   # (3, Wo*Ci, Wo*Co)
    swu = jnp.einsum("ij,djk->dik", s, band_up, precision=hi)     # (3, W*Ci, Wo*Co)
    band1 = _band_weights(params["c1_w"], Wo)                     # (3, Wo*Co, Wo*Co)
    band2 = _band_weights(params["c2_w"], Wo)

    bu = jnp.tile(params["up_b"], Wo).reshape(1, Wo * Co)
    b1 = jnp.tile(params["c1_b"], Wo).reshape(1, Wo * Co)
    b2 = jnp.tile(params["c2_b"], Wo).reshape(1, Wo * Co)
    au = params["up_a"].reshape(1, 1)
    a1 = params["a1"].reshape(1, 1)
    a2 = params["a2"].reshape(1, 1)

    def const_spec(shape):
        return pl.BlockSpec(shape, lambda b, _s=shape: (0,) * len(_s))

    smem_spec = pl.BlockSpec(memory_space=pltpu.MemorySpace.SMEM)

    kernel = functools.partial(_upblock_kernel, H=H, W=W, Ci=Ci, Co=Co)

    out = pl.pallas_call(
        kernel,
        out_shape=jax.ShapeDtypeStruct((B, Ho, Wo * Co), jnp.float32),
        grid=(B,),
        in_specs=[
            pl.BlockSpec((1, H, W * Ci), lambda b: (b, 0, 0)),        # feat1 slab
            pl.BlockSpec((1, Ho, Wo * Co), lambda b: (b, 0, 0)),      # feat0 slab
            const_spec((3 * Ho, H)),                                   # stacked shifted Ry
            const_spec((3, W * Ci, Wo * Co)),                          # S @ band_up
            const_spec((1, Wo * Co)),                                  # up bias (tiled)
            const_spec((3, Wo * Co, Wo * Co)),                         # conv1 bands
            const_spec((1, Wo * Co)),                                  # conv1 bias
            const_spec((3, Wo * Co, Wo * Co)),                         # conv2 bands
            const_spec((1, Wo * Co)),                                  # conv2 bias
            smem_spec, smem_spec, smem_spec,                           # PReLU alphas
        ],
        out_specs=pl.BlockSpec((1, Ho, Wo * Co), lambda b: (b, 0, 0)),
        scratch_shapes=[
            pltpu.VMEM((Ho + 2, Wo * Co), jnp.float32),  # row-padded ResBlock activations
        ],
        compiler_params=pltpu.CompilerParams(dimension_semantics=("parallel",)),
    )(x1, x0, rs, swu, bu, band1, b1, band2, b2, au, a1, a2)

    out = out.reshape(B, Ho, Wo, Co)
    return jnp.transpose(out, (0, 3, 1, 2))              # back to NCHW


# --------------------------------------------------------------------------
# Pure-JAX reference (for correctness check)
# --------------------------------------------------------------------------

def upblock_reference(params, feat1_nchw, feat0_nchw):
    hi = jax.lax.Precision.HIGHEST
    x1 = jnp.transpose(feat1_nchw, (0, 2, 3, 1))
    x0 = jnp.transpose(feat0_nchw, (0, 2, 3, 1))
    B, H, W, Ci = x1.shape
    Ho, Wo = 2 * H, 2 * W
    ry = _upsample_matrix(H, Ho)
    rx = _upsample_matrix(W, Wo)
    u = jnp.einsum("oh,bhwc->bowc", ry, x1, precision=hi)
    u = jnp.einsum("pw,bowc->bopc", rx, u, precision=hi)

    def conv3x3(x, w, b):
        y = jax.lax.conv_general_dilated(
            x, w, window_strides=(1, 1), padding=((1, 1), (1, 1)),
            dimension_numbers=("NHWC", "HWIO", "NHWC"), precision=hi)
        return y + b

    prelu = lambda v, a: jnp.where(v >= 0.0, v, a * v)

    t = prelu(conv3x3(u, params["up_w"], params["up_b"]), params["up_a"]) + x0
    h = prelu(conv3x3(t, params["c1_w"], params["c1_b"]), params["a1"])
    h = conv3x3(h, params["c2_w"], params["c2_b"])
    out = prelu(h + t, params["a2"])
    return jnp.transpose(out, (0, 3, 1, 2))


# --------------------------------------------------------------------------
# Deterministic parameter initialization
# --------------------------------------------------------------------------

def init_params(key, in_ch, out_ch):
    ks = jax.random.split(key, 3)

    def conv_init(k, ci, co, scale=0.05):
        kw, kb = jax.random.split(k)
        w = jax.random.normal(kw, (3, 3, ci, co), jnp.float32) * scale
        b = jax.random.normal(kb, (co,), jnp.float32) * 0.01
        return w, b

    up_w, up_b = conv_init(ks[0], in_ch, out_ch)
    c1_w, c1_b = conv_init(ks[1], out_ch, out_ch)
    c2_w, c2_b = conv_init(ks[2], out_ch, out_ch)
    quarter = jnp.full((1,), 0.25, jnp.float32)        # PReLU default init
    return {
        "up_w": up_w, "up_b": up_b, "up_a": quarter,
        "c1_w": c1_w, "c1_b": c1_b, "a1": quarter,
        "c2_w": c2_w, "c2_b": c2_b, "a2": quarter,
    }


# --------------------------------------------------------------------------
# Main
# --------------------------------------------------------------------------

if __name__ == "__main__":
    key = jax.random.PRNGKey(0)
    k1, k0, kp = jax.random.split(key, 3)

    B, in_ch, out_ch, H, W = 2, 16, 8, 16, 16          # UpBlock(in_ch=16, out_ch=8)
    feat1 = jax.random.normal(k1, (B, in_ch, H, W), jnp.float32)
    feat0 = jax.random.normal(k0, (B, out_ch, 2 * H, 2 * W), jnp.float32)
    params = init_params(kp, in_ch, out_ch)

    fwd = jax.jit(lambda a, b: upblock_pallas(params, a, b))
    out = fwd(feat1, feat0)
    jax.block_until_ready(out)
    assert out.shape == (B, out_ch, 2 * H, 2 * W)

    ref = upblock_reference(params, feat1, feat0)
    err = float(jnp.max(jnp.abs(out - ref)))
    assert err < 2e-3, f"max abs error vs reference: {err}"

    print("KERNEL_OK")
</pallas_src>

<mosaic_0001>
module attributes {stable_mosaic.version = 11 : i64} {
  func.func @_upblock_kernel(%arg0: i32, %arg1: memref<1x16x256xf32, #tpu.memory_space<vmem>>, %arg2: memref<1x32x256xf32, #tpu.memory_space<vmem>>, %arg3: memref<96x16xf32, #tpu.memory_space<vmem>>, %arg4: memref<3x256x256xf32, #tpu.memory_space<vmem>>, %arg5: memref<1x256xf32, #tpu.memory_space<vmem>>, %arg6: memref<3x256x256xf32, #tpu.memory_space<vmem>>, %arg7: memref<1x256xf32, #tpu.memory_space<vmem>>, %arg8: memref<3x256x256xf32, #tpu.memory_space<vmem>>, %arg9: memref<1x256xf32, #tpu.memory_space<vmem>>, %arg10: memref<1x1xf32, #tpu.memory_space<smem>>, %arg11: memref<1x1xf32, #tpu.memory_space<smem>>, %arg12: memref<1x1xf32, #tpu.memory_space<smem>>, %arg13: memref<1x32x256xf32, #tpu.memory_space<vmem>>, %arg14: memref<34x256xf32, #tpu.memory_space<vmem>>) attributes {dimension_semantics = [#tpu.dimension_semantics<parallel>], iteration_bounds = array<i64: 2>, scalar_prefetch = 0 : i64, scratch_operands = 1 : i64, tpu.core_type = #tpu.core_type<tc>, window_params = [{transform_indices = @transform_0, window_bounds = array<i64: 1, 16, 256>}, {transform_indices = @transform_1, window_bounds = array<i64: 1, 32, 256>}, {pipeline_mode = #tpu.pipeline_mode<synchronous>, transform_indices = @transform_2, window_bounds = array<i64: 96, 16>}, {pipeline_mode = #tpu.pipeline_mode<synchronous>, transform_indices = @transform_3, window_bounds = array<i64: 3, 256, 256>}, {pipeline_mode = #tpu.pipeline_mode<synchronous>, transform_indices = @transform_4, window_bounds = array<i64: 1, 256>}, {pipeline_mode = #tpu.pipeline_mode<synchronous>, transform_indices = @transform_5, window_bounds = array<i64: 3, 256, 256>}, {pipeline_mode = #tpu.pipeline_mode<synchronous>, transform_indices = @transform_6, window_bounds = array<i64: 1, 256>}, {pipeline_mode = #tpu.pipeline_mode<synchronous>, transform_indices = @transform_7, window_bounds = array<i64: 3, 256, 256>}, {pipeline_mode = #tpu.pipeline_mode<synchronous>, transform_indices = @transform_8, window_bounds = array<i64: 1, 256>}, {transform_indices = @transform_9, window_bounds = array<i64: 1, 1>}, {transform_indices = @transform_10, window_bounds = array<i64: 1, 1>}, {transform_indices = @transform_11, window_bounds = array<i64: 1, 1>}, {transform_indices = @transform_12, window_bounds = array<i64: 1, 32, 256>}]} {
    %c0 = arith.constant 0 : index
    %c0_0 = arith.constant 0 : index
    %0 = memref.load %arg10[%c0, %c0_0] : memref<1x1xf32, #tpu.memory_space<smem>>
    %c0_1 = arith.constant 0 : index
    %c0_2 = arith.constant 0 : index
    %1 = memref.load %arg11[%c0_1, %c0_2] : memref<1x1xf32, #tpu.memory_space<smem>>
    %c0_3 = arith.constant 0 : index
    %c0_4 = arith.constant 0 : index
    %2 = memref.load %arg12[%c0_3, %c0_4] : memref<1x1xf32, #tpu.memory_space<smem>>
    %c0_5 = arith.constant 0 : index
    %c0_6 = arith.constant 0 : index
    %3 = vector.load %arg3[%c0_5, %c0_6] : memref<96x16xf32, #tpu.memory_space<vmem>>, vector<96x16xf32>
    %c0_7 = arith.constant 0 : index
    %c0_8 = arith.constant 0 : index
    %c0_9 = arith.constant 0 : index
    %4 = vector.load %arg1[%c0_7, %c0_8, %c0_9] : memref<1x16x256xf32, #tpu.memory_space<vmem>>, vector<1x16x256xf32>
    %5 = vector.shape_cast %4 : vector<1x16x256xf32> to vector<16x256xf32>
    %cst = arith.constant dense<0.000000e+00> : vector<96x256xf32>
    %6 = tpu.matmul %3, %5, %cst {dimension_numbers = #tpu.dot_dimension_numbers<[1], [0], [0], [1], [0, 0, 1, 1], [], []>} : vector<96x16xf32>, vector<16x256xf32>, vector<96x256xf32> -> vector<96x256xf32>
    %7 = vector.extract_strided_slice %6 {offsets = [0, 0], sizes = [32, 256], strides = [1, 1]} : vector<96x256xf32> to vector<32x256xf32>
    %c0_10 = arith.constant 0 : index
    %c0_11 = arith.constant 0 : index
    %c0_12 = arith.constant 0 : index
    %8 = vector.load %arg4[%c0_10, %c0_11, %c0_12] : memref<3x256x256xf32, #tpu.memory_space<vmem>>, vector<1x256x256xf32>
    %9 = vector.shape_cast %8 : vector<1x256x256xf32> to vector<256x256xf32>
    %cst_13 = arith.constant dense<0.000000e+00> : vector<32x256xf32>
    %10 = tpu.matmul %7, %9, %cst_13 {dimension_numbers = #tpu.dot_dimension_numbers<[1], [0], [0], [1], [0, 0, 1, 1], [], []>} : vector<32x256xf32>, vector<256x256xf32>, vector<32x256xf32> -> vector<32x256xf32>
    %11 = vector.extract_strided_slice %6 {offsets = [32, 0], sizes = [32, 256], strides = [1, 1]} : vector<96x256xf32> to vector<32x256xf32>
    %c1 = arith.constant 1 : index
    %c0_14 = arith.constant 0 : index
    %c0_15 = arith.constant 0 : index
    %12 = vector.load %arg4[%c1, %c0_14, %c0_15] : memref<3x256x256xf32, #tpu.memory_space<vmem>>, vector<1x256x256xf32>
    %13 = vector.shape_cast %12 : vector<1x256x256xf32> to vector<256x256xf32>
    %cst_16 = arith.constant dense<0.000000e+00> : vector<32x256xf32>
    %14 = tpu.matmul %11, %13, %cst_16 {dimension_numbers = #tpu.dot_dimension_numbers<[1], [0], [0], [1], [0, 0, 1, 1], [], []>} : vector<32x256xf32>, vector<256x256xf32>, vector<32x256xf32> -> vector<32x256xf32>
    %15 = arith.addf %10, %14 : vector<32x256xf32>
    %16 = vector.extract_strided_slice %6 {offsets = [64, 0], sizes = [32, 256], strides = [1, 1]} : vector<96x256xf32> to vector<32x256xf32>
    %c2 = arith.constant 2 : index
    %c0_17 = arith.constant 0 : index
    %c0_18 = arith.constant 0 : index
    %17 = vector.load %arg4[%c2, %c0_17, %c0_18] : memref<3x256x256xf32, #tpu.memory_space<vmem>>, vector<1x256x256xf32>
    %18 = vector.shape_cast %17 : vector<1x256x256xf32> to vector<256x256xf32>
    %cst_19 = arith.constant dense<0.000000e+00> : vector<32x256xf32>
    %19 = tpu.matmul %16, %18, %cst_19 {dimension_numbers = #tpu.dot_dimension_numbers<[1], [0], [0], [1], [0, 0, 1, 1], [], []>} : vector<32x256xf32>, vector<256x256xf32>, vector<32x256xf32> -> vector<32x256xf32>
    %20 = arith.addf %15, %19 : vector<32x256xf32>
    %c0_20 = arith.constant 0 : index
    %c0_21 = arith.constant 0 : index
    %21 = vector.load %arg5[%c0_20, %c0_21] : memref<1x256xf32, #tpu.memory_space<vmem>>, vector<1x256xf32>
    %22 = vector.broadcast %21 : vector<1x256xf32> to vector<32x256xf32>
    %23 = arith.addf %20, %22 : vector<32x256xf32>
    %cst_22 = arith.constant 0.000000e+00 : f32
    %24 = vector.broadcast %cst_22 : f32 to vector<32x256xf32>
    %25 = arith.cmpf oge, %23, %24 : vector<32x256xf32>
    %26 = vector.broadcast %0 : f32 to vector<32x256xf32>
    %27 = arith.mulf %26, %23 : vector<32x256xf32>
    %28 = arith.select %25, %23, %27 : vector<32x256xi1>, vector<32x256xf32>
    %c0_23 = arith.constant 0 : index
    %c0_24 = arith.constant 0 : index
    %c0_25 = arith.constant 0 : index
    %29 = vector.load %arg2[%c0_23, %c0_24, %c0_25] : memref<1x32x256xf32, #tpu.memory_space<vmem>>, vector<1x32x256xf32>
    %30 = vector.shape_cast %29 : vector<1x32x256xf32> to vector<32x256xf32>
    %31 = arith.addf %28, %30 : vector<32x256xf32>
    %cst_26 = arith.constant 0.000000e+00 : f32
    %32 = vector.broadcast %cst_26 : f32 to vector<1x256xf32>
    %c0_27 = arith.constant 0 : index
    %c0_28 = arith.constant 0 : index
    %33 = vector.load %arg14[%c0_27, %c0_28] : memref<34x256xf32, #tpu.memory_space<vmem>>, vector<1x256xf32>
    tpu.vector_store %arg14[%c0_27, %c0_28], %32 {strides = array<i32>} : memref<34x256xf32, #tpu.memory_space<vmem>>, vector<1x256xf32>,
    %c33 = arith.constant 33 : index
    %c0_29 = arith.constant 0 : index
    %34 = vector.load %arg14[%c33, %c0_29] : memref<34x256xf32, #tpu.memory_space<vmem>>, vector<1x256xf32>
    tpu.vector_store %arg14[%c33, %c0_29], %32 {strides = array<i32>} : memref<34x256xf32, #tpu.memory_space<vmem>>, vector<1x256xf32>,
    %c1_30 = arith.constant 1 : index
    %c0_31 = arith.constant 0 : index
    %35 = vector.load %arg14[%c1_30, %c0_31] : memref<34x256xf32, #tpu.memory_space<vmem>>, vector<32x256xf32>
    tpu.vector_store %arg14[%c1_30, %c0_31], %31 {strides = array<i32>} : memref<34x256xf32, #tpu.memory_space<vmem>>, vector<32x256xf32>,
    %c0_32 = arith.constant 0 : index
    %c0_33 = arith.constant 0 : index
    %36 = vector.load %arg14[%c0_32, %c0_33] : memref<34x256xf32, #tpu.memory_space<vmem>>, vector<32x256xf32>
    %c0_34 = arith.constant 0 : index
    %c0_35 = arith.constant 0 : index
    %c0_36 = arith.constant 0 : index
    %37 = vector.load %arg6[%c0_34, %c0_35, %c0_36] : memref<3x256x256xf32, #tpu.memory_space<vmem>>, vector<1x256x256xf32>
    %38 = vector.shape_cast %37 : vector<1x256x256xf32> to vector<256x256xf32>
    %cst_37 = arith.constant dense<0.000000e+00> : vector<32x256xf32>
    %39 = tpu.matmul %36, %38, %cst_37 {dimension_numbers = #tpu.dot_dimension_numbers<[1], [0], [0], [1], [0, 0, 1, 1], [], []>} : vector<32x256xf32>, vector<256x256xf32>, vector<32x256xf32> -> vector<32x256xf32>
    %c1_38 = arith.constant 1 : index
    %c0_39 = arith.constant 0 : index
    %40 = vector.load %arg14[%c1_38, %c0_39] : memref<34x256xf32, #tpu.memory_space<vmem>>, vector<32x256xf32>
    %c1_40 = arith.constant 1 : index
    %c0_41 = arith.constant 0 : index
    %c0_42 = arith.constant 0 : index
    %41 = vector.load %arg6[%c1_40, %c0_41, %c0_42] : memref<3x256x256xf32, #tpu.memory_space<vmem>>, vector<1x256x256xf32>
    %42 = vector.shape_cast %41 : vector<1x256x256xf32> to vector<256x256xf32>
    %cst_43 = arith.constant dense<0.000000e+00> : vector<32x256xf32>
    %43 = tpu.matmul %40, %42, %cst_43 {dimension_numbers = #tpu.dot_dimension_numbers<[1], [0], [0], [1], [0, 0, 1, 1], [], []>} : vector<32x256xf32>, vector<256x256xf32>, vector<32x256xf32> -> vector<32x256xf32>
    %44 = arith.addf %39, %43 : vector<32x256xf32>
    %c2_44 = arith.constant 2 : index
    %c0_45 = arith.constant 0 : index
    %45 = vector.load %arg14[%c2_44, %c0_45] : memref<34x256xf32, #tpu.memory_space<vmem>>, vector<32x256xf32>
    %c2_46 = arith.constant 2 : index
    %c0_47 = arith.constant 0 : index
    %c0_48 = arith.constant 0 : index
    %46 = vector.load %arg6[%c2_46, %c0_47, %c0_48] : memref<3x256x256xf32, #tpu.memory_space<vmem>>, vector<1x256x256xf32>
    %47 = vector.shape_cast %46 : vector<1x256x256xf32> to vector<256x256xf32>
    %cst_49 = arith.constant dense<0.000000e+00> : vector<32x256xf32>
    %48 = tpu.matmul %45, %47, %cst_49 {dimension_numbers = #tpu.dot_dimension_numbers<[1], [0], [0], [1], [0, 0, 1, 1], [], []>} : vector<32x256xf32>, vector<256x256xf32>, vector<32x256xf32> -> vector<32x256xf32>
    %49 = arith.addf %44, %48 : vector<32x256xf32>
    %c0_50 = arith.constant 0 : index
    %c0_51 = arith.constant 0 : index
    %50 = vector.load %arg7[%c0_50, %c0_51] : memref<1x256xf32, #tpu.memory_space<vmem>>, vector<1x256xf32>
    %51 = vector.broadcast %50 : vector<1x256xf32> to vector<32x256xf32>
    %52 = arith.addf %49, %51 : vector<32x256xf32>
    %cst_52 = arith.constant 0.000000e+00 : f32
    %53 = vector.broadcast %cst_52 : f32 to vector<32x256xf32>
    %54 = arith.cmpf oge, %52, %53 : vector<32x256xf32>
    %55 = vector.broadcast %1 : f32 to vector<32x256xf32>
    %56 = arith.mulf %55, %52 : vector<32x256xf32>
    %57 = arith.select %54, %52, %56 : vector<32x256xi1>, vector<32x256xf32>
    %c1_53 = arith.constant 1 : index
    %c0_54 = arith.constant 0 : index
    %58 = vector.load %arg14[%c1_53, %c0_54] : memref<34x256xf32, #tpu.memory_space<vmem>>, vector<32x256xf32>
    tpu.vector_store %arg14[%c1_53, %c0_54], %57 {strides = array<i32>} : memref<34x256xf32, #tpu.memory_space<vmem>>, vector<32x256xf32>,
    %c0_55 = arith.constant 0 : index
    %c0_56 = arith.constant 0 : index
    %59 = vector.load %arg14[%c0_55, %c0_56] : memref<34x256xf32, #tpu.memory_space<vmem>>, vector<32x256xf32>
    %c0_57 = arith.constant 0 : index
    %c0_58 = arith.constant 0 : index
    %c0_59 = arith.constant 0 : index
    %60 = vector.load %arg8[%c0_57, %c0_58, %c0_59] : memref<3x256x256xf32, #tpu.memory_space<vmem>>, vector<1x256x256xf32>
    %61 = vector.shape_cast %60 : vector<1x256x256xf32> to vector<256x256xf32>
    %cst_60 = arith.constant dense<0.000000e+00> : vector<32x256xf32>
    %62 = tpu.matmul %59, %61, %cst_60 {dimension_numbers = #tpu.dot_dimension_numbers<[1], [0], [0], [1], [0, 0, 1, 1], [], []>} : vector<32x256xf32>, vector<256x256xf32>, vector<32x256xf32> -> vector<32x256xf32>
    %c1_61 = arith.constant 1 : index
    %c0_62 = arith.constant 0 : index
    %63 = vector.load %arg14[%c1_61, %c0_62] : memref<34x256xf32, #tpu.memory_space<vmem>>, vector<32x256xf32>
    %c1_63 = arith.constant 1 : index
    %c0_64 = arith.constant 0 : index
    %c0_65 = arith.constant 0 : index
    %64 = vector.load %arg8[%c1_63, %c0_64, %c0_65] : memref<3x256x256xf32, #tpu.memory_space<vmem>>, vector<1x256x256xf32>
    %65 = vector.shape_cast %64 : vector<1x256x256xf32> to vector<256x256xf32>
    %cst_66 = arith.constant dense<0.000000e+00> : vector<32x256xf32>
    %66 = tpu.matmul %63, %65, %cst_66 {dimension_numbers = #tpu.dot_dimension_numbers<[1], [0], [0], [1], [0, 0, 1, 1], [], []>} : vector<32x256xf32>, vector<256x256xf32>, vector<32x256xf32> -> vector<32x256xf32>
    %67 = arith.addf %62, %66 : vector<32x256xf32>
    %c2_67 = arith.constant 2 : index
    %c0_68 = arith.constant 0 : index
    %68 = vector.load %arg14[%c2_67, %c0_68] : memref<34x256xf32, #tpu.memory_space<vmem>>, vector<32x256xf32>
    %c2_69 = arith.constant 2 : index
    %c0_70 = arith.constant 0 : index
    %c0_71 = arith.constant 0 : index
    %69 = vector.load %arg8[%c2_69, %c0_70, %c0_71] : memref<3x256x256xf32, #tpu.memory_space<vmem>>, vector<1x256x256xf32>
    %70 = vector.shape_cast %69 : vector<1x256x256xf32> to vector<256x256xf32>
    %cst_72 = arith.constant dense<0.000000e+00> : vector<32x256xf32>
    %71 = tpu.matmul %68, %70, %cst_72 {dimension_numbers = #tpu.dot_dimension_numbers<[1], [0], [0], [1], [0, 0, 1, 1], [], []>} : vector<32x256xf32>, vector<256x256xf32>, vector<32x256xf32> -> vector<32x256xf32>
    %72 = arith.addf %67, %71 : vector<32x256xf32>
    %c0_73 = arith.constant 0 : index
    %c0_74 = arith.constant 0 : index
    %73 = vector.load %arg9[%c0_73, %c0_74] : memref<1x256xf32, #tpu.memory_space<vmem>>, vector<1x256xf32>
    %74 = vector.broadcast %73 : vector<1x256xf32> to vector<32x256xf32>
    %75 = arith.addf %72, %74 : vector<32x256xf32>
    %76 = arith.addf %75, %31 : vector<32x256xf32>
    %cst_75 = arith.constant 0.000000e+00 : f32
    %77 = vector.broadcast %cst_75 : f32 to vector<32x256xf32>
    %78 = arith.cmpf oge, %76, %77 : vector<32x256xf32>
    %79 = vector.broadcast %2 : f32 to vector<32x256xf32>
    %80 = arith.mulf %79, %76 : vector<32x256xf32>
    %81 = arith.select %78, %76, %80 : vector<32x256xi1>, vector<32x256xf32>
    %c0_76 = arith.constant 0 : index
    %c0_77 = arith.constant 0 : index
    %c0_78 = arith.constant 0 : index
    %82 = vector.load %arg13[%c0_76, %c0_77, %c0_78] : memref<1x32x256xf32, #tpu.memory_space<vmem>>, vector<1x32x256xf32>
    %83 = vector.shape_cast %82 : vector<1x32x256xf32> to vector<32x256xf32>
    %84 = vector.shape_cast %81 : vector<32x256xf32> to vector<1x32x256xf32>
    tpu.vector_store %arg13[%c0_76, %c0_77, %c0_78], %84 {strides = array<i32>} : memref<1x32x256xf32, #tpu.memory_space<vmem>>, vector<1x32x256xf32>,
    return
  }
  func.func @transform_0(%arg0: i32) -> (i32, i32, i32) {
    %c0_i32 = arith.constant 0 : i32
    %c0_i32_0 = arith.constant 0 : i32
    %c0_i32_1 = arith.constant 0 : i32
    return %arg0, %c0_i32, %c0_i32_0 : i32, i32, i32
  }
  func.func @transform_1(%arg0: i32) -> (i32, i32, i32) {
    %c0_i32 = arith.constant 0 : i32
    %c0_i32_0 = arith.constant 0 : i32
    %c0_i32_1 = arith.constant 0 : i32
    return %arg0, %c0_i32, %c0_i32_0 : i32, i32, i32
  }
  func.func @transform_2(%arg0: i32) -> (i32, i32) {
    %c0_i32 = arith.constant 0 : i32
    %c0_i32_0 = arith.constant 0 : i32
    %c0_i32_1 = arith.constant 0 : i32
    return %c0_i32, %c0_i32_0 : i32, i32
  }
  func.func @transform_3(%arg0: i32) -> (i32, i32, i32) {
    %c0_i32 = arith.constant 0 : i32
    %c0_i32_0 = arith.constant 0 : i32
    %c0_i32_1 = arith.constant 0 : i32
    %c0_i32_2 = arith.constant 0 : i32
    return %c0_i32, %c0_i32_0, %c0_i32_1 : i32, i32, i32
  }
  func.func @transform_4(%arg0: i32) -> (i32, i32) {
    %c0_i32 = arith.constant 0 : i32
    %c0_i32_0 = arith.constant 0 : i32
    %c0_i32_1 = arith.constant 0 : i32
    return %c0_i32, %c0_i32_0 : i32, i32
  }
  func.func @transform_5(%arg0: i32) -> (i32, i32, i32) {
    %c0_i32 = arith.constant 0 : i32
    %c0_i32_0 = arith.constant 0 : i32
    %c0_i32_1 = arith.constant 0 : i32
    %c0_i32_2 = arith.constant 0 : i32
    return %c0_i32, %c0_i32_0, %c0_i32_1 : i32, i32, i32
  }
  func.func @transform_6(%arg0: i32) -> (i32, i32) {
    %c0_i32 = arith.constant 0 : i32
    %c0_i32_0 = arith.constant 0 : i32
    %c0_i32_1 = arith.constant 0 : i32
    return %c0_i32, %c0_i32_0 : i32, i32
  }
  func.func @transform_7(%arg0: i32) -> (i32, i32, i32) {
    %c0_i32 = arith.constant 0 : i32
    %c0_i32_0 = arith.constant 0 : i32
    %c0_i32_1 = arith.constant 0 : i32
    %c0_i32_2 = arith.constant 0 : i32
    return %c0_i32, %c0_i32_0, %c0_i32_1 : i32, i32, i32
  }
  func.func @transform_8(%arg0: i32) -> (i32, i32) {
    %c0_i32 = arith.constant 0 : i32
    %c0_i32_0 = arith.constant 0 : i32
    %c0_i32_1 = arith.constant 0 : i32
    return %c0_i32, %c0_i32_0 : i32, i32
  }
  func.func @transform_9(%arg0: i32) -> (i32, i32) {
    %c0_i32 = arith.constant 0 : i32
    %c0_i32_0 = arith.constant 0 : i32
    %c0_i32_1 = arith.constant 0 : i32
    return %c0_i32, %c0_i32_0 : i32, i32
  }
  func.func @transform_10(%arg0: i32) -> (i32, i32) {
    %c0_i32 = arith.constant 0 : i32
    %c0_i32_0 = arith.constant 0 : i32
    %c0_i32_1 = arith.constant 0 : i32
    return %c0_i32, %c0_i32_0 : i32, i32
  }
  func.func @transform_11(%arg0: i32) -> (i32, i32) {
    %c0_i32 = arith.constant 0 : i32
    %c0_i32_0 = arith.constant 0 : i32
    %c0_i32_1 = arith.constant 0 : i32
    return %c0_i32, %c0_i32_0 : i32, i32
  }
  func.func @transform_12(%arg0: i32) -> (i32, i32, i32) {
    %c0_i32 = arith.constant 0 : i32
    %c0_i32_0 = arith.constant 0 : i32
    %c0_i32_1 = arith.constant 0 : i32
    return %arg0, %c0_i32, %c0_i32_0 : i32, i32, i32
  }
}

</mosaic_0001>

<bundles_post_ra>
// kernel: tile.14
= control target key start
LH: loop header
LB: loop body
LE: loop exit
PB: predicated region body
PF: predicated region fallthrough
CT: control target
= control target key end

     0   :  { %s40_s0 = inlined_call_operand.vmem [shape: f32[8], index: 0, kind: input, shape index: {}]   ;;  %s41_s1 = inlined_call_operand.vmem [shape: f32[32,8], index: 1, kind: output, shape index: {}]  }
   0x1   :  { %v4_v0 = vld [vmem:[%s40_s0] ss:$0 sm:$0xff] }
   0x2   :  { %5 = vst [vmem:[%s41_s1] sm:$0xff] %v4_v0  ;;  %12 = vst [vmem:[%s41_s1 + $0x8] sm:$0xff] %v4_v0 }
   0x3   :  { %13 = vst [vmem:[%s41_s1 + $0x10] sm:$0xff] %v4_v0  ;;  %14 = vst [vmem:[%s41_s1 + $0x18] sm:$0xff] %v4_v0 }

// kernel: tile.15
= control target key start
LH: loop header
LB: loop body
LE: loop exit
PB: predicated region body
PF: predicated region fallthrough
CT: control target
= control target key end

     0   :  { %s7_s6 = smov 3  ;;  %s21_s9 = smov 3  ;;  %vm4_vm0 = vcmask 64512   ;;  %vm11_vm1 = vcmask 1048512   ;;  %vm18_vm2 = vcmask 982912   ;;  %vm25_vm3 = vcmask 917312   ;;  %s232_s0 = inlined_call_operand.vmem [shape: f32[32,8], index: 0, kind: input, shape index: {}]   ;;  %s233_s1 = inlined_call_operand.vmem [shape: f32[1,256], index: 1, kind: output, shape index: {}]  }
   0x1   :  { %v122_v0 = vld [vmem:[%s232_s0 + $0xf] ss:$16 sm:%s7_s6]   ;;  %s153_s10 = smov 120   ;;  %v124_v1 = vld [vmem:[%s232_s0 + $0xd] ss:$16 sm:%s21_s9]   ;;  %s14_s13 = smov 3 }
   0x2   :  { %9 = vrot.lane.b32.xlu0 %v122_v0, %s153_s10  ;;  %s154_s14 = smov 104   ;;  %v123_v2 = vld [vmem:[%s232_s0 + $0xe] ss:$16 sm:%s14_s13]   ;;  %s28_s17 = smov 3  ;;  %vm32_vm4 = vcmask 851712   ;;  %vm39_vm5 = vcmask 786112  }
   0x3   :  { %23 = vrot.lane.b32.xlu1 %v124_v1, %s154_s14  ;;  %v125_v3 = vld [vmem:[%s232_s0 + $0xc] ss:$16 sm:%s28_s17]   ;;  %s35_s20 = smov 3  ;;  %s42_s21 = smov 3  ;;  %vm46_vm6 = vcmask 720512   ;;  %vm53_vm7 = vcmask 654912  }
   0x4   :  { %s155_s22 = smov 112   ;;  %s156_s23 = smov 96   ;;  %v126_v4 = vld [vmem:[%s232_s0 + $0xb] ss:$16 sm:%s35_s20]   ;;  %v127_v5 = vld [vmem:[%s232_s0 + $0xa] ss:$16 sm:%s42_s21]  }
   0x5   :  { %s49_s28 = smov 3  ;;  %s56_s29 = smov 3  ;;  %vm60_vm8 = vcmask 589312   ;;  %vm67_vm9 = vcmask 523712   ;;  %vm74_vm10 = vcmask 458112   ;;  %vm81_vm11 = vcmask 392512  }
   0x6   :  { %16 = vrot.lane.b32.xlu0 %v123_v2, %s155_s22  ;;  %s157_s30 = smov 88   ;;  %s158_s2 = smov 80   ;;  %v128_v6 = vld [vmem:[%s232_s0 + $0x9] ss:$16 sm:%s49_s28]   ;;  %vm88_vm12 = vcmask 326912   ;;  %vm95_vm13 = vcmask 261312  }
   0x7   :  { %30 = vrot.lane.b32.xlu1 %v125_v3, %s156_s23  ;;  %v129_v7 = vld [vmem:[%s232_s0 + $0x8] ss:$16 sm:%s56_s29]   ;;  %s63_s7 = smov 3  ;;  %s70_s8 = smov 3  ;;  %vm102_vm14 = vcmask 195712   ;;  %vm109_vm15 = vcmask 130112  }
   0x8   :  { %s159_s9 = smov 72   ;;  %s160_s10 = smov 64   ;;  %v130_v8 = vld [vmem:[%s232_s0 + $0x7] ss:$16 sm:%s63_s7]   ;;  %v131_v9 = vld [vmem:[%s232_s0 + $0x6] ss:$16 sm:%s70_s8]  }
   0x9   :  { %s2_s13 = smov 3  ;;  %s77_s16 = smov 3 }
   0xa   :  { %37 = vrot.lane.b32.xlu0 %v126_v4, %s157_s30  ;;  %v3_v10 = vld [vmem:[%s232_s0] ss:$16 sm:%s2_s13]   ;;  %s84_s19 = smov 3  ;;  %s161_s20 = smov 56  }
   0xb   :  { %44 = vrot.lane.b32.xlu1 %v127_v5, %s158_s2  ;;  %5 = vst.msk [vmem:[#allocation0] ss:$8 sm:$0x3] %vm4_vm0, %v3_v10   ;;  %s162_s21 = smov 48   ;;  %v132_v11 = vld [vmem:[%s232_s0 + $0x5] ss:$16 sm:%s77_s16]  }
   0xc   :  { %v133_v12 = vld [vmem:[%s232_s0 + $0x4] ss:$16 sm:%s84_s19]   ;;  %s91_s26 = smov 3  ;;  %s98_s27 = smov 3 }
   0xd   :  { %s163_s28 = smov 40   ;;  %s164_s29 = smov 32   ;;  %v134_v13 = vld [vmem:[%s232_s0 + $0x3] ss:$16 sm:%s91_s26]   ;;  %v135_v14 = vld [vmem:[%s232_s0 + $0x2] ss:$16 sm:%s98_s27]  }
   0xe   :  { %51 = vrot.lane.b32.xlu0 %v128_v6, %s159_s9  ;;  %s105_s5 = smov 3  ;;  %s165_s6 = smov 24  }
   0xf   :  { %58 = vrot.lane.b32.xlu1 %v129_v7, %s160_s10  ;;  %s166_s7 = smov 16   ;;  %v136_v15 = vld [vmem:[%s232_s0 + $0x1] ss:$16 sm:%s105_s5]   ;;  %s167_s0 = smov 8  }
  0x12   :  { %65 = vrot.lane.b32.xlu0 %v130_v8, %s161_s20 }
  0x13   :  { %72 = vrot.lane.b32.xlu1 %v131_v9, %s162_s21 }
  0x16   :  { %79 = vrot.lane.b32.xlu0 %v132_v11, %s163_s28 }
  0x17   :  { %86 = vrot.lane.b32.xlu1 %v133_v12, %s164_s29 }
  0x1a   :  { %93 = vrot.lane.b32.xlu0 %v134_v13, %s165_s6 }
  0x1b   :  { %100 = vrot.lane.b32.xlu1 %v135_v14, %s166_s7 }
  0x1e   :  { %107 = vrot.lane.b32.xlu0 %v136_v15, %s167_s0 }
  0x74   :  { %v10_v16 = vpop.permute.xlu0 %9  }
  0x75   :  { %12 = vst.msk [vmem:[#allocation0] ss:$8 sm:$0x3] %vm11_vm1, %v10_v16   ;;  %v24_v17 = vpop.permute.xlu1 %23  }
  0x78   :  { %v17_v18 = vpop.permute.xlu0 %16  }
  0x79   :  { %19 = vst.msk [vmem:[#allocation0] ss:$8 sm:$0x3] %vm18_vm2, %v17_v18   ;;  %v31_v19 = vpop.permute.xlu1 %30  }
  0x7a   :  { %26 = vst.msk [vmem:[#allocation0] ss:$8 sm:$0x3] %vm25_vm3, %v24_v17  }
  0x7b   :  { %33 = vst.msk [vmem:[#allocation0] ss:$8 sm:$0x3] %vm32_vm4, %v31_v19  }
  0x7c   :  { %v38_v20 = vpop.permute.xlu0 %37  }
  0x7d   :  { %40 = vst.msk [vmem:[#allocation0] ss:$8 sm:$0x3] %vm39_vm5, %v38_v20   ;;  %v45_v21 = vpop.permute.xlu1 %44  }
  0x7e   :  { %47 = vst.msk [vmem:[#allocation0] ss:$8 sm:$0x3] %vm46_vm6, %v45_v21  }
  0x80   :  { %v52_v22 = vpop.permute.xlu0 %51  }
  0x81   :  { %54 = vst.msk [vmem:[#allocation0] ss:$8 sm:$0x3] %vm53_vm7, %v52_v22   ;;  %v59_v23 = vpop.permute.xlu1 %58  }
  0x82   :  { %61 = vst.msk [vmem:[#allocation0] ss:$8 sm:$0x3] %vm60_vm8, %v59_v23  }
  0x84   :  { %v66_v24 = vpop.permute.xlu0 %65  }
  0x85   :  { %68 = vst.msk [vmem:[#allocation0] ss:$8 sm:$0x3] %vm67_vm9, %v66_v24   ;;  %v73_v25 = vpop.permute.xlu1 %72  }
  0x86   :  { %75 = vst.msk [vmem:[#allocation0] ss:$8 sm:$0x3] %vm74_vm10, %v73_v25  }
  0x88   :  { %v80_v26 = vpop.permute.xlu0 %79  }
  0x89   :  { %82 = vst.msk [vmem:[#allocation0] ss:$8 sm:$0x3] %vm81_vm11, %v80_v26   ;;  %v87_v27 = vpop.permute.xlu1 %86  }
  0x8a   :  { %89 = vst.msk [vmem:[#allocation0] ss:$8 sm:$0x3] %vm88_vm12, %v87_v27  }
  0x8c   :  { %v94_v28 = vpop.permute.xlu0 %93  }
  0x8d   :  { %96 = vst.msk [vmem:[#allocation0] ss:$8 sm:$0x3] %vm95_vm13, %v94_v28   ;;  %v101_v29 = vpop.permute.xlu1 %100  }
  0x8e   :  { %103 = vst.msk [vmem:[#allocation0] ss:$8 sm:$0x3] %vm102_vm14, %v101_v29  }
  0x90   :  { %v108_v30 = vpop.permute.xlu0 %107  }
  0x91   :  { %110 = vst.msk [vmem:[#allocation0] ss:$8 sm:$0x3] %vm109_vm15, %v108_v30  }
  0x98   :  { %v114_v31 = vld [vmem:[#allocation0] sm:$0x1]  ;;  %v118_v32 = vld [vmem:[#allocation0 + $0x8] sm:$0x1] }
  0x99   :  { %116 = vst [vmem:[%s233_s1] sm:$0x1] %v114_v31  ;;  %137 = vst [vmem:[%s233_s1 + $0x1] sm:$0x1] %v118_v32 }

// kernel: _lambda_.1
= control target key start
LH: loop header
LB: loop body
LE: loop exit
PB: predicated region body
PF: predicated region fallthrough
CT: control target
= control target key end

     0   :  { %s3695_s27 = smov 0   ;;  %s5856_s0 = inlined_call_operand.vmem [shape: f32[2,16,256], index: 0, kind: input, shape index: {}]   ;;  %s5857_s1 = inlined_call_operand.vmem [shape: f32[2,32,256], index: 1, kind: input, shape index: {}]   ;;  %s5858_s2 = inlined_call_operand.vmem [shape: f32[96,16], index: 2, kind: input, shape index: {}]   ;;  %s5859_s3 = inlined_call_operand.vmem [shape: f32[3,256,256], index: 3, kind: input, shape index: {}]   ;;  %s5860_s4 = inlined_call_operand.vmem [shape: f32[1,256], index: 4, kind: input, shape index: {}]   ;;  %s5861_s5 = inlined_call_operand.vmem [shape: f32[3,256,256], index: 5, kind: input, shape index: {}]   ;;  %s5862_s6 = inlined_call_operand.vmem [shape: f32[1,256], index: 6, kind: input, shape index: {}]   ;;  %s5863_s7 = inlined_call_operand.vmem [shape: f32[3,256,256], index: 7, kind: input, shape index: {}]   ;;  %s5864_s8 = inlined_call_operand.vmem [shape: f32[1,256], index: 8, kind: input, shape index: {}]   ;;  %s5865_s9 = inlined_call_operand.<no memory space> [shape: f32[1,1], index: 9, kind: input, shape index: {}, may-alias: {9,10,11}]   ;;  %s5866_s10 = inlined_call_operand.<no memory space> [shape: f32[1,1], index: 10, kind: input, shape index: {}, may-alias: {9,10,11}]   ;;  %s5867_s11 = inlined_call_operand.<no memory space> [shape: f32[1,1], index: 11, kind: input, shape index: {}, may-alias: {9,10,11}]   ;;  %s5868_s12 = inlined_call_operand.vmem [shape: f32[2,32,256], index: 12, kind: output, shape index: {}]  }
   0x1   :  { %17 = sst [smem:[#allocation3]] %s5865_s9 }
   0x2   :  { %18 = sst [smem:[#allocation4]] %s5866_s10 }
   0x3   :  { %19 = sst [smem:[#allocation5]] %s5867_s11 }
   0x4 LB: > { %s2531_s28 = sadd.s32 4294967295, %s3618_s27   ;;  %p2535_p0 = scmp.ge.s32.totalorder %s3618_s27, 1  ;;  %s3618_s27 = sphi %s3695_s27, %s25_s27  }
   0x5   : > { %p375_p1 = scmp.lt.s32.totalorder %s3618_s27, 3 }
   0x7   : > { %p376_p2 = pnand %p2535_p0, %p375_p1 }
   0x9   : > { %379 = sbr.rel (%p376_p2) target bundleno = 1259 (0x4eb), region = 68 }
  0x10   : > { %p422_p3 = scmp.lt.s32.totalorder %s2531_s28, 1  ;;  %v3620_v0 = vmov 0.0   ;;  %v631_v1 = vld [vmem:[%s5859_s3 + $0x8] sm:$0xff]  ;;  %v633_v2 = vld [vmem:[%s5859_s3 + $0x18] sm:$0xff]  ;;  %v630_v3 = vld [vmem:[%s5859_s3] sm:$0xff]  ;;  %vm456_vm0 = vcmask 130048  }
  0x11   : > { %557 = vmatprep.mubr.f32.mxu0 %v3620_v0  ;;  %v3011_v4 = vpack.c.bf16 %v633_v2, %v631_v1  ;;  %v632_v5 = vld [vmem:[%s5859_s3 + $0x10] sm:$0xff]  ;;  %v635_v6 = vld [vmem:[%s5859_s3 + $0x28] sm:$0xff]  ;;  %v637_v7 = vld [vmem:[%s5859_s3 + $0x38] sm:$0xff]  ;;  %s437_s20 = sld [smem:[#allocation3]]  ;;  %vm1177_vm7 = vcmask 1040384   ;;  %vm1363_vm11 = vcmask 1046528  }
  0x12   : > { %s5896_s28 = smov (!%p422_p3, %s2531_s28), 1  ;;  %v3013_v11 = vpack.c.bf16 %v632_v5, %v630_v3  ;;  %v3015_v12 = vpack.c.bf16 %v637_v7, %v635_v6  ;;  %v634_v15 = vld [vmem:[%s5859_s3 + $0x20] sm:$0xff]  ;;  %v636_v16 = vld [vmem:[%s5859_s3 + $0x30] sm:$0xff]  ;;  %v639_v19 = vld [vmem:[%s5859_s3 + $0x48] sm:$0xff]  ;;  %vm1641_vm12 = vcmask 1045504   ;;  %s438_s16 = sld [smem:[#allocation4]] }
  0x13   : > { %s2940_s9 = sshll.u32 %s5896_s28, 5  ;;  %3012 = vmatprep.subr.bf16.mxu1 %v3011_v4  ;;  %v3017_v18 = vpack.c.bf16 %v636_v16, %v634_v15  ;;  %v641_v20 = vld [vmem:[%s5859_s3 + $0x58] sm:$0xff]  ;;  %v638_v22 = vld [vmem:[%s5859_s3 + $0x40] sm:$0xff]  ;;  %v640_v23 = vld [vmem:[%s5859_s3 + $0x50] sm:$0xff]  ;;  %s2941_s23 = sshll.u32 %s5896_s28, 6 }
  0x14   : > { %s426_s17 = scalar_lea.vmem %s5856_s0, %s2940_s9  ;;  %3014 = vmatpush1.bf16.msra.mxu1 %v3013_v11  ;;  %v3019_v21 = vpack.c.bf16 %v641_v20, %v639_v19  ;;  %v440_v24 = vld [vmem:[%s5858_s2] sm:$0xff]  ;;  %v643_v25 = vld [vmem:[%s5859_s3 + $0x68] sm:$0xff]  ;;  %v645_v26 = vld [vmem:[%s5859_s3 + $0x78] sm:$0xff]  ;;  %v3021_v27 = vpack.c.bf16 %v640_v23, %v638_v22  ;;  %s4565_s26 = scalar_lea.vmem %s5857_s1, %s2941_s23 }
  0x15   : > { %v453_v8 = vld [vmem:[%s426_s17 + $0x8] sm:$0xff]  ;;  %v455_v9 = vld [vmem:[%s426_s17 + $0x18] sm:$0xff]  ;;  %v452_v10 = vld [vmem:[%s426_s17] sm:$0xff]  ;;  %3016 = vmatprep.subr.bf16.mxu1 %v3015_v12  ;;  %v3023_v28 = vpack.c.bf16 %v645_v26, %v643_v25  ;;  %s5837_s22 = scalar_lea.vmem %s5868_s12, %s2941_s23 }
  0x16   : > { %v2943_v13 = vpack.c.bf16 %v455_v9, %v453_v8  ;;  %v454_v14 = vld [vmem:[%s426_s17 + $0x10] sm:$0xff]  ;;  %v642_v29 = vld [vmem:[%s5859_s3 + $0x60] sm:$0xff]  ;;  %v441_v31 = vld [vmem:[%s5858_s2 + $0x8] sm:$0xff]  ;;  %s439_s17 = sld [smem:[#allocation5]] }
  0x17   : > { %v2945_v17 = vpack.c.bf16 %v454_v14, %v452_v10  ;;  %v644_v30 = vld [vmem:[%s5859_s3 + $0x70] sm:$0xff]  ;;  %v647_v32 = vld [vmem:[%s5859_s3 + $0x88] sm:$0xff]  ;;  %v649_v33 = vld [vmem:[%s5859_s3 + $0x98] sm:$0xff] }
  0x18   : > { %2944 = vmatprep.subr.bf16.mxu0 %v2943_v13  ;;  %3018 = vmatpush1.bf16.msra.mxu1 %v3017_v18  ;;  %v3025_v34 = vpack.c.bf16 %v644_v30, %v642_v29  ;;  %v3027_v35 = vpack.c.bf16 %v649_v33, %v647_v32  ;;  %v646_v36 = vld [vmem:[%s5859_s3 + $0x80] sm:$0xff]  ;;  %v648_v37 = vld [vmem:[%s5859_s3 + $0x90] sm:$0xff]  ;;  %v651_v39 = vld [vmem:[%s5859_s3 + $0xa8] sm:$0xff] }
  0x19   : > { %2946 = vmatpush1.bf16.msra.mxu0 %v2945_v17  ;;  %3020 = vmatprep.subr.bf16.mxu1 %v3019_v21  ;;  %v442_v38 = vld [vmem:[%s5858_s2 + $0x10] sm:$0xff]  ;;  %v653_v40 = vld [vmem:[%s5859_s3 + $0xb8] sm:$0xff]  ;;  %v3029_v42 = vpack.c.bf16 %v648_v37, %v646_v36  ;;  %v650_v43 = vld [vmem:[%s5859_s3 + $0xa0] sm:$0xff] }
  0x1a   : > { %v443_v41 = vld [vmem:[%s5858_s2 + $0x18] sm:$0xff]  ;;  %v2555_v44 = vld [vmem:[%s5859_s3 + $0x208] sm:$0xff]  ;;  %v3031_v45 = vpack.c.bf16 %v653_v40, %v651_v39  ;;  %v652_v46 = vld [vmem:[%s5859_s3 + $0xb0] sm:$0xff] }
  0x1b   : > { %v655_v47 = vld [vmem:[%s5859_s3 + $0xc8] sm:$0xff]  ;;  %v2557_v48 = vld [vmem:[%s5859_s3 + $0x218] sm:$0xff]  ;;  %v2554_v51 = vld [vmem:[%s5859_s3 + $0x200] sm:$0xff]  ;;  %v3033_v57 = vpack.c.bf16 %v652_v46, %v650_v43 }
  0x1c   : > { %2542 = vmatmul.mubr.msk.f32.vlgmr.msra.gmra.mrb[0].mxu0 %vm456_vm0, %v440_v24  ;;  %3022 = vmatpush1.bf16.msra.mxu1 %v3021_v27  ;;  %v657_v49 = vld [vmem:[%s5859_s3 + $0xd8] sm:$0xff]  ;;  %v2947_v50 = vpack.c.bf16 %v2557_v48, %v2555_v44  ;;  %v2556_v52 = vld [vmem:[%s5859_s3 + $0x210] sm:$0xff]  ;;  %v2559_v54 = vld [vmem:[%s5859_s3 + $0x228] sm:$0xff] }
  0x1d   : > { %563 = vmatprep.mubr.f32.mxu0 %v3620_v0  ;;  %3024 = vmatprep.subr.bf16.mxu1 %v3023_v28  ;;  %v2949_v53 = vpack.c.bf16 %v2556_v52, %v2554_v51  ;;  %v2561_v55 = vld [vmem:[%s5859_s3 + $0x238] sm:$0xff]  ;;  %v444_v56 = vld [vmem:[%s5858_s2 + $0x20] sm:$0xff]  ;;  %v3035_v61 = vpack.c.bf16 %v657_v49, %v655_v47  ;;  %v656_v62 = vld [vmem:[%s5859_s3 + $0xd0] sm:$0xff] }
  0x1e   : > { %v654_v58 = vld [vmem:[%s5859_s3 + $0xc0] sm:$0xff]  ;;  %2948 = vmatprep.subr.bf16.mxu0 %v2947_v50  ;;  %v2951_v59 = vpack.c.bf16 %v2561_v55, %v2559_v54  ;;  %v659_v63 = vld [vmem:[%s5859_s3 + $0xe8] sm:$0xff]  ;;  %v2560_v1 = vld [vmem:[%s5859_s3 + $0x230] sm:$0xff] }
  0x1f   : > { %v2558_v60 = vld [vmem:[%s5859_s3 + $0x220] sm:$0xff]  ;;  %v661_v2 = vld [vmem:[%s5859_s3 + $0xf8] sm:$0xff]  ;;  %2950 = vmatpush1.bf16.msra.mxu0 %v2949_v53  ;;  %v2563_v4 = vld [vmem:[%s5859_s3 + $0x248] sm:$0xff]  ;;  %v3037_v9 = vpack.c.bf16 %v656_v62, %v654_v58 }
  0x20   : > { %2543 = vmatmul.mubr.msk.f32.gmra.mrb[2].mxu0 %vm456_vm0, %v441_v31  ;;  %3026 = vmatpush1.bf16.msra.mxu1 %v3025_v34  ;;  %v2953_v3 = vpack.c.bf16 %v2560_v1, %v2558_v60  ;;  %v2565_v5 = vld [vmem:[%s5859_s3 + $0x258] sm:$0xff]  ;;  %v2562_v7 = vld [vmem:[%s5859_s3 + $0x240] sm:$0xff]  ;;  %v2564_v8 = vld [vmem:[%s5859_s3 + $0x250] sm:$0xff]  ;;  %v3039_v11 = vpack.c.bf16 %v661_v2, %v659_v63 }
  0x21   : > { %569 = vmatprep.mubr.f32.mxu0 %v3620_v0  ;;  %3028 = vmatprep.subr.bf16.mxu1 %v3027_v35  ;;  %v2955_v6 = vpack.c.bf16 %v2565_v5, %v2563_v4  ;;  %v2567_v10 = vld [vmem:[%s5859_s3 + $0x268] sm:$0xff]  ;;  %v658_v12 = vld [vmem:[%s5859_s3 + $0xe0] sm:$0xff]  ;;  %v660_v13 = vld [vmem:[%s5859_s3 + $0xf0] sm:$0xff]  ;;  %v2957_v18 = vpack.c.bf16 %v2564_v8, %v2562_v7 }
  0x22   : > { %2952 = vmatprep.subr.bf16.mxu0 %v2951_v59  ;;  %v2569_v14 = vld [vmem:[%s5859_s3 + $0x278] sm:$0xff]  ;;  %v445_v15 = vld [vmem:[%s5858_s2 + $0x28] sm:$0xff]  ;;  %v2566_v20 = vld [vmem:[%s5859_s3 + $0x260] sm:$0xff]  ;;  %v3041_v22 = vpack.c.bf16 %v660_v13, %v658_v12 }
  0x23   : > { %v663_v16 = vld [vmem:[%s5859_s3 + $0x108] sm:$0xff]  ;;  %v665_v17 = vld [vmem:[%s5859_s3 + $0x118] sm:$0xff]  ;;  %2954 = vmatpush1.bf16.msra.mxu0 %v2953_v3  ;;  %v2959_v19 = vpack.c.bf16 %v2569_v14, %v2567_v10  ;;  %v2568_v21 = vld [vmem:[%s5859_s3 + $0x270] sm:$0xff] }
  0x24   : > { %2544 = vmatmul.mubr.msk.f32.gmra.mrb[4].mxu0 %vm456_vm0, %v442_v38  ;;  %3030 = vmatpush1.bf16.msra.mxu1 %v3029_v42  ;;  %v2571_v23 = vld [vmem:[%s5859_s3 + $0x288] sm:$0xff]  ;;  %v2573_v24 = vld [vmem:[%s5859_s3 + $0x298] sm:$0xff]  ;;  %v3043_v25 = vpack.c.bf16 %v665_v17, %v663_v16  ;;  %v662_v26 = vld [vmem:[%s5859_s3 + $0x100] sm:$0xff]  ;;  %v2961_v31 = vpack.c.bf16 %v2568_v21, %v2566_v20 }
  0x25   : > { %575 = vmatprep.mubr.f32.mxu0 %v3620_v0  ;;  %3032 = vmatprep.subr.bf16.mxu1 %v3031_v45  ;;  %v664_v27 = vld [vmem:[%s5859_s3 + $0x110] sm:$0xff]  ;;  %v667_v29 = vld [vmem:[%s5859_s3 + $0x128] sm:$0xff]  ;;  %v669_v30 = vld [vmem:[%s5859_s3 + $0x138] sm:$0xff]  ;;  %v2963_v32 = vpack.c.bf16 %v2573_v24, %v2571_v23 }
  0x26   : > { %2956 = vmatprep.subr.bf16.mxu0 %v2955_v6  ;;  %v446_v28 = vld [vmem:[%s5858_s2 + $0x30] sm:$0xff]  ;;  %v3045_v33 = vpack.c.bf16 %v664_v27, %v662_v26  ;;  %v3047_v34 = vpack.c.bf16 %v669_v30, %v667_v29  ;;  %v666_v35 = vld [vmem:[%s5859_s3 + $0x120] sm:$0xff]  ;;  %v447_v37 = vld [vmem:[%s5858_s2 + $0x38] sm:$0xff] }
  0x27   : > { %2958 = vmatpush1.bf16.msra.mxu0 %v2957_v18  ;;  %v668_v36 = vld [vmem:[%s5859_s3 + $0x130] sm:$0xff]  ;;  %v671_v38 = vld [vmem:[%s5859_s3 + $0x148] sm:$0xff]  ;;  %v673_v39 = vld [vmem:[%s5859_s3 + $0x158] sm:$0xff] }
  0x28   : > { %2545 = vmatmul.mubr.msk.f32.gmra.mrb[6].mxu0 %vm456_vm0, %v443_v41  ;;  %3034 = vmatpush1.bf16.msra.mxu1 %v3033_v57  ;;  %v3049_v40 = vpack.c.bf16 %v668_v36, %v666_v35  ;;  %v3051_v41 = vpack.c.bf16 %v673_v39, %v671_v38  ;;  %v670_v42 = vld [vmem:[%s5859_s3 + $0x140] sm:$0xff]  ;;  %v672_v43 = vld [vmem:[%s5859_s3 + $0x150] sm:$0xff]  ;;  %v675_v45 = vld [vmem:[%s5859_s3 + $0x168] sm:$0xff] }
  0x29   : > { %581 = vmatprep.mubr.f32.mxu0 %v3620_v0  ;;  %3036 = vmatprep.subr.bf16.mxu1 %v3035_v61  ;;  %v448_v44 = vld [vmem:[%s5858_s2 + $0x40] sm:$0xff]  ;;  %v677_v46 = vld [vmem:[%s5859_s3 + $0x178] sm:$0xff]  ;;  %v3053_v47 = vpack.c.bf16 %v672_v43, %v670_v42  ;;  %v676_v50 = vld [vmem:[%s5859_s3 + $0x170] sm:$0xff] }
  0x2a   : > { %2960 = vmatprep.subr.bf16.mxu0 %v2959_v19  ;;  %v3055_v48 = vpack.c.bf16 %v677_v46, %v675_v45  ;;  %v674_v49 = vld [vmem:[%s5859_s3 + $0x160] sm:$0xff]  ;;  %v449_v51 = vld [vmem:[%s5858_s2 + $0x48] sm:$0xff]  ;;  %v681_v53 = vld [vmem:[%s5859_s3 + $0x198] sm:$0xff] }
  0x2b   : > { %2962 = vmatpush1.bf16.msra.mxu0 %v2961_v31  ;;  %v679_v52 = vld [vmem:[%s5859_s3 + $0x188] sm:$0xff]  ;;  %v3057_v54 = vpack.c.bf16 %v676_v50, %v674_v49  ;;  %v680_v57 = vld [vmem:[%s5859_s3 + $0x190] sm:$0xff]  ;;  %v685_v60 = vld [vmem:[%s5859_s3 + $0x1b8] sm:$0xff] }
  0x2c   : > { %2546 = vmatmul.mubr.msk.f32.gmra.mrb[8].mxu0 %vm456_vm0, %v444_v56  ;;  %3038 = vmatpush1.bf16.msra.mxu1 %v3037_v9  ;;  %v3059_v55 = vpack.c.bf16 %v681_v53, %v679_v52  ;;  %v678_v56 = vld [vmem:[%s5859_s3 + $0x180] sm:$0xff]  ;;  %v450_v58 = vld [vmem:[%s5858_s2 + $0x50] sm:$0xff]  ;;  %v683_v59 = vld [vmem:[%s5859_s3 + $0x1a8] sm:$0xff] }
  0x2d   : > { %587 = vmatprep.mubr.f32.mxu0 %v3620_v0  ;;  %3040 = vmatprep.subr.bf16.mxu1 %v3039_v11  ;;  %v3061_v61 = vpack.c.bf16 %v680_v57, %v678_v56  ;;  %v3063_v62 = vpack.c.bf16 %v685_v60, %v683_v59  ;;  %v682_v63 = vld [vmem:[%s5859_s3 + $0x1a0] sm:$0xff]  ;;  %v684_v1 = vld [vmem:[%s5859_s3 + $0x1b0] sm:$0xff]  ;;  %v451_v2 = vld [vmem:[%s5858_s2 + $0x58] sm:$0xff] }
  0x2e   : > { %2964 = vmatprep.subr.bf16.mxu0 %v2963_v32  ;;  %v687_v3 = vld [vmem:[%s5859_s3 + $0x1c8] sm:$0xff]  ;;  %v689_v4 = vld [vmem:[%s5859_s3 + $0x1d8] sm:$0xff]  ;;  %v3065_v5 = vpack.c.bf16 %v684_v1, %v682_v63  ;;  %v686_v7 = vld [vmem:[%s5859_s3 + $0x1c0] sm:$0xff] }
  0x2f   : > { %v3067_v6 = vpack.c.bf16 %v689_v4, %v687_v3  ;;  %v688_v8 = vld [vmem:[%s5859_s3 + $0x1d0] sm:$0xff]  ;;  %v691_v9 = vld [vmem:[%s5859_s3 + $0x1e8] sm:$0xff]  ;;  %v693_v10 = vld [vmem:[%s5859_s3 + $0x1f8] sm:$0xff] }
  0x30   : > { %2547 = vmatmul.mubr.msk.f32.gmra.mrb[10].mxu0 %vm456_vm0, %v445_v15  ;;  %3042 = vmatpush1.bf16.msra.mxu1 %v3041_v22  ;;  %v3069_v11 = vpack.c.bf16 %v688_v8, %v686_v7  ;;  %v3071_v12 = vpack.c.bf16 %v693_v10, %v691_v9  ;;  %v690_v13 = vld [vmem:[%s5859_s3 + $0x1e0] sm:$0xff]  ;;  %v692_v14 = vld [vmem:[%s5859_s3 + $0x1f0] sm:$0xff]  ;;  %v2619_v19 = vld [vmem:[%s5859_s3 + $0x408] sm:$0xff] }
  0x31   : > { %593 = vmatprep.mubr.f32.mxu0 %v3620_v0  ;;  %3044 = vmatprep.subr.bf16.mxu1 %v3043_v25  ;;  %v3073_v15 = vpack.c.bf16 %v692_v14, %v690_v13  ;;  %v2570_v16 = vld [vmem:[%s5859_s3 + $0x280] sm:$0xff]  ;;  %v2572_v17 = vld [vmem:[%s5859_s3 + $0x290] sm:$0xff]  ;;  %v2621_v20 = vld [vmem:[%s5859_s3 + $0x418] sm:$0xff] }
  0x32   : > { %v2965_v18 = vpack.c.bf16 %v2572_v17, %v2570_v16  ;;  %v3075_v21 = vpack.c.bf16 %v2621_v20, %v2619_v19  ;;  %v2575_v22 = vld [vmem:[%s5859_s3 + $0x2a8] sm:$0xff]  ;;  %v2577_v23 = vld [vmem:[%s5859_s3 + $0x2b8] sm:$0xff]  ;;  %v2574_v25 = vld [vmem:[%s5859_s3 + $0x2a0] sm:$0xff] }
  0x33   : > { %v2967_v24 = vpack.c.bf16 %v2577_v23, %v2575_v22  ;;  %v2576_v26 = vld [vmem:[%s5859_s3 + $0x2b0] sm:$0xff]  ;;  %v2581_v29 = vld [vmem:[%s5859_s3 + $0x2d8] sm:$0xff]  ;;  %v2578_v31 = vld [vmem:[%s5859_s3 + $0x2c0] sm:$0xff] }
  0x34   : > { %2548 = vmatmul.mubr.msk.f32.gmra.mrb[12].mxu0 %vm456_vm0, %v446_v28  ;;  %3046 = vmatpush1.bf16.msra.mxu1 %v3045_v33  ;;  %v2969_v27 = vpack.c.bf16 %v2576_v26, %v2574_v25  ;;  %v2579_v28 = vld [vmem:[%s5859_s3 + $0x2c8] sm:$0xff]  ;;  %v2580_v32 = vld [vmem:[%s5859_s3 + $0x2d0] sm:$0xff]  ;;  %v2585_v35 = vld [vmem:[%s5859_s3 + $0x2f8] sm:$0xff] }
  0x35   : > { %599 = vmatprep.mubr.f32.mxu0 %v3620_v0  ;;  %3048 = vmatprep.subr.bf16.mxu1 %v3047_v34  ;;  %v2971_v30 = vpack.c.bf16 %v2581_v29, %v2579_v28  ;;  %v2973_v33 = vpack.c.bf16 %v2580_v32, %v2578_v31  ;;  %v2583_v34 = vld [vmem:[%s5859_s3 + $0x2e8] sm:$0xff]  ;;  %v2584_v38 = vld [vmem:[%s5859_s3 + $0x2f0] sm:$0xff]  ;;  %v2586_v43 = vld [vmem:[%s5859_s3 + $0x300] sm:$0xff] }
  0x36   : > { %2966 = vmatpush1.bf16.msra.mxu0 %v2965_v18  ;;  %v2975_v36 = vpack.c.bf16 %v2585_v35, %v2583_v34  ;;  %v2591_v46 = vld [vmem:[%s5859_s3 + $0x328] sm:$0xff]  ;;  %v2590_v49 = vld [vmem:[%s5859_s3 + $0x320] sm:$0xff]  ;;  %v2592_v50 = vld [vmem:[%s5859_s3 + $0x330] sm:$0xff] }
  0x37   : > { %2968 = vmatprep.subr.bf16.mxu0 %v2967_v24  ;;  %v2595_v52 = vld [vmem:[%s5859_s3 + $0x348] sm:$0xff]  ;;  %v2597_v53 = vld [vmem:[%s5859_s3 + $0x358] sm:$0xff]  ;;  %v2596_v56 = vld [vmem:[%s5859_s3 + $0x350] sm:$0xff] }
  0x38   : > { %2549 = vmatmul.mubr.msk.f32.gmra.mrb[14].mxu0 %vm456_vm0, %v447_v37  ;;  %3050 = vmatpush1.bf16.msra.mxu1 %v3049_v40  ;;  %v2582_v37 = vld [vmem:[%s5859_s3 + $0x2e0] sm:$0xff]  ;;  %v2587_v40 = vld [vmem:[%s5859_s3 + $0x308] sm:$0xff]  ;;  %v2601_v59 = vld [vmem:[%s5859_s3 + $0x378] sm:$0xff] }
  0x39   : > { %605 = vmatprep.mubr.f32.mxu0 %v3620_v0  ;;  %3052 = vmatprep.subr.bf16.mxu1 %v3051_v41  ;;  %v2977_v39 = vpack.c.bf16 %v2584_v38, %v2582_v37  ;;  %v2589_v41 = vld [vmem:[%s5859_s3 + $0x318] sm:$0xff]  ;;  %v2603_v1 = vld [vmem:[%s5859_s3 + $0x388] sm:$0xff]  ;;  %v2602_v4 = vld [vmem:[%s5859_s3 + $0x380] sm:$0xff] }
  0x3a   : > { %2970 = vmatpush1.bf16.msra.mxu0 %v2969_v27  ;;  %v2979_v42 = vpack.c.bf16 %v2589_v41, %v2587_v40  ;;  %v2607_v7 = vld [vmem:[%s5859_s3 + $0x3a8] sm:$0xff]  ;;  %v2609_v8 = vld [vmem:[%s5859_s3 + $0x3b8] sm:$0xff]  ;;  %v2606_v10 = vld [vmem:[%s5859_s3 + $0x3a0] sm:$0xff] }
  0x3b   : > { %2972 = vmatprep.subr.bf16.mxu0 %v2971_v30  ;;  %v2999_v9 = vpack.c.bf16 %v2609_v8, %v2607_v7  ;;  %v2611_v13 = vld [vmem:[%s5859_s3 + $0x3c8] sm:$0xff]  ;;  %v2613_v14 = vld [vmem:[%s5859_s3 + $0x3d8] sm:$0xff]  ;;  %v2610_v16 = vld [vmem:[%s5859_s3 + $0x3c0] sm:$0xff] }
  0x3c   : > { %2550 = vmatmul.mubr.msk.f32.gmra.mrb[16].mxu0 %vm456_vm0, %v448_v44  ;;  %3054 = vmatpush1.bf16.msra.mxu1 %v3053_v47  ;;  %v2588_v44 = vld [vmem:[%s5859_s3 + $0x310] sm:$0xff]  ;;  %v2593_v47 = vld [vmem:[%s5859_s3 + $0x338] sm:$0xff]  ;;  %v2615_v19 = vld [vmem:[%s5859_s3 + $0x3e8] sm:$0xff] }
  0x3d   : > { %611 = vmatprep.mubr.f32.mxu0 %v3620_v0  ;;  %3056 = vmatprep.subr.bf16.mxu1 %v3055_v48  ;;  %v2981_v45 = vpack.c.bf16 %v2588_v44, %v2586_v43  ;;  %v2983_v48 = vpack.c.bf16 %v2593_v47, %v2591_v46  ;;  %v2612_v17 = vld [vmem:[%s5859_s3 + $0x3d0] sm:$0xff]  ;;  %v2617_v20 = vld [vmem:[%s5859_s3 + $0x3f8] sm:$0xff]  ;;  %v2614_v22 = vld [vmem:[%s5859_s3 + $0x3e0] sm:$0xff] }
  0x3e   : > { %2974 = vmatpush1.bf16.msra.mxu0 %v2973_v33  ;;  %v3005_v18 = vpack.c.bf16 %v2612_v17, %v2610_v16  ;;  %v2616_v23 = vld [vmem:[%s5859_s3 + $0x3f0] sm:$0xff]  ;;  %v2683_v25 = vld [vmem:[%s5861_s5 + $0x208] sm:$0xff]  ;;  %v2685_v26 = vld [vmem:[%s5861_s5 + $0x218] sm:$0xff] }
  0x3f   : > { %2976 = vmatprep.subr.bf16.mxu0 %v2975_v36  ;;  %v3009_v24 = vpack.c.bf16 %v2616_v23, %v2614_v22  ;;  %v3139_v27 = vpack.c.bf16 %v2685_v26, %v2683_v25  ;;  %v2618_v28 = vld [vmem:[%s5859_s3 + $0x400] sm:$0xff]  ;;  %v2620_v29 = vld [vmem:[%s5859_s3 + $0x410] sm:$0xff]  ;;  %v2623_v30 = vld [vmem:[%s5859_s3 + $0x428] sm:$0xff] }
  0x40   : > { %2551 = vmatmul.mubr.msk.f32.gmra.mrb[18].mxu0 %vm456_vm0, %v449_v51  ;;  %3058 = vmatpush1.bf16.msra.mxu1 %v3057_v54  ;;  %v2985_v51 = vpack.c.bf16 %v2592_v50, %v2590_v49  ;;  %v2987_v54 = vpack.c.bf16 %v2597_v53, %v2595_v52  ;;  %v2625_v31 = vld [vmem:[%s5859_s3 + $0x438] sm:$0xff]  ;;  %v3077_v33 = vpack.c.bf16 %v2620_v29, %v2618_v28  ;;  %v2622_v36 = vld [vmem:[%s5859_s3 + $0x420] sm:$0xff]  ;;  %v2624_v37 = vld [vmem:[%s5859_s3 + $0x430] sm:$0xff] }
  0x41   : > { %617 = vmatprep.mubr.f32.mxu0 %v3620_v0  ;;  %3060 = vmatprep.subr.bf16.mxu1 %v3059_v55  ;;  %v2594_v55 = vld [vmem:[%s5859_s3 + $0x340] sm:$0xff]  ;;  %v3079_v35 = vpack.c.bf16 %v2625_v31, %v2623_v30  ;;  %v2627_v38 = vld [vmem:[%s5859_s3 + $0x448] sm:$0xff]  ;;  %v3081_v40 = vpack.c.bf16 %v2624_v37, %v2622_v36  ;;  %v2628_v44 = vld [vmem:[%s5859_s3 + $0x450] sm:$0xff] }
  0x42   : > { %2978 = vmatpush1.bf16.msra.mxu0 %v2977_v39  ;;  %v2989_v57 = vpack.c.bf16 %v2596_v56, %v2594_v55  ;;  %v2629_v39 = vld [vmem:[%s5859_s3 + $0x458] sm:$0xff]  ;;  %v2626_v43 = vld [vmem:[%s5859_s3 + $0x440] sm:$0xff]  ;;  %v2631_v46 = vld [vmem:[%s5859_s3 + $0x468] sm:$0xff] }
  0x43   : > { %2980 = vmatprep.subr.bf16.mxu0 %v2979_v42  ;;  %v3083_v42 = vpack.c.bf16 %v2629_v39, %v2627_v38  ;;  %v2633_v47 = vld [vmem:[%s5859_s3 + $0x478] sm:$0xff]  ;;  %v2632_v52 = vld [vmem:[%s5859_s3 + $0x470] sm:$0xff]  ;;  %v2691_v17 = vld [vmem:[%s5861_s5 + $0x248] sm:$0xff] }
  0x44   : > { %2552 = vmatmul.mubr.msk.f32.gmra.mrb[20].mxu0 %vm456_vm0, %v450_v58  ;;  %3062 = vmatpush1.bf16.msra.mxu1 %v3061_v61  ;;  %v2599_v58 = vld [vmem:[%s5859_s3 + $0x368] sm:$0xff]  ;;  %v2598_v61 = vld [vmem:[%s5859_s3 + $0x360] sm:$0xff]  ;;  %v3087_v50 = vpack.c.bf16 %v2633_v47, %v2631_v46  ;;  %v2637_v55 = vld [vmem:[%s5859_s3 + $0x498] sm:$0xff] }
  0x45   : > { %623 = vmatprep.mubr.f32.mxu0 %v3620_v0  ;;  %3064 = vmatprep.subr.bf16.mxu1 %v3063_v62  ;;  %v2991_v60 = vpack.c.bf16 %v2601_v59, %v2599_v58  ;;  %v2600_v62 = vld [vmem:[%s5859_s3 + $0x370] sm:$0xff]  ;;  %v2645_v16 = vld [vmem:[%s5859_s3 + $0x4d8] sm:$0xff]  ;;  %v2647_v25 = vld [vmem:[%s5859_s3 + $0x4e8] sm:$0xff] }
  0x46   : > { %2982 = vmatpush1.bf16.msra.mxu0 %v2981_v45  ;;  %v2993_v63 = vpack.c.bf16 %v2600_v62, %v2598_v61  ;;  %v2636_v58 = vld [vmem:[%s5859_s3 + $0x490] sm:$0xff]  ;;  %v2639_v61 = vld [vmem:[%s5859_s3 + $0x4a8] sm:$0xff]  ;;  %v2690_v28 = vld [vmem:[%s5861_s5 + $0x240] sm:$0xff] }
  0x47   : > { %2984 = vmatprep.subr.bf16.mxu0 %v2983_v48  ;;  %v3085_v48 = vpack.c.bf16 %v2628_v44, %v2626_v43  ;;  %v2640_v7 = vld [vmem:[%s5859_s3 + $0x4b0] sm:$0xff]  ;;  %v2649_v30 = vld [vmem:[%s5859_s3 + $0x4f8] sm:$0xff]  ;;  %v2695_v31 = vld [vmem:[%s5861_s5 + $0x268] sm:$0xff] }
  0x48   : > { %2553 = vmatmul.mubr.msk.f32.gmra.mrb[22].mxu0 %vm456_vm0, %v451_v2  ;;  %3066 = vmatpush1.bf16.msra.mxu1 %v3065_v5  ;;  %v2605_v2 = vld [vmem:[%s5859_s3 + $0x398] sm:$0xff]  ;;  %v2604_v5 = vld [vmem:[%s5859_s3 + $0x390] sm:$0xff]  ;;  %v3103_v37 = vpack.c.bf16 %v2649_v30, %v2647_v25  ;;  %v2651_v43 = vld [vmem:[%s5859_s3 + $0x508] sm:$0xff] }
  0x49   : > { %3068 = vmatprep.subr.bf16.mxu1 %v3067_v6  ;;  %v2995_v3 = vpack.c.bf16 %v2605_v2, %v2603_v1  ;;  %v2997_v6 = vpack.c.bf16 %v2604_v5, %v2602_v4  ;;  %v2684_v1 = vld [vmem:[%s5861_s5 + $0x210] sm:$0xff]  ;;  %v2641_v2 = vld [vmem:[%s5859_s3 + $0x4b8] sm:$0xff]  ;;  %v2670_v25 = vld [vmem:[%s5859_s3 + $0x5a0] sm:$0xff] }
  0x4a   : > { %2986 = vmatpush1.bf16.msra.mxu0 %v2985_v51  ;;  %v2630_v51 = vld [vmem:[%s5859_s3 + $0x460] sm:$0xff]  ;;  %v2689_v4 = vld [vmem:[%s5861_s5 + $0x238] sm:$0xff]  ;;  %v2692_v29 = vld [vmem:[%s5861_s5 + $0x250] sm:$0xff] }
  0x4b   : > { %2988 = vmatprep.subr.bf16.mxu0 %v2987_v54  ;;  %v2635_v54 = vld [vmem:[%s5859_s3 + $0x488] sm:$0xff]  ;;  %v3089_v56 = vpack.c.bf16 %v2632_v52, %v2630_v51  ;;  %v3149_v36 = vpack.c.bf16 %v2692_v29, %v2690_v28  ;;  %v2648_v38 = vld [vmem:[%s5859_s3 + $0x4f0] sm:$0xff]  ;;  %v2653_v44 = vld [vmem:[%s5859_s3 + $0x518] sm:$0xff] }
  0x4c   : > { %3070 = vmatpush1.bf16.msra.mxu1 %v3069_v11  ;;  %v2608_v11 = vld [vmem:[%s5859_s3 + $0x3b0] sm:$0xff]  ;;  %v2655_v52 = vld [vmem:[%s5859_s3 + $0x528] sm:$0xff]  ;;  %v2677_v28 = vld [vmem:[%s5859_s3 + $0x5d8] sm:$0xff] }
  0x4d   : > { %3072 = vmatprep.subr.bf16.mxu1 %v3071_v12  ;;  %v3001_v12 = vpack.c.bf16 %v2608_v11, %v2606_v10  ;;  %v3095_v10 = vpack.c.bf16 %v2641_v2, %v2639_v61  ;;  %v2643_v11 = vld [vmem:[%s5859_s3 + $0x4c8] sm:$0xff]  ;;  %v2661_v61 = vld [vmem:[%s5859_s3 + $0x558] sm:$0xff]  ;;  %v2658_v2 = vld [vmem:[%s5859_s3 + $0x540] sm:$0xff] }
  0x4e   : > { %2990 = vmatpush1.bf16.msra.mxu0 %v2989_v57  ;;  %v2634_v57 = vld [vmem:[%s5859_s3 + $0x480] sm:$0xff] }
  0x4f   : > { %2992 = vmatprep.subr.bf16.mxu0 %v2991_v60  ;;  %v3091_v60 = vpack.c.bf16 %v2637_v55, %v2635_v54  ;;  %v3093_v5 = vpack.c.bf16 %v2636_v58, %v2634_v57  ;;  %v2654_v57 = vld [vmem:[%s5859_s3 + $0x520] sm:$0xff]  ;;  %v2656_v58 = vld [vmem:[%s5859_s3 + $0x530] sm:$0xff] }
  0x50   : > { %3074 = vmatpush1.bf16.msra.mxu1 %v3073_v15  ;;  %v3003_v15 = vpack.c.bf16 %v2613_v14, %v2611_v13  ;;  %v2686_v14 = vld [vmem:[%s5861_s5 + $0x220] sm:$0xff] }
  0x51   : > { %3076 = vmatprep.subr.bf16.mxu1 %v3075_v21  ;;  %v3007_v21 = vpack.c.bf16 %v2617_v20, %v2615_v19  ;;  %v2642_v20 = vld [vmem:[%s5859_s3 + $0x4c0] sm:$0xff] }
  0x52   : > { %2994 = vmatpush1.bf16.msra.mxu0 %v2993_v63  ;;  %v2682_v63 = vld [vmem:[%s5861_s5 + $0x200] sm:$0xff] }
  0x53   : > { %2996 = vmatprep.subr.bf16.mxu0 %v2995_v3  ;;  %v2687_v3 = vld [vmem:[%s5861_s5 + $0x228] sm:$0xff] }
  0x54   : > { %v3143_v13 = vpack.c.bf16 %v2689_v4, %v2687_v3  ;;  %v2660_v3 = vld [vmem:[%s5859_s3 + $0x550] sm:$0xff] }
  0x56   : > { %2998 = vmatpush1.bf16.msra.mxu0 %v2997_v6  ;;  %v2638_v6 = vld [vmem:[%s5859_s3 + $0x4a0] sm:$0xff] }
  0x57   : > { %3000 = vmatprep.subr.bf16.mxu0 %v2999_v9  ;;  %v3141_v9 = vpack.c.bf16 %v2684_v1, %v2682_v63  ;;  %v3097_v19 = vpack.c.bf16 %v2640_v7, %v2638_v6  ;;  %v2665_v6 = vld [vmem:[%s5859_s3 + $0x578] sm:$0xff]  ;;  %v3117_v7 = vpack.c.bf16 %v2660_v3, %v2658_v2  ;;  %v2714_v3 = vld [vmem:[%s5861_s5 + $0x300] sm:$0xff] }
  0x58   : > { %v2717_v2 = vld [vmem:[%s5861_s5 + $0x318] sm:$0xff] }
  0x5a   : > { %3002 = vmatpush1.bf16.msra.mxu0 %v3001_v12 }
  0x5b   : > { %3004 = vmatprep.subr.bf16.mxu0 %v3003_v15  ;;  %v2688_v15 = vld [vmem:[%s5861_s5 + $0x230] sm:$0xff] }
  0x5c   : > { %v3145_v23 = vpack.c.bf16 %v2688_v15, %v2686_v14  ;;  %v2669_v14 = vld [vmem:[%s5859_s3 + $0x598] sm:$0xff] }
  0x5e   : > { %3006 = vmatpush1.bf16.msra.mxu0 %v3005_v18  ;;  %v2693_v18 = vld [vmem:[%s5861_s5 + $0x258] sm:$0xff] }
  0x5f   : > { %3008 = vmatprep.subr.bf16.mxu0 %v3007_v21  ;;  %v2644_v21 = vld [vmem:[%s5859_s3 + $0x4d0] sm:$0xff] }
  0x62   : > { %3010 = vmatpush1.bf16.msra.mxu0 %v3009_v24  ;;  %v3099_v24 = vpack.c.bf16 %v2645_v16, %v2643_v11  ;;  %v2664_v11 = vld [vmem:[%s5859_s3 + $0x570] sm:$0xff] }
  0x63   : > { %3140 = vmatprep.subr.bf16.mxu0 %v3139_v27  ;;  %v3147_v27 = vpack.c.bf16 %v2693_v18, %v2691_v17  ;;  %v2666_v18 = vld [vmem:[%s5859_s3 + $0x580] sm:$0xff] }
  0xef   : > { %v559_v32 = vpop.f32.mrb[0].mxu0 }
  0xf0   : > { %v561_v34 = vpop.f32.mrb[1].mxu0 }
  0xf1   : > { %912 = vmatprep.mubr.f32.mxu1 %v561_v34  ;;  %v2646_v34 = vld [vmem:[%s5859_s3 + $0x4e0] sm:$0xff] }
  0xf2   : > { %913 = vmatmul.mubr.f32.vlgmr.msra.gmra.mrb[0].mxu1 %v559_v32  ;;  %v2697_v32 = vld [vmem:[%s5861_s5 + $0x278] sm:$0xff] }
  0xf3   : > { %3078 = vmatpush1.bf16.msra.mxu1 %v3077_v33  ;;  %v565_v41 = vpop.f32.mrb[2].mxu0  ;;  %v3101_v33 = vpack.c.bf16 %v2644_v21, %v2642_v20  ;;  %v2671_v21 = vld [vmem:[%s5859_s3 + $0x5a8] sm:$0xff] }
  0xf4   : > { %3080 = vmatprep.subr.bf16.mxu1 %v3079_v35  ;;  %v567_v45 = vpop.f32.mrb[3].mxu0 }
  0xf5   : > { %918 = vmatprep.mubr.f32.mxu1 %v567_v45  ;;  %v3105_v45 = vpack.c.bf16 %v2648_v38, %v2646_v34  ;;  %v2681_v34 = vld [vmem:[%s5859_s3 + $0x5f8] sm:$0xff]  ;;  %v2680_v38 = vld [vmem:[%s5859_s3 + $0x5f0] sm:$0xff] }
  0xf6   : > { %919 = vmatmul.mubr.f32.gmra.mrb[2].mxu1 %v565_v41  ;;  %v2694_v41 = vld [vmem:[%s5861_s5 + $0x260] sm:$0xff] }
  0xf7   : > { %3082 = vmatpush1.bf16.msra.mxu1 %v3081_v40  ;;  %v571_v49 = vpop.f32.mrb[4].mxu0  ;;  %v3151_v40 = vpack.c.bf16 %v2697_v32, %v2695_v31  ;;  %v2674_v31 = vld [vmem:[%s5859_s3 + $0x5c0] sm:$0xff]  ;;  %v2676_v32 = vld [vmem:[%s5859_s3 + $0x5d0] sm:$0xff] }
  0xf8   : > { %3084 = vmatprep.subr.bf16.mxu1 %v3083_v42  ;;  %v573_v53 = vpop.f32.mrb[5].mxu0  ;;  %v2696_v42 = vld [vmem:[%s5861_s5 + $0x270] sm:$0xff] }
  0xf9   : > { %924 = vmatprep.mubr.f32.mxu1 %v573_v53  ;;  %v3153_v47 = vpack.c.bf16 %v2696_v42, %v2694_v41  ;;  %v2657_v53 = vld [vmem:[%s5859_s3 + $0x538] sm:$0xff] }
  0xfa   : > { %925 = vmatmul.mubr.f32.gmra.mrb[4].mxu1 %v571_v49  ;;  %v2650_v49 = vld [vmem:[%s5859_s3 + $0x500] sm:$0xff]  ;;  %v2701_v41 = vld [vmem:[%s5861_s5 + $0x298] sm:$0xff] }
  0xfb   : > { %3086 = vmatpush1.bf16.msra.mxu1 %v3085_v48  ;;  %v577_v59 = vpop.f32.mrb[6].mxu0  ;;  %v3107_v48 = vpack.c.bf16 %v2653_v44, %v2651_v43  ;;  %v2698_v43 = vld [vmem:[%s5861_s5 + $0x280] sm:$0xff]  ;;  %v2700_v44 = vld [vmem:[%s5861_s5 + $0x290] sm:$0xff] }
  0xfc   : > { %3088 = vmatprep.subr.bf16.mxu1 %v3087_v50  ;;  %v579_v62 = vpop.f32.mrb[7].mxu0  ;;  %v2652_v50 = vld [vmem:[%s5859_s3 + $0x510] sm:$0xff] }
  0xfd   : > { %930 = vmatprep.mubr.f32.mxu1 %v579_v62  ;;  %v3109_v54 = vpack.c.bf16 %v2652_v50, %v2650_v49  ;;  %v3113_v62 = vpack.c.bf16 %v2656_v58, %v2654_v57  ;;  %v2702_v49 = vld [vmem:[%s5861_s5 + $0x2a0] sm:$0xff]  ;;  %v2704_v50 = vld [vmem:[%s5861_s5 + $0x2b0] sm:$0xff]  ;;  %v2711_v58 = vld [vmem:[%s5861_s5 + $0x2e8] sm:$0xff] }
  0xfe   : > { %931 = vmatmul.mubr.f32.gmra.mrb[6].mxu1 %v577_v59 }
  0xff   : > { %3090 = vmatpush1.bf16.msra.mxu1 %v3089_v56  ;;  %v583_v8 = vpop.f32.mrb[8].mxu0  ;;  %v3111_v56 = vpack.c.bf16 %v2657_v53, %v2655_v52  ;;  %v2707_v52 = vld [vmem:[%s5861_s5 + $0x2c8] sm:$0xff]  ;;  %v2709_v53 = vld [vmem:[%s5861_s5 + $0x2d8] sm:$0xff] }
 0x100   : > { %3092 = vmatprep.subr.bf16.mxu1 %v3091_v60  ;;  %v585_v12 = vpop.f32.mrb[9].mxu0  ;;  %v2659_v60 = vld [vmem:[%s5859_s3 + $0x548] sm:$0xff] }
 0x101   : > { %823 = vmatprep.mubr.f32.mxu0 %v585_v12  ;;  %v3115_v1 = vpack.c.bf16 %v2661_v61, %v2659_v60  ;;  %v2710_v61 = vld [vmem:[%s5861_s5 + $0x2e0] sm:$0xff] }
 0x102   : > { %824 = vmatmul.mubr.f32.vlgmr.msra.gmra.mrb[24].mxu0 %v583_v8 }
 0x103   : > { %3094 = vmatpush1.bf16.msra.mxu1 %v3093_v5  ;;  %v589_v22 = vpop.f32.mrb[10].mxu0  ;;  %3142 = vmatpush1.bf16.msra.mxu0 %v3141_v9  ;;  %v2663_v5 = vld [vmem:[%s5859_s3 + $0x568] sm:$0xff] }
 0x104   : > { %3096 = vmatprep.subr.bf16.mxu1 %v3095_v10  ;;  %v591_v26 = vpop.f32.mrb[11].mxu0  ;;  %3144 = vmatprep.subr.bf16.mxu0 %v3143_v13  ;;  %v3119_v9 = vpack.c.bf16 %v2665_v6, %v2663_v5  ;;  %v2662_v10 = vld [vmem:[%s5859_s3 + $0x560] sm:$0xff]  ;;  %v2667_v13 = vld [vmem:[%s5859_s3 + $0x588] sm:$0xff] }
 0x105   : > { %829 = vmatprep.mubr.f32.mxu0 %v591_v26  ;;  %v3121_v15 = vpack.c.bf16 %v2664_v11, %v2662_v10  ;;  %v3123_v17 = vpack.c.bf16 %v2669_v14, %v2667_v13  ;;  %v2672_v26 = vld [vmem:[%s5859_s3 + $0x5b0] sm:$0xff]  ;;  %v2718_v10 = vld [vmem:[%s5861_s5 + $0x320] sm:$0xff]  ;;  %v2723_v13 = vld [vmem:[%s5861_s5 + $0x348] sm:$0xff] }
 0x106   : > { %830 = vmatmul.mubr.f32.gmra.mrb[26].mxu0 %v589_v22  ;;  %v2673_v22 = vld [vmem:[%s5859_s3 + $0x5b8] sm:$0xff]  ;;  %v3129_v29 = vpack.c.bf16 %v2672_v26, %v2670_v25  ;;  %v2720_v11 = vld [vmem:[%s5861_s5 + $0x330] sm:$0xff]  ;;  %v2731_v25 = vld [vmem:[%s5861_s5 + $0x388] sm:$0xff] }
 0x107   : > { %3098 = vmatpush1.bf16.msra.mxu1 %v3097_v19  ;;  %v595_v35 = vpop.f32.mrb[12].mxu0  ;;  %3146 = vmatpush1.bf16.msra.mxu0 %v3145_v23  ;;  %v2668_v19 = vld [vmem:[%s5859_s3 + $0x590] sm:$0xff]  ;;  %v2725_v14 = vld [vmem:[%s5861_s5 + $0x358] sm:$0xff] }
 0x108   : > { %3100 = vmatprep.subr.bf16.mxu1 %v3099_v24  ;;  %v597_v39 = vpop.f32.mrb[13].mxu0  ;;  %3148 = vmatprep.subr.bf16.mxu0 %v3147_v27  ;;  %v3125_v23 = vpack.c.bf16 %v2668_v19, %v2666_v18  ;;  %v3127_v24 = vpack.c.bf16 %v2673_v22, %v2671_v21  ;;  %v2675_v27 = vld [vmem:[%s5859_s3 + $0x5c8] sm:$0xff]  ;;  %v2726_v22 = vld [vmem:[%s5861_s5 + $0x360] sm:$0xff]  ;;  %v2733_v26 = vld [vmem:[%s5861_s5 + $0x398] sm:$0xff] }
 0x109   : > { %835 = vmatprep.mubr.f32.mxu0 %v597_v39  ;;  %v3131_v30 = vpack.c.bf16 %v2677_v28, %v2675_v27  ;;  %v2727_v19 = vld [vmem:[%s5861_s5 + $0x368] sm:$0xff]  ;;  %v1101_v27 = vlaneseq  ;;  %v3187_v28 = vpack.c.bf16 %v2733_v26, %v2731_v25  ;;  %v1146_v26 = vld [vmem:[%s4565_s26 + $0x10] sm:$0xff] }
 0x10a   : > { %836 = vmatmul.mubr.f32.gmra.mrb[28].mxu0 %v595_v35  ;;  %v3133_v35 = vpack.c.bf16 %v2676_v32, %v2674_v31  ;;  %v2735_v32 = vld [vmem:[%s5861_s5 + $0x3a8] sm:$0xff] }
 0x10b   : > { %3102 = vmatpush1.bf16.msra.mxu1 %v3101_v33  ;;  %v601_v46 = vpop.f32.mrb[14].mxu0  ;;  %3150 = vmatpush1.bf16.msra.mxu0 %v3149_v36  ;;  %v2679_v33 = vld [vmem:[%s5859_s3 + $0x5e8] sm:$0xff]  ;;  %vm1162_vm1 = vcmp.lt.s32.totalorder %v1101_v27, 256 }
 0x10c   : > { %3104 = vmatprep.subr.bf16.mxu1 %v3103_v37  ;;  %v603_v51 = vpop.f32.mrb[15].mxu0  ;;  %3152 = vmatprep.subr.bf16.mxu0 %v3151_v40  ;;  %v3135_v36 = vpack.c.bf16 %v2681_v34, %v2679_v33  ;;  %v2678_v37 = vld [vmem:[%s5859_s3 + $0x5e0] sm:$0xff]  ;;  %v2699_v40 = vld [vmem:[%s5861_s5 + $0x288] sm:$0xff]  ;;  %1164 = vst.msk [vmem:[#allocation2] ss:$8 sm:$0x3] %vm1162_vm1, %v3620_v0 }
 0x10d   : > { %841 = vmatprep.mubr.f32.mxu0 %v603_v51  ;;  %v3137_v39 = vpack.c.bf16 %v2680_v38, %v2678_v37  ;;  %v3155_v42 = vpack.c.bf16 %v2701_v41, %v2699_v40  ;;  %v3161_v51 = vpack.c.bf16 %v2704_v50, %v2702_v49  ;;  %1167 = vst.msk [vmem:[#allocation2 + $0x41] ss:$8 sm:$0x3] %vm1162_vm1, %v3620_v0  ;;  %v2737_v33 = vld [vmem:[%s5861_s5 + $0x3b8] sm:$0xff]  ;;  %v2739_v0 = vld [vmem:[%s5861_s5 + $0x3c8] sm:$0xff]  ;;  %v2738_v40 = vld [vmem:[%s5861_s5 + $0x3c0] sm:$0xff] }
 0x10e   : > { %842 = vmatmul.mubr.f32.gmra.mrb[30].mxu0 %v601_v46  ;;  %v2703_v46 = vld [vmem:[%s5861_s5 + $0x2a8] sm:$0xff]  ;;  %v3191_v34 = vpack.c.bf16 %v2737_v33, %v2735_v32  ;;  %v2741_v38 = vld [vmem:[%s5861_s5 + $0x3d8] sm:$0xff]  ;;  %v2740_v41 = vld [vmem:[%s5861_s5 + $0x3d0] sm:$0xff] }
 0x10f   : > { %3106 = vmatpush1.bf16.msra.mxu1 %v3105_v45  ;;  %v4315_v55 = vpop.f32.mrb[16].mxu0  ;;  %3154 = vmatpush1.bf16.msra.mxu0 %v3153_v47  ;;  %v3157_v45 = vpack.c.bf16 %v2700_v44, %v2698_v43  ;;  %v2705_v47 = vld [vmem:[%s5861_s5 + $0x2b8] sm:$0xff]  ;;  %v2743_v43 = vld [vmem:[%s5861_s5 + $0x3e8] sm:$0xff] }
 0x110   : > { %3108 = vmatprep.subr.bf16.mxu1 %v3107_v48  ;;  %v609_v59 = vpop.f32.mrb[17].mxu0  ;;  %3156 = vmatprep.subr.bf16.mxu0 %v3155_v42  ;;  %v3159_v48 = vpack.c.bf16 %v2705_v47, %v2703_v46  ;;  %v3197_v42 = vpack.c.bf16 %v2740_v41, %v2738_v40  ;;  %v2745_v44 = vld [vmem:[%s5861_s5 + $0x3f8] sm:$0xff]  ;;  %v2742_v46 = vld [vmem:[%s5861_s5 + $0x3e0] sm:$0xff]  ;;  %v2744_v47 = vld [vmem:[%s5861_s5 + $0x3f0] sm:$0xff] }
 0x111   : > { %1066 = vmatprep.mubr.f32.mxu1 %v609_v59  ;;  %v2713_v59 = vld [vmem:[%s5861_s5 + $0x2f8] sm:$0xff]  ;;  %v1221_v49 = vld [vmem:[%s5861_s5 + $0x8] sm:$0xff]  ;;  %v1148_v41 = vld [vmem:[%s4565_s26 + $0x20] sm:$0xff] }
 0x112   : > { %v3167_v60 = vpack.c.bf16 %v2713_v59, %v2711_v58  ;;  %v1223_v50 = vld [vmem:[%s5861_s5 + $0x18] sm:$0xff] }
 0x113   : > { %3110 = vmatpush1.bf16.msra.mxu1 %v3109_v54  ;;  %v613_v63 = vpop.f32.mrb[18].mxu0  ;;  %3158 = vmatpush1.bf16.msra.mxu0 %v3157_v45  ;;  %v3163_v54 = vpack.c.bf16 %v2709_v53, %v2707_v52  ;;  %v3199_v45 = vpack.c.bf16 %v2745_v44, %v2743_v43 }
 0x114   : > { %3112 = vmatprep.subr.bf16.mxu1 %v3111_v56  ;;  %v615_v4 = vpop.f32.mrb[19].mxu0  ;;  %3160 = vmatprep.subr.bf16.mxu0 %v3159_v48  ;;  %v2708_v56 = vld [vmem:[%s5861_s5 + $0x2d0] sm:$0xff]  ;;  %v3201_v48 = vpack.c.bf16 %v2744_v47, %v2742_v46 }
 0x117   : > { %3114 = vmatpush1.bf16.msra.mxu1 %v3113_v62  ;;  %v619_v8 = vpop.f32.mrb[20].mxu0  ;;  %3162 = vmatpush1.bf16.msra.mxu0 %v3161_v51  ;;  %v2712_v62 = vld [vmem:[%s5861_s5 + $0x2f0] sm:$0xff]  ;;  %v3203_v51 = vpack.c.bf16 %v1223_v50, %v1221_v49 }
 0x118   : > { %3116 = vmatprep.subr.bf16.mxu1 %v3115_v1  ;;  %v621_v12 = vpop.f32.mrb[21].mxu0  ;;  %3164 = vmatprep.subr.bf16.mxu0 %v3163_v54  ;;  %v3169_v1 = vpack.c.bf16 %v2712_v62, %v2710_v61  ;;  %v1099_v62 = vld [vmem:[%s5860_s4] sm:$0x3] }
 0x11b   : > { %3118 = vmatpush1.bf16.msra.mxu1 %v3117_v7  ;;  %v625_v16 = vpop.f32.mrb[22].mxu0  ;;  %v2719_v7 = vld [vmem:[%s5861_s5 + $0x328] sm:$0xff] }
 0x11c   : > { %3120 = vmatprep.subr.bf16.mxu1 %v3119_v9  ;;  %v627_v20 = vpop.f32.mrb[23].mxu0 }
 0x11f   : > { %3122 = vmatpush1.bf16.msra.mxu1 %v3121_v15  ;;  %v3179_v15 = vpack.c.bf16 %v2725_v14, %v2723_v13 }
 0x120   : > { %3124 = vmatprep.subr.bf16.mxu1 %v3123_v17  ;;  %v2724_v17 = vld [vmem:[%s5861_s5 + $0x350] sm:$0xff] }
 0x123   : > { %3126 = vmatpush1.bf16.msra.mxu1 %v3125_v23  ;;  %v2728_v23 = vld [vmem:[%s5861_s5 + $0x370] sm:$0xff] }
 0x124   : > { %3128 = vmatprep.subr.bf16.mxu1 %v3127_v24  ;;  %v3185_v24 = vpack.c.bf16 %v2728_v23, %v2726_v22 }
 0x127   : > { %3130 = vmatpush1.bf16.msra.mxu1 %v3129_v29  ;;  %v2730_v29 = vld [vmem:[%s5861_s5 + $0x380] sm:$0xff] }
 0x128   : > { %3132 = vmatprep.subr.bf16.mxu1 %v3131_v30  ;;  %v2732_v30 = vld [vmem:[%s5861_s5 + $0x390] sm:$0xff] }
 0x129   : > { %v3189_v31 = vpack.c.bf16 %v2732_v30, %v2730_v29 }
 0x12b   : > { %3134 = vmatpush1.bf16.msra.mxu1 %v3133_v35  ;;  %v2734_v35 = vld [vmem:[%s5861_s5 + $0x3a0] sm:$0xff] }
 0x12c   : > { %3136 = vmatprep.subr.bf16.mxu1 %v3135_v36  ;;  %v2736_v36 = vld [vmem:[%s5861_s5 + $0x3b0] sm:$0xff] }
 0x12d   : > { %v3193_v37 = vpack.c.bf16 %v2736_v36, %v2734_v35 }
 0x12f   : > { %3138 = vmatpush1.bf16.msra.mxu1 %v3137_v39  ;;  %v3195_v39 = vpack.c.bf16 %v2741_v38, %v2739_v0 }
 0x132   : > { %1067 = vmatmul.mubr.f32.vlgmr.msra.gmra.mrb[0].mxu1 %v4315_v55  ;;  %v2706_v55 = vld [vmem:[%s5861_s5 + $0x2c0] sm:$0xff] }
 0x133   : > { %1072 = vmatprep.mubr.f32.mxu1 %v615_v4  ;;  %v3165_v57 = vpack.c.bf16 %v2708_v56, %v2706_v55  ;;  %v2716_v4 = vld [vmem:[%s5861_s5 + $0x310] sm:$0xff] }
 0x134   : > { %v3173_v6 = vpack.c.bf16 %v2716_v4, %v2714_v3 }
 0x135   : > { %3166 = vmatpush1.bf16.msra.mxu0 %v3165_v57 }
 0x136   : > { %1073 = vmatmul.mubr.f32.gmra.mrb[2].mxu1 %v613_v63  ;;  %v2715_v63 = vld [vmem:[%s5861_s5 + $0x308] sm:$0xff]  ;;  %3168 = vmatprep.subr.bf16.mxu0 %v3167_v60  ;;  %v1102_v60 = vshrl.u32 %v1101_v27, 7 }
 0x137   : > { %1078 = vmatprep.mubr.f32.mxu1 %v621_v12  ;;  %v3171_v5 = vpack.c.bf16 %v2717_v2, %v2715_v63  ;;  %v3177_v12 = vpack.c.bf16 %v2720_v11, %v2718_v10 }
 0x138   : > { %v4550_v61 = vsub.s32 0, %v1102_v60  ;;  %v4555_v63 = vsub.s32 1, %v1102_v60  ;;  %v1151_v60 = vld [vmem:[%s4565_s26 + $0x38] sm:$0xff] }
 0x139   : > { %3170 = vmatpush1.bf16.msra.mxu0 %v3169_v1 }
 0x13a   : > { %1079 = vmatmul.mubr.f32.gmra.mrb[4].mxu1 %v619_v8  ;;  %3172 = vmatprep.subr.bf16.mxu0 %v3171_v5  ;;  %v2721_v8 = vld [vmem:[%s5861_s5 + $0x338] sm:$0xff]  ;;  %v1104_v1 = vrot.slane %v1099_v62, %v4550_v61  ;;  %v1108_v3 = vrot.slane %v1099_v62, %v4555_v63 }
 0x13b   : > { %1084 = vmatprep.mubr.f32.mxu1 %v627_v20  ;;  %v3175_v9 = vpack.c.bf16 %v2721_v8, %v2719_v7  ;;  %v2729_v20 = vld [vmem:[%s5861_s5 + $0x378] sm:$0xff] }
 0x13c   : > { %v3183_v21 = vpack.c.bf16 %v2729_v20, %v2727_v19 }
 0x13d   : > { %3174 = vmatpush1.bf16.msra.mxu0 %v3173_v6  ;;  %v4567_v6 = vstv %s437_s20 }
 0x13e   : > { %1085 = vmatmul.mubr.f32.gmra.mrb[6].mxu1 %v625_v16  ;;  %3176 = vmatprep.subr.bf16.mxu0 %v3175_v9  ;;  %v2722_v16 = vld [vmem:[%s5861_s5 + $0x340] sm:$0xff] }
 0x13f   : > { %v3181_v18 = vpack.c.bf16 %v2724_v17, %v2722_v16  ;;  %v1145_v16 = vld [vmem:[%s4565_s26 + $0x8] sm:$0xff] }
 0x141   : > { %3178 = vmatpush1.bf16.msra.mxu0 %v3177_v12  ;;  %v1144_v12 = vld [vmem:[%s4565_s26] sm:$0xff] }
 0x142   : > { %3180 = vmatprep.subr.bf16.mxu0 %v3179_v15 }
 0x145   : > { %3182 = vmatpush1.bf16.msra.mxu0 %v3181_v18 }
 0x146   : > { %3184 = vmatprep.subr.bf16.mxu0 %v3183_v21 }
 0x149   : > { %3186 = vmatpush1.bf16.msra.mxu0 %v3185_v24 }
 0x14a   : > { %3188 = vmatprep.subr.bf16.mxu0 %v3187_v28 }
 0x14d   : > { %3190 = vmatpush1.bf16.msra.mxu0 %v3189_v31  ;;  %v1147_v31 = vld [vmem:[%s4565_s26 + $0x18] sm:$0xff] }
 0x14e   : > { %3192 = vmatprep.subr.bf16.mxu0 %v3191_v34 }
 0x151   : > { %3194 = vmatpush1.bf16.msra.mxu0 %v3193_v37 }
 0x152   : > { %3196 = vmatprep.subr.bf16.mxu0 %v3195_v39 }
 0x155   : > { %3198 = vmatpush1.bf16.msra.mxu0 %v3197_v42 }
 0x156   : > { %3200 = vmatprep.subr.bf16.mxu0 %v3199_v45  ;;  %v1149_v45 = vld [vmem:[%s4565_s26 + $0x28] sm:$0xff] }
 0x159   : > { %3202 = vmatpush1.bf16.msra.mxu0 %v3201_v48 }
 0x15a   : > { %3204 = vmatprep.subr.bf16.mxu0 %v3203_v51 }
 0x1d5   : > { %v825_v52 = vpop.f32.mrb[24].mxu0 }
 0x1d6   : > { %v827_v53 = vpop.f32.mrb[25].mxu0 }
 0x1d9   : > { %v831_v54 = vpop.f32.mrb[26].mxu0 }
 0x1da   : > { %v833_v55 = vpop.f32.mrb[27].mxu0 }
 0x1dd   : > { %v837_v56 = vpop.f32.mrb[28].mxu0 }
 0x1de   : > { %v839_v57 = vpop.f32.mrb[29].mxu0 }
 0x1e1   : > { %v843_v58 = vpop.f32.mrb[30].mxu0 }
 0x1e2   : > { %v4548_v59 = vpop.f32.mrb[31].mxu0 }
 0x205   : > { %v1068_v2 = vpop.f32.mrb[0].mxu1 }
 0x206   : > { %v3555_v4 = vadd.f32 %v1068_v2, %v825_v52  ;;  %v1070_v5 = vpop.f32.mrb[1].mxu1 }
 0x207   : > { %v3556_v7 = vadd.f32 %v1070_v5, %v827_v53  ;;  %v1222_v5 = vld [vmem:[%s5861_s5 + $0x10] sm:$0xff] }
 0x208   : > { %v1111_v8 = vadd.f32 %v3555_v4, %v1104_v1  ;;  %v1220_v4 = vld [vmem:[%s5861_s5] sm:$0xff] }
 0x209   : > { %v1112_v9 = vadd.f32 %v3556_v7, %v1108_v3  ;;  %v1074_v10 = vpop.f32.mrb[2].mxu1 }
 0x20a   : > { %vm1119_vm2 = vcmp.ge.f32.partialorder %v1111_v8, 0.0  ;;  %v1128_v11 = vmul.f32 %v4567_v6, %v1111_v8  ;;  %v3557_v13 = vadd.f32 %v1074_v10, %v831_v54  ;;  %v1076_v14 = vpop.f32.mrb[3].mxu1 }
 0x20b   : > { %vm1120_vm3 = vcmp.ge.f32.partialorder %v1112_v9, 0.0  ;;  %v1129_v15 = vmul.f32 %v4567_v6, %v1112_v9  ;;  %v3558_v17 = vadd.f32 %v1076_v14, %v833_v55 }
 0x20c   : > { %v1136_v18 = vsel %vm1119_vm2, %v1111_v8, %v1128_v11  ;;  %v1113_v19 = vadd.f32 %v3557_v13, %v1104_v1  ;;  %v1225_v11 = vld [vmem:[%s5861_s5 + $0x28] sm:$0xff] }
 0x20d   : > { %v4573_v20 = vadd.f32 %v1144_v12, %v1136_v18  ;;  %v1137_v21 = vsel %vm1120_vm3, %v1112_v9, %v1129_v15  ;;  %v1114_v22 = vadd.f32 %v3558_v17, %v1108_v3  ;;  %v1080_v23 = vpop.f32.mrb[4].mxu1  ;;  %v1227_v12 = vld [vmem:[%s5861_s5 + $0x38] sm:$0xff] }
 0x20e   : > { %v4575_v24 = vadd.f32 %v1145_v16, %v1137_v21  ;;  %vm1121_vm4 = vcmp.ge.f32.partialorder %v1113_v19, 0.0  ;;  %v1130_v25 = vmul.f32 %v4567_v6, %v1113_v19  ;;  %v3559_v27 = vadd.f32 %v1080_v23, %v837_v56  ;;  %v1082_v28 = vpop.f32.mrb[5].mxu1 }
 0x20f   : > { %5877 = vst [vmem:[#allocation6_spill] sm:$0xff] %v4573_v20  ;;  %v1178_v29 = vrot.slane %v4573_v20, 7  ;;  %vm1122_vm5 = vcmp.ge.f32.partialorder %v1114_v22, 0.0  ;;  %v1131_v30 = vmul.f32 %v4567_v6, %v1114_v22  ;;  %v3560_v32 = vadd.f32 %v1082_v28, %v839_v57  ;;  %v1150_v57 = vld [vmem:[%s4565_s26 + $0x30] sm:$0xff] }
 0x210   : > { %5878 = vst [vmem:[#allocation7_spill] sm:$0xff] %v4575_v24  ;;  %v1179_v33 = vrot.slane %v4575_v24, 7  ;;  %v1138_v34 = vsel %vm1121_vm4, %v1113_v19, %v1130_v25  ;;  %v1115_v35 = vadd.f32 %v3559_v27, %v1104_v1  ;;  %v3205_v19 = vpack.c.bf16 %v1222_v5, %v1220_v4  ;;  %v1226_v27 = vld [vmem:[%s5861_s5 + $0x30] sm:$0xff] }
 0x211   : > { %1202 = vst [vmem:[#allocation2] sm:$0xfe] %v1178_v29  ;;  %v4583_v36 = vadd.f32 %v1146_v26, %v1138_v34  ;;  %v1139_v37 = vsel %vm1122_vm5, %v1114_v22, %v1131_v30  ;;  %v1116_v0 = vadd.f32 %v3560_v32, %v1108_v3  ;;  %v1086_v38 = vpop.f32.mrb[6].mxu1  ;;  %v3207_v25 = vpack.c.bf16 %v1227_v12, %v1225_v11  ;;  %v1224_v26 = vld [vmem:[%s5861_s5 + $0x20] sm:$0xff]  ;;  %v1231_v32 = vld [vmem:[%s5861_s5 + $0x58] sm:$0xff]  ;;  %v1238_v4 = vld [vmem:[%s5861_s5 + $0x90] sm:$0xff] }
 0x212   : > { %1203 = vst [vmem:[#allocation2 + $0x8] sm:$0xfe] %v1179_v33  ;;  %v4585_v39 = vadd.f32 %v1147_v31, %v1139_v37  ;;  %vm1123_vm6 = vcmp.ge.f32.partialorder %v1115_v35, 0.0  ;;  %v1132_v40 = vmul.f32 %v4567_v6, %v1115_v35  ;;  %v3561_v42 = vadd.f32 %v1086_v38, %v843_v58  ;;  %v1088_v43 = vpop.f32.mrb[7].mxu1  ;;  %v1229_v31 = vld [vmem:[%s5861_s5 + $0x48] sm:$0xff]  ;;  %v1228_v38 = vld [vmem:[%s5861_s5 + $0x40] sm:$0xff] }
 0x213   : > { %5879 = vst [vmem:[#allocation8_spill] sm:$0xff] %v4583_v36  ;;  %vm1124_vm8 = vcmp.ge.f32.partialorder %v1116_v0, 0.0  ;;  %v1133_v44 = vmul.f32 %v4567_v6, %v1116_v0  ;;  %v3562_v46 = vadd.f32 %v1088_v43, %v4548_v59  ;;  %v1180_v47 = vrot.slane %v4583_v36, 7  ;;  %v2813_v11 = vld [vmem:[%s5863_s7 + $0x218] sm:$0xff]  ;;  %v2810_v12 = vld [vmem:[%s5863_s7 + $0x200] sm:$0xff] }
 0x214   : > { %5880 = vst [vmem:[#allocation9_spill] sm:$0xff] %v4585_v39  ;;  %v1182_v48 = vrot.slane %v4585_v39, 7  ;;  %v1140_v49 = vsel %vm1123_vm6, %v1115_v35, %v1132_v40  ;;  %v1117_v50 = vadd.f32 %v3561_v42, %v1104_v1  ;;  %v3209_v35 = vpack.c.bf16 %v1226_v27, %v1224_v26  ;;  %v1230_v40 = vld [vmem:[%s5861_s5 + $0x50] sm:$0xff]  ;;  %v2815_v27 = vld [vmem:[%s5863_s7 + $0x228] sm:$0xff] }
 0x215   : > { %v4594_v51 = vadd.f32 %v1148_v41, %v1140_v49  ;;  %v1141_v52 = vsel %vm1124_vm8, %v1116_v0, %v1133_v44  ;;  %v1118_v53 = vadd.f32 %v3562_v46, %v1108_v3  ;;  %v4607_v62 = vsel %vm1177_vm7, %v1178_v29, %v1180_v47  ;;  %v1233_v44 = vld [vmem:[%s5861_s5 + $0x68] sm:$0xff]  ;;  %v1232_v49 = vld [vmem:[%s5861_s5 + $0x60] sm:$0xff] }
 0x216   : > { %v4597_v54 = vsel %vm1177_vm7, %v1179_v33, %v1182_v48  ;;  %v4599_v55 = vadd.f32 %v1149_v45, %v1141_v52  ;;  %vm1125_vm9 = vcmp.ge.f32.partialorder %v1117_v50, 0.0  ;;  %v1134_v56 = vmul.f32 %v4567_v6, %v1117_v50  ;;  %v1235_v45 = vld [vmem:[%s5861_s5 + $0x78] sm:$0xff] }
 0x217   : > { %5881 = vst [vmem:[#allocation10_spill] sm:$0xff] %v4594_v51  ;;  %v1184_v58 = vrot.slane %v4594_v51, 7  ;;  %vm1126_vm10 = vcmp.ge.f32.partialorder %v1118_v53, 0.0  ;;  %v1135_v59 = vmul.f32 %v4567_v6, %v1118_v53  ;;  %v1368_v9 = vrot.slane %v4597_v54, 1 }
 0x218   : > { %5882 = vst [vmem:[#allocation11_spill] sm:$0xff] %v4599_v55  ;;  %v1186_v1 = vrot.slane %v4599_v55, 7  ;;  %v1142_v2 = vsel %vm1125_vm9, %v1117_v50, %v1134_v56  ;;  %v1284_v3 = vld [vmem:[#allocation2] sm:$0xfe]  ;;  %v1365_v18 = vrot.slane %v4607_v62, 1  ;;  %v3211_v0 = vpack.c.bf16 %v1231_v32, %v1229_v31  ;;  %v1234_v50 = vld [vmem:[%s5861_s5 + $0x70] sm:$0xff] }
 0x219   : > { %v4616_v7 = vadd.f32 %v1150_v57, %v1142_v2  ;;  %v1143_v6 = vsel %vm1126_vm10, %v1118_v53, %v1135_v59  ;;  %v1285_v8 = vld [vmem:[#allocation2 + $0x8] sm:$0xfe]  ;;  %v1364_v10 = vrot.slane %v1284_v3, 1  ;;  %v4626_v13 = vsel %vm1177_vm7, %v1180_v47, %v1184_v58  ;;  %v1236_v3 = vld [vmem:[%s5861_s5 + $0x80] sm:$0xff] }
 0x21a   : > { %v4629_v14 = vsel %vm1177_vm7, %v1182_v48, %v1186_v1  ;;  %v4631_v15 = vadd.f32 %v1151_v60, %v1143_v6  ;;  %v1367_v16 = vrot.slane %v1285_v8, 1  ;;  %v1370_v30 = vrot.slane %v4626_v13, 1  ;;  %v1237_v57 = vld [vmem:[%s5861_s5 + $0x88] sm:$0xff] }
 0x21b   : > { %5883 = vst [vmem:[#allocation12_spill] sm:$0xff] %v4616_v7  ;;  %v1188_v17 = vrot.slane %v4616_v7, 7  ;;  %v1372_v21 = vrot.slane %v4629_v14, 1  ;;  %v1366_v28 = vsel %vm1363_vm11, %v1364_v10, %v1365_v18  ;;  %v3213_v46 = vpack.c.bf16 %v1230_v40, %v1228_v38  ;;  %v1213_v6 = vld [vmem:[#allocation2 + $0x8] sm:$0xff]  ;;  %v2821_v38 = vld [vmem:[%s5863_s7 + $0x258] sm:$0xff] }
 0x21c   : > { %5884 = vst [vmem:[#allocation13_spill] sm:$0xff] %v4631_v15  ;;  %v1190_v22 = vrot.slane %v4631_v15, 7  ;;  %v1369_v23 = vsel %vm1363_vm11, %v1367_v16, %v1368_v9  ;;  %v1371_v41 = vsel %vm1363_vm11, %v1365_v18, %v1370_v30  ;;  %v3215_v47 = vpack.c.bf16 %v1235_v45, %v1233_v44  ;;  %v1241_v8 = vld [vmem:[%s5861_s5 + $0xa8] sm:$0xff]  ;;  %v1242_v18 = vld [vmem:[%s5861_s5 + $0xb0] sm:$0xff] }
 0x21d   : > { %1210 = vst [vmem:[#allocation2 + $0x40] sm:$0x1] %v1188_v17  ;;  %1454 = vmatprep.mubr.f32.mxu0 %v1369_v23  ;;  %v1373_v29 = vsel %vm1363_vm11, %v1368_v9, %v1372_v21  ;;  %v4654_v33 = vsel %vm1177_vm7, %v1184_v58, %v1188_v17  ;;  %v1239_v58 = vld [vmem:[%s5861_s5 + $0x98] sm:$0xff]  ;;  %v3217_v60 = vpack.c.bf16 %v1234_v50, %v1232_v49  ;;  %v2811_v10 = vld [vmem:[%s5863_s7 + $0x208] sm:$0xff]  ;;  %v1240_v17 = vld [vmem:[%s5861_s5 + $0xa0] sm:$0xff] }
 0x21e   : > { %v4657_v34 = vsel %vm1177_vm7, %v1186_v1, %v1190_v22  ;;  %1211 = vst [vmem:[#allocation2 + $0x48] sm:$0x1] %v1190_v22  ;;  %1455 = vmatmul.mubr.f32.vlgmr.msra.gmra.mrb[32].mxu0 %v1366_v28  ;;  %v1374_v43 = vrot.slane %v4654_v33, 1  ;;  %v3219_v2 = vpack.c.bf16 %v1239_v58, %v1237_v57  ;;  %v1243_v9 = vld [vmem:[%s5861_s5 + $0xb8] sm:$0xff]  ;;  %v3221_v16 = vpack.c.bf16 %v1238_v4, %v1236_v3  ;;  %v1245_v23 = vld [vmem:[%s5861_s5 + $0xc8] sm:$0xff]  ;;  %v2820_v44 = vld [vmem:[%s5863_s7 + $0x250] sm:$0xff] }
 0x21f   : > { %3206 = vmatpush1.bf16.msra.mxu0 %v3205_v19  ;;  %1460 = vmatprep.mubr.f32.mxu0 %v1373_v29  ;;  %v1376_v37 = vrot.slane %v4657_v34, 1  ;;  %v3331_v19 = vpack.c.bf16 %v2813_v11, %v2811_v10  ;;  %v3223_v22 = vpack.c.bf16 %v1243_v9, %v1241_v8  ;;  %v2817_v28 = vld [vmem:[%s5863_s7 + $0x238] sm:$0xff]  ;;  %v2814_v29 = vld [vmem:[%s5863_s7 + $0x220] sm:$0xff]  ;;  %v1249_v45 = vld [vmem:[%s5861_s5 + $0xe8] sm:$0xff] }
 0x220   : > { %3208 = vmatprep.subr.bf16.mxu0 %v3207_v25  ;;  %v1375_v52 = vsel %vm1363_vm11, %v1370_v30, %v1374_v43  ;;  %v1247_v25 = vld [vmem:[%s5861_s5 + $0xd8] sm:$0xff]  ;;  %v2816_v30 = vld [vmem:[%s5863_s7 + $0x230] sm:$0xff]  ;;  %v3335_v31 = vpack.c.bf16 %v2817_v28, %v2815_v27  ;;  %v1248_v58 = vld [vmem:[%s5861_s5 + $0xe0] sm:$0xff] }
 0x221   : > { %v1377_v42 = vsel %vm1363_vm11, %v1372_v21, %v1376_v37  ;;  %v2812_v21 = vld [vmem:[%s5863_s7 + $0x210] sm:$0xff]  ;;  %3332 = vmatprep.subr.bf16.mxu1 %v3331_v19  ;;  %v3337_v32 = vpack.c.bf16 %v2816_v30, %v2814_v29  ;;  %v3227_v40 = vpack.c.bf16 %v1247_v25, %v1245_v23  ;;  %v2825_v49 = vld [vmem:[%s5863_s7 + $0x278] sm:$0xff]  ;;  %v2826_v9 = vld [vmem:[%s5863_s7 + $0x280] sm:$0xff] }
 0x222   : > { %1461 = vmatmul.mubr.f32.gmra.mrb[34].mxu0 %v1371_v41  ;;  %v3333_v26 = vpack.c.bf16 %v2812_v21, %v2810_v12  ;;  %v1246_v41 = vld [vmem:[%s5861_s5 + $0xd0] sm:$0xff]  ;;  %v2829_v3 = vld [vmem:[%s5863_s7 + $0x298] sm:$0xff]  ;;  %v1256_v23 = vld [vmem:[%s5861_s5 + $0x120] sm:$0xff] }
 0x223   : > { %3210 = vmatpush1.bf16.msra.mxu0 %v3209_v35  ;;  %1466 = vmatprep.mubr.f32.mxu0 %v1377_v42  ;;  %v3225_v35 = vpack.c.bf16 %v1242_v18, %v1240_v17  ;;  %v2828_v10 = vld [vmem:[%s5863_s7 + $0x290] sm:$0xff]  ;;  %v2833_v17 = vld [vmem:[%s5863_s7 + $0x2b8] sm:$0xff]  ;;  %v1257_v18 = vld [vmem:[%s5861_s5 + $0x128] sm:$0xff] }
 0x224   : > { %3212 = vmatprep.subr.bf16.mxu0 %v3211_v0  ;;  %v1286_v48 = vld [vmem:[#allocation2 + $0x40] sm:$0x1]  ;;  %3334 = vmatpush1.bf16.msra.mxu1 %v3333_v26  ;;  %v2819_v0 = vld [vmem:[%s5863_s7 + $0x248] sm:$0xff]  ;;  %v1254_v12 = vld [vmem:[%s5861_s5 + $0x110] sm:$0xff]  ;;  %v3349_v21 = vpack.c.bf16 %v2828_v10, %v2826_v9 }
 0x225   : > { %v1287_v53 = vld [vmem:[#allocation2 + $0x48] sm:$0x1]  ;;  %v1378_v56 = vrot.slane %v1286_v48, 1  ;;  %3336 = vmatprep.subr.bf16.mxu1 %v3335_v31  ;;  %v3339_v42 = vpack.c.bf16 %v2821_v38, %v2819_v0  ;;  %v1259_v19 = vld [vmem:[%s5861_s5 + $0x138] sm:$0xff]  ;;  %v2830_v26 = vld [vmem:[%s5863_s7 + $0x2a0] sm:$0xff] }
 0x226   : > { %1467 = vmatmul.mubr.f32.gmra.mrb[36].mxu0 %v1375_v52  ;;  %v1380_v59 = vrot.slane %v1287_v53, 1  ;;  %v2823_v48 = vld [vmem:[%s5863_s7 + $0x268] sm:$0xff]  ;;  %v2822_v53 = vld [vmem:[%s5863_s7 + $0x260] sm:$0xff]  ;;  %v2832_v27 = vld [vmem:[%s5863_s7 + $0x2b0] sm:$0xff]  ;;  %v3239_v28 = vpack.c.bf16 %v1259_v19, %v1257_v18 }
 0x227   : > { %3214 = vmatpush1.bf16.msra.mxu0 %v3213_v46  ;;  %v1379_v5 = vsel %vm1363_vm11, %v1374_v43, %v1378_v56  ;;  %v2818_v43 = vld [vmem:[%s5863_s7 + $0x240] sm:$0xff]  ;;  %v1251_v46 = vld [vmem:[%s5861_s5 + $0xf8] sm:$0xff]  ;;  %v3343_v52 = vpack.c.bf16 %v2825_v49, %v2823_v48  ;;  %v2824_v56 = vld [vmem:[%s5863_s7 + $0x270] sm:$0xff] }
 0x228   : > { %v1381_v1 = vsel %vm1363_vm11, %v1376_v37, %v1380_v59  ;;  %3216 = vmatprep.subr.bf16.mxu0 %v3215_v47  ;;  %v1244_v37 = vld [vmem:[%s5861_s5 + $0xc0] sm:$0xff]  ;;  %3338 = vmatpush1.bf16.msra.mxu1 %v3337_v32  ;;  %v3341_v47 = vpack.c.bf16 %v2820_v44, %v2818_v43  ;;  %v3231_v57 = vpack.c.bf16 %v1251_v46, %v1249_v45  ;;  %v1250_v59 = vld [vmem:[%s5861_s5 + $0xf0] sm:$0xff]  ;;  %v2835_v30 = vld [vmem:[%s5863_s7 + $0x2c8] sm:$0xff] }
 0x229   : > { %1472 = vmatprep.mubr.f32.mxu0 %v1381_v1  ;;  %v3229_v50 = vpack.c.bf16 %v1246_v41, %v1244_v37  ;;  %3340 = vmatprep.subr.bf16.mxu1 %v3339_v42  ;;  %v1253_v1 = vld [vmem:[%s5861_s5 + $0x108] sm:$0xff]  ;;  %v3345_v4 = vpack.c.bf16 %v2824_v56, %v2822_v53  ;;  %v1258_v29 = vld [vmem:[%s5861_s5 + $0x130] sm:$0xff]  ;;  %v2837_v31 = vld [vmem:[%s5863_s7 + $0x2d8] sm:$0xff]  ;;  %v3353_v37 = vpack.c.bf16 %v2832_v27, %v2830_v26 }
 0x22a   : > { %1473 = vmatmul.mubr.f32.gmra.mrb[38].mxu0 %v1379_v5  ;;  %v3233_v5 = vpack.c.bf16 %v1250_v59, %v1248_v58  ;;  %v1261_v32 = vld [vmem:[%s5861_s5 + $0x148] sm:$0xff]  ;;  %v3241_v0 = vpack.c.bf16 %v1258_v29, %v1256_v23  ;;  %v1260_v38 = vld [vmem:[%s5861_s5 + $0x140] sm:$0xff]  ;;  %v2836_v42 = vld [vmem:[%s5863_s7 + $0x2d0] sm:$0xff] }
 0x22b   : > { %3218 = vmatpush1.bf16.msra.mxu0 %v3217_v60  ;;  %1543 = vmatprep.mubr.f32.mxu0 %v1213_v6  ;;  %v2827_v60 = vld [vmem:[%s5863_s7 + $0x288] sm:$0xff]  ;;  %v1252_v6 = vld [vmem:[%s5861_s5 + $0x100] sm:$0xff]  ;;  %v1262_v44 = vld [vmem:[%s5861_s5 + $0x150] sm:$0xff] }
 0x22c   : > { %3220 = vmatprep.subr.bf16.mxu0 %v3219_v2  ;;  %v1255_v2 = vld [vmem:[%s5861_s5 + $0x118] sm:$0xff]  ;;  %3342 = vmatpush1.bf16.msra.mxu1 %v3341_v47  ;;  %v3347_v8 = vpack.c.bf16 %v2829_v3, %v2827_v60  ;;  %v2834_v41 = vld [vmem:[%s5863_s7 + $0x2c0] sm:$0xff]  ;;  %v2839_v45 = vld [vmem:[%s5863_s7 + $0x2e8] sm:$0xff] }
 0x22d   : > { %3344 = vmatprep.subr.bf16.mxu1 %v3343_v52  ;;  %v3235_v11 = vpack.c.bf16 %v1255_v2, %v1253_v1  ;;  %v2841_v46 = vld [vmem:[%s5863_s7 + $0x2f8] sm:$0xff]  ;;  %v1265_v47 = vld [vmem:[%s5861_s5 + $0x168] sm:$0xff]  ;;  %v3357_v49 = vpack.c.bf16 %v2836_v42, %v2834_v41  ;;  %v1264_v52 = vld [vmem:[%s5861_s5 + $0x160] sm:$0xff] }
 0x22e   : > { %v1267_v48 = vld [vmem:[%s5861_s5 + $0x178] sm:$0xff]  ;;  %v3359_v53 = vpack.c.bf16 %v2841_v46, %v2839_v45  ;;  %v2838_v56 = vld [vmem:[%s5863_s7 + $0x2e0] sm:$0xff]  ;;  %v1266_v59 = vld [vmem:[%s5861_s5 + $0x170] sm:$0xff] }
 0x22f   : > { %3222 = vmatpush1.bf16.msra.mxu0 %v3221_v16  ;;  %v2831_v16 = vld [vmem:[%s5863_s7 + $0x2a8] sm:$0xff]  ;;  %v3247_v58 = vpack.c.bf16 %v1267_v48, %v1265_v47  ;;  %v2845_v1 = vld [vmem:[%s5863_s7 + $0x318] sm:$0xff]  ;;  %v2842_v9 = vld [vmem:[%s5863_s7 + $0x300] sm:$0xff] }
 0x230   : > { %3224 = vmatprep.subr.bf16.mxu0 %v3223_v22  ;;  %3346 = vmatpush1.bf16.msra.mxu1 %v3345_v4  ;;  %v3237_v22 = vpack.c.bf16 %v1254_v12, %v1252_v6  ;;  %v3351_v25 = vpack.c.bf16 %v2833_v17, %v2831_v16  ;;  %v2843_v60 = vld [vmem:[%s5863_s7 + $0x308] sm:$0xff]  ;;  %v1271_v3 = vld [vmem:[%s5861_s5 + $0x198] sm:$0xff]  ;;  %v1268_v6 = vld [vmem:[%s5861_s5 + $0x180] sm:$0xff] }
 0x231   : > { %3348 = vmatprep.subr.bf16.mxu1 %v3347_v8  ;;  %v1269_v2 = vld [vmem:[%s5861_s5 + $0x188] sm:$0xff]  ;;  %v3363_v8 = vpack.c.bf16 %v2845_v1, %v2843_v60  ;;  %v2844_v10 = vld [vmem:[%s5863_s7 + $0x310] sm:$0xff]  ;;  %v2849_v17 = vld [vmem:[%s5863_s7 + $0x338] sm:$0xff] }
 0x232   : > { %v1270_v12 = vld [vmem:[%s5861_s5 + $0x190] sm:$0xff]  ;;  %v2847_v16 = vld [vmem:[%s5863_s7 + $0x328] sm:$0xff]  ;;  %v1275_v19 = vld [vmem:[%s5861_s5 + $0x1b8] sm:$0xff] }
 0x233   : > { %3226 = vmatpush1.bf16.msra.mxu0 %v3225_v35  ;;  %v1263_v35 = vld [vmem:[%s5861_s5 + $0x158] sm:$0xff]  ;;  %v1273_v18 = vld [vmem:[%s5861_s5 + $0x1a8] sm:$0xff]  ;;  %v3367_v23 = vpack.c.bf16 %v2849_v17, %v2847_v16  ;;  %v2848_v26 = vld [vmem:[%s5863_s7 + $0x330] sm:$0xff] }
 0x234   : > { %3228 = vmatprep.subr.bf16.mxu0 %v3227_v40  ;;  %3350 = vmatpush1.bf16.msra.mxu1 %v3349_v21  ;;  %v3355_v40 = vpack.c.bf16 %v2837_v31, %v2835_v30  ;;  %v3243_v43 = vpack.c.bf16 %v1263_v35, %v1261_v32  ;;  %v3365_v21 = vpack.c.bf16 %v2844_v10, %v2842_v9  ;;  %v1274_v29 = vld [vmem:[%s5861_s5 + $0x1b0] sm:$0xff]  ;;  %v1277_v30 = vld [vmem:[%s5861_s5 + $0x1c8] sm:$0xff]  ;;  %v1279_v31 = vld [vmem:[%s5861_s5 + $0x1d8] sm:$0xff] }
 0x235   : > { %3352 = vmatprep.subr.bf16.mxu1 %v3351_v25  ;;  %v2846_v25 = vld [vmem:[%s5863_s7 + $0x320] sm:$0xff]  ;;  %v3255_v27 = vpack.c.bf16 %v1275_v19, %v1273_v18  ;;  %v1283_v41 = vld [vmem:[%s5861_s5 + $0x1f8] sm:$0xff]  ;;  %v1282_v45 = vld [vmem:[%s5861_s5 + $0x1f0] sm:$0xff] }
 0x236   : > { %v3369_v32 = vpack.c.bf16 %v2848_v26, %v2846_v25  ;;  %v2747_v46 = vld [vmem:[%s5861_s5 + $0x408] sm:$0xff]  ;;  %v2749_v47 = vld [vmem:[%s5861_s5 + $0x418] sm:$0xff]  ;;  %v2752_v60 = vld [vmem:[%s5861_s5 + $0x430] sm:$0xff]  ;;  %v1646_v25 = vrot.slane %v4597_v54, 2 }
 0x237   : > { %3230 = vmatpush1.bf16.msra.mxu0 %v3229_v50  ;;  %v3245_v50 = vpack.c.bf16 %v1262_v44, %v1260_v38  ;;  %v1278_v38 = vld [vmem:[%s5861_s5 + $0x1d0] sm:$0xff]  ;;  %v1280_v44 = vld [vmem:[%s5861_s5 + $0x1e0] sm:$0xff]  ;;  %v2759_v9 = vld [vmem:[%s5861_s5 + $0x468] sm:$0xff] }
 0x238   : > { %3232 = vmatprep.subr.bf16.mxu0 %v3231_v57  ;;  %3354 = vmatpush1.bf16.msra.mxu1 %v3353_v37  ;;  %v2840_v57 = vld [vmem:[%s5863_s7 + $0x2f0] sm:$0xff]  ;;  %v3259_v37 = vpack.c.bf16 %v1279_v31, %v1277_v30  ;;  %v3265_v48 = vpack.c.bf16 %v1282_v45, %v1280_v44  ;;  %v1212_v1 = vld [vmem:[#allocation2] sm:$0xff]  ;;  %v2761_v10 = vld [vmem:[%s5861_s5 + $0x478] sm:$0xff] }
 0x239   : > { %3356 = vmatprep.subr.bf16.mxu1 %v3355_v40  ;;  %v3361_v4 = vpack.c.bf16 %v2840_v57, %v2838_v56  ;;  %v1281_v40 = vld [vmem:[%s5861_s5 + $0x1e8] sm:$0xff]  ;;  %v2753_v56 = vld [vmem:[%s5861_s5 + $0x438] sm:$0xff]  ;;  %v3279_v16 = vpack.c.bf16 %v2761_v10, %v2759_v9  ;;  %v2758_v17 = vld [vmem:[%s5861_s5 + $0x460] sm:$0xff] }
 0x23a   : > { %v2760_v18 = vld [vmem:[%s5861_s5 + $0x470] sm:$0xff]  ;;  %v2763_v19 = vld [vmem:[%s5861_s5 + $0x488] sm:$0xff]  ;;  %v2769_v30 = vld [vmem:[%s5861_s5 + $0x4b8] sm:$0xff] }
 0x23b   : > { %3234 = vmatpush1.bf16.msra.mxu0 %v3233_v5  ;;  %v3249_v5 = vpack.c.bf16 %v1266_v59, %v1264_v52  ;;  %v2748_v52 = vld [vmem:[%s5861_s5 + $0x410] sm:$0xff]  ;;  %v2750_v59 = vld [vmem:[%s5861_s5 + $0x420] sm:$0xff]  ;;  %v2775_v45 = vld [vmem:[%s5861_s5 + $0x4e8] sm:$0xff] }
 0x23c   : > { %3236 = vmatprep.subr.bf16.mxu0 %v3235_v11  ;;  %3358 = vmatpush1.bf16.msra.mxu1 %v3357_v49  ;;  %v3251_v11 = vpack.c.bf16 %v1271_v3, %v1269_v2  ;;  %v3267_v49 = vpack.c.bf16 %v2749_v47, %v2747_v46  ;;  %v2755_v2 = vld [vmem:[%s5861_s5 + $0x448] sm:$0xff]  ;;  %v2757_v3 = vld [vmem:[%s5861_s5 + $0x458] sm:$0xff]  ;;  %v2772_v44 = vld [vmem:[%s5861_s5 + $0x4d0] sm:$0xff] }
 0x23d   : > { %3360 = vmatprep.subr.bf16.mxu1 %v3359_v53  ;;  %v2751_v53 = vld [vmem:[%s5861_s5 + $0x428] sm:$0xff]  ;;  %v2777_v46 = vld [vmem:[%s5861_s5 + $0x4f8] sm:$0xff] }
 0x23f   : > { %3238 = vmatpush1.bf16.msra.mxu0 %v3237_v22  ;;  %v3253_v22 = vpack.c.bf16 %v1270_v12, %v1268_v6  ;;  %v2754_v6 = vld [vmem:[%s5861_s5 + $0x440] sm:$0xff]  ;;  %v1569_v12 = vld [vmem:[#allocation2 + $0x8] sm:$0xfc] }
 0x240   : > { %3240 = vmatprep.subr.bf16.mxu0 %v3239_v28  ;;  %3362 = vmatpush1.bf16.msra.mxu1 %v3361_v4  ;;  %v1272_v28 = vld [vmem:[%s5861_s5 + $0x1a0] sm:$0xff]  ;;  %v3273_v4 = vpack.c.bf16 %v2752_v60, %v2750_v59  ;;  %v2780_v59 = vld [vmem:[%s5861_s5 + $0x510] sm:$0xff]  ;;  %v2783_v60 = vld [vmem:[%s5861_s5 + $0x528] sm:$0xff] }
 0x241   : > { %3364 = vmatprep.subr.bf16.mxu1 %v3363_v8  ;;  %v3257_v35 = vpack.c.bf16 %v1274_v29, %v1272_v28  ;;  %v2756_v8 = vld [vmem:[%s5861_s5 + $0x450] sm:$0xff]  ;;  %v2767_v29 = vld [vmem:[%s5861_s5 + $0x4a8] sm:$0xff] }
 0x242   : > { %v2764_v28 = vld [vmem:[%s5861_s5 + $0x490] sm:$0xff] }
 0x243   : > { %3242 = vmatpush1.bf16.msra.mxu0 %v3241_v0  ;;  %v1276_v0 = vld [vmem:[%s5861_s5 + $0x1c0] sm:$0xff] }
 0x244   : > { %3244 = vmatprep.subr.bf16.mxu0 %v3243_v43  ;;  %3366 = vmatpush1.bf16.msra.mxu1 %v3365_v21  ;;  %v3261_v42 = vpack.c.bf16 %v1278_v38, %v1276_v0  ;;  %v3263_v43 = vpack.c.bf16 %v1283_v41, %v1281_v40  ;;  %v2765_v21 = vld [vmem:[%s5861_s5 + $0x498] sm:$0xff]  ;;  %v2768_v0 = vld [vmem:[%s5861_s5 + $0x4b0] sm:$0xff]  ;;  %v2771_v38 = vld [vmem:[%s5861_s5 + $0x4c8] sm:$0xff] }
 0x245   : > { %3368 = vmatprep.subr.bf16.mxu1 %v3367_v23  ;;  %v3281_v23 = vpack.c.bf16 %v2760_v18, %v2758_v17  ;;  %v3283_v26 = vpack.c.bf16 %v2765_v21, %v2763_v19  ;;  %v2773_v40 = vld [vmem:[%s5861_s5 + $0x4d8] sm:$0xff]  ;;  %v2790_v21 = vld [vmem:[%s5861_s5 + $0x560] sm:$0xff] }
 0x246   : > { %v2793_v17 = vld [vmem:[%s5861_s5 + $0x578] sm:$0xff] }
 0x247   : > { %3246 = vmatpush1.bf16.msra.mxu0 %v3245_v50  ;;  %v2746_v50 = vld [vmem:[%s5861_s5 + $0x400] sm:$0xff] }
 0x248   : > { %3248 = vmatprep.subr.bf16.mxu0 %v3247_v58  ;;  %3370 = vmatpush1.bf16.msra.mxu1 %v3369_v32  ;;  %v3269_v57 = vpack.c.bf16 %v2748_v52, %v2746_v50  ;;  %v3271_v58 = vpack.c.bf16 %v2753_v56, %v2751_v53  ;;  %v2776_v50 = vld [vmem:[%s5861_s5 + $0x4f0] sm:$0xff]  ;;  %v2779_v52 = vld [vmem:[%s5861_s5 + $0x508] sm:$0xff]  ;;  %v2781_v53 = vld [vmem:[%s5861_s5 + $0x518] sm:$0xff] }
 0x24b   : > { %3250 = vmatpush1.bf16.msra.mxu0 %v3249_v5  ;;  %v3275_v5 = vpack.c.bf16 %v2757_v3, %v2755_v2 }
 0x24c   : > { %3252 = vmatprep.subr.bf16.mxu0 %v3251_v11  ;;  %v3277_v11 = vpack.c.bf16 %v2756_v8, %v2754_v6  ;;  %v2787_v6 = vld [vmem:[%s5861_s5 + $0x548] sm:$0xff]  ;;  %v2789_v8 = vld [vmem:[%s5861_s5 + $0x558] sm:$0xff] }
 0x24d   : > { %v3307_v10 = vpack.c.bf16 %v2789_v8, %v2787_v6  ;;  %v1643_v6 = vrot.slane %v4607_v62, 2 }
 0x24f   : > { %3254 = vmatpush1.bf16.msra.mxu0 %v3253_v22  ;;  %v1645_v22 = vrot.slane %v1569_v12, 2  ;;  %v2788_v12 = vld [vmem:[%s5861_s5 + $0x550] sm:$0xff] }
 0x250   : > { %3256 = vmatprep.subr.bf16.mxu0 %v3255_v27  ;;  %v2762_v27 = vld [vmem:[%s5861_s5 + $0x480] sm:$0xff] }
 0x251   : > { %v1647_v31 = vsel %vm1641_vm12, %v1645_v22, %v1646_v25  ;;  %v3285_v32 = vpack.c.bf16 %v2764_v28, %v2762_v27  ;;  %v2792_v22 = vld [vmem:[%s5861_s5 + $0x570] sm:$0xff] }
 0x252   : > { %v3313_v27 = vpack.c.bf16 %v2792_v22, %v2790_v21  ;;  %v2882_v22 = vld [vmem:[%s5863_s7 + $0x440] sm:$0xff] }
 0x253   : > { %3258 = vmatpush1.bf16.msra.mxu0 %v3257_v35  ;;  %v3287_v35 = vpack.c.bf16 %v2769_v30, %v2767_v29  ;;  %v2794_v29 = vld [vmem:[%s5861_s5 + $0x580] sm:$0xff]  ;;  %v2796_v30 = vld [vmem:[%s5861_s5 + $0x590] sm:$0xff] }
 0x254   : > { %3260 = vmatprep.subr.bf16.mxu0 %v3259_v37  ;;  %v2766_v37 = vld [vmem:[%s5861_s5 + $0x4a0] sm:$0xff] }
 0x255   : > { %v3289_v41 = vpack.c.bf16 %v2768_v0, %v2766_v37  ;;  %v2798_v0 = vld [vmem:[%s5861_s5 + $0x5a0] sm:$0xff] }
 0x257   : > { %3262 = vmatpush1.bf16.msra.mxu0 %v3261_v42  ;;  %v3291_v42 = vpack.c.bf16 %v2773_v40, %v2771_v38  ;;  %v2800_v38 = vld [vmem:[%s5861_s5 + $0x5b0] sm:$0xff]  ;;  %v2803_v40 = vld [vmem:[%s5861_s5 + $0x5c8] sm:$0xff] }
 0x258   : > { %3264 = vmatprep.subr.bf16.mxu0 %v3263_v43  ;;  %v2770_v43 = vld [vmem:[%s5861_s5 + $0x4c0] sm:$0xff] }
 0x259   : > { %v3293_v47 = vpack.c.bf16 %v2772_v44, %v2770_v43  ;;  %v2802_v44 = vld [vmem:[%s5861_s5 + $0x5c0] sm:$0xff] }
 0x25b   : > { %3266 = vmatpush1.bf16.msra.mxu0 %v3265_v48  ;;  %v3295_v48 = vpack.c.bf16 %v2777_v46, %v2775_v45  ;;  %v2804_v45 = vld [vmem:[%s5861_s5 + $0x5d0] sm:$0xff]  ;;  %v2807_v46 = vld [vmem:[%s5861_s5 + $0x5e8] sm:$0xff] }
 0x25c   : > { %3268 = vmatprep.subr.bf16.mxu0 %v3267_v49  ;;  %v2774_v49 = vld [vmem:[%s5861_s5 + $0x4e0] sm:$0xff] }
 0x25d   : > { %v3297_v56 = vpack.c.bf16 %v2776_v50, %v2774_v49  ;;  %v2806_v50 = vld [vmem:[%s5861_s5 + $0x5e0] sm:$0xff] }
 0x25e   : > { %1544 = vmatmul.mubr.f32.vlgmr.msra.gmra.mrb[32].mxu0 %v1212_v1  ;;  %v2785_v1 = vld [vmem:[%s5861_s5 + $0x538] sm:$0xff] }
 0x25f   : > { %1549 = vmatprep.mubr.f32.mxu0 %v4597_v54  ;;  %3270 = vmatpush1.bf16.msra.mxu0 %v3269_v57  ;;  %v3299_v57 = vpack.c.bf16 %v2781_v53, %v2779_v52  ;;  %v3303_v3 = vpack.c.bf16 %v2785_v1, %v2783_v60  ;;  %v2808_v52 = vld [vmem:[%s5861_s5 + $0x5f0] sm:$0xff]  ;;  %v2875_v53 = vld [vmem:[%s5863_s7 + $0x408] sm:$0xff]  ;;  %v2874_v60 = vld [vmem:[%s5863_s7 + $0x400] sm:$0xff] }
 0x260   : > { %3272 = vmatprep.subr.bf16.mxu0 %v3271_v58  ;;  %v2778_v58 = vld [vmem:[%s5861_s5 + $0x500] sm:$0xff]  ;;  %v2876_v1 = vld [vmem:[%s5863_s7 + $0x410] sm:$0xff] }
 0x261   : > { %v3301_v2 = vpack.c.bf16 %v2780_v59, %v2778_v58  ;;  %v3329_v58 = vpack.c.bf16 %v2808_v52, %v2806_v50  ;;  %v5172_v8 = vpack.c.bf16 %v2876_v1, %v2874_v60  ;;  %v2884_v54 = vld [vmem:[%s5863_s7 + $0x450] sm:$0xff]  ;;  %v2894_v50 = vld [vmem:[%s5863_s7 + $0x4a0] sm:$0xff] }
 0x262   : > { %1550 = vmatmul.mubr.f32.gmra.mrb[34].mxu0 %v4607_v62  ;;  %v2883_v62 = vld [vmem:[%s5863_s7 + $0x448] sm:$0xff]  ;;  %v2896_v52 = vld [vmem:[%s5863_s7 + $0x4b0] sm:$0xff]  ;;  %v2898_v60 = vld [vmem:[%s5863_s7 + $0x4c0] sm:$0xff] }
 0x263   : > { %1555 = vmatprep.mubr.f32.mxu0 %v4629_v14  ;;  %3274 = vmatpush1.bf16.msra.mxu0 %v3273_v4  ;;  %v2782_v4 = vld [vmem:[%s5861_s5 + $0x520] sm:$0xff]  ;;  %v2900_v1 = vld [vmem:[%s5863_s7 + $0x4d0] sm:$0xff] }
 0x264   : > { %3276 = vmatprep.subr.bf16.mxu0 %v3275_v5  ;;  %v2784_v5 = vld [vmem:[%s5861_s5 + $0x530] sm:$0xff] }
 0x265   : > { %v3305_v9 = vpack.c.bf16 %v2784_v5, %v2782_v4  ;;  %v2881_v4 = vld [vmem:[%s5863_s7 + $0x438] sm:$0xff]  ;;  %v1650_v5 = vrot.slane %v4629_v14, 2  ;;  %v1648_v14 = vrot.slane %v4626_v13, 2 }
 0x266   : > { %1556 = vmatmul.mubr.f32.gmra.mrb[36].mxu0 %v4626_v13 }
 0x267   : > { %1561 = vmatprep.mubr.f32.mxu0 %v4657_v34  ;;  %3278 = vmatpush1.bf16.msra.mxu0 %v3277_v11  ;;  %v2786_v11 = vld [vmem:[%s5861_s5 + $0x540] sm:$0xff] }
 0x268   : > { %3280 = vmatprep.subr.bf16.mxu0 %v3279_v16  ;;  %v2791_v16 = vld [vmem:[%s5861_s5 + $0x568] sm:$0xff]  ;;  %v3309_v18 = vpack.c.bf16 %v2788_v12, %v2786_v11  ;;  %v2880_v11 = vld [vmem:[%s5863_s7 + $0x430] sm:$0xff] }
 0x269   : > { %v3311_v19 = vpack.c.bf16 %v2793_v17, %v2791_v16  ;;  %v2885_v16 = vld [vmem:[%s5863_s7 + $0x458] sm:$0xff]  ;;  %v1651_v17 = vsel %vm1641_vm12, %v1646_v25, %v1650_v5  ;;  %v1652_v25 = vrot.slane %v4654_v33, 2 }
 0x26a   : > { %1562 = vmatmul.mubr.f32.gmra.mrb[38].mxu0 %v4654_v33  ;;  %v5199_v21 = vpack.c.bf16 %v2885_v16, %v2883_v62  ;;  %v2906_v16 = vld [vmem:[%s5863_s7 + $0x500] sm:$0xff] }
 0x26b   : > { %3282 = vmatpush1.bf16.msra.mxu0 %v3281_v23  ;;  %1732 = vmatprep.mubr.f32.mxu0 %v1647_v31  ;;  %v2795_v23 = vld [vmem:[%s5861_s5 + $0x588] sm:$0xff] }
 0x26c   : > { %3284 = vmatprep.subr.bf16.mxu0 %v3283_v26  ;;  %v2797_v26 = vld [vmem:[%s5861_s5 + $0x598] sm:$0xff]  ;;  %v2799_v31 = vld [vmem:[%s5861_s5 + $0x5a8] sm:$0xff] }
 0x26d   : > { %v3315_v28 = vpack.c.bf16 %v2797_v26, %v2795_v23  ;;  %v2887_v23 = vld [vmem:[%s5863_s7 + $0x468] sm:$0xff]  ;;  %v2889_v26 = vld [vmem:[%s5863_s7 + $0x478] sm:$0xff] }
 0x26e   : > { %v5220_v33 = vpack.c.bf16 %v2889_v26, %v2887_v23  ;;  %v2851_v26 = vld [vmem:[%s5863_s7 + $0x348] sm:$0xff] }
 0x26f   : > { %3286 = vmatpush1.bf16.msra.mxu0 %v3285_v32  ;;  %v2801_v32 = vld [vmem:[%s5861_s5 + $0x5b8] sm:$0xff] }
 0x270   : > { %3288 = vmatprep.subr.bf16.mxu0 %v3287_v35  ;;  %v3317_v35 = vpack.c.bf16 %v2796_v30, %v2794_v29  ;;  %v3319_v37 = vpack.c.bf16 %v2801_v32, %v2799_v31  ;;  %v1570_v29 = vld [vmem:[#allocation2 + $0x40] sm:$0x3]  ;;  %v5217_v30 = vpack.c.bf16 %v2884_v54, %v2882_v22  ;;  %v2888_v32 = vld [vmem:[%s5863_s7 + $0x470] sm:$0xff] }
 0x271   : > { %v2886_v31 = vld [vmem:[%s5863_s7 + $0x460] sm:$0xff] }
 0x273   : > { %3290 = vmatpush1.bf16.msra.mxu0 %v3289_v41  ;;  %v2805_v41 = vld [vmem:[%s5861_s5 + $0x5d8] sm:$0xff] }
 0x274   : > { %3292 = vmatprep.subr.bf16.mxu0 %v3291_v42  ;;  %v3321_v42 = vpack.c.bf16 %v2800_v38, %v2798_v0  ;;  %v3323_v43 = vpack.c.bf16 %v2805_v41, %v2803_v40  ;;  %v2891_v0 = vld [vmem:[%s5863_s7 + $0x488] sm:$0xff]  ;;  %v2893_v38 = vld [vmem:[%s5863_s7 + $0x498] sm:$0xff]  ;;  %v5237_v41 = vpack.c.bf16 %v2888_v32, %v2886_v31  ;;  %v2852_v31 = vld [vmem:[%s5863_s7 + $0x350] sm:$0xff] }
 0x275   : > { %v2915_v32 = vld [vmem:[%s5863_s7 + $0x548] sm:$0xff] }
 0x277   : > { %3294 = vmatpush1.bf16.msra.mxu0 %v3293_v47  ;;  %v2809_v47 = vld [vmem:[%s5861_s5 + $0x5f8] sm:$0xff] }
 0x278   : > { %3296 = vmatprep.subr.bf16.mxu0 %v3295_v48  ;;  %v3325_v48 = vpack.c.bf16 %v2804_v45, %v2802_v44  ;;  %v3327_v49 = vpack.c.bf16 %v2809_v47, %v2807_v46  ;;  %v2892_v44 = vld [vmem:[%s5863_s7 + $0x490] sm:$0xff]  ;;  %v2895_v46 = vld [vmem:[%s5863_s7 + $0x4a8] sm:$0xff]  ;;  %v2897_v47 = vld [vmem:[%s5863_s7 + $0x4b8] sm:$0xff] }
 0x27b   : > { %3298 = vmatpush1.bf16.msra.mxu0 %v3297_v56  ;;  %v2877_v56 = vld [vmem:[%s5863_s7 + $0x418] sm:$0xff] }
 0x27c   : > { %3300 = vmatprep.subr.bf16.mxu0 %v3299_v57  ;;  %v1568_v57 = vld [vmem:[#allocation2] sm:$0xfc]  ;;  %v5156_v59 = vpack.c.bf16 %v2877_v56, %v2875_v53  ;;  %v2899_v53 = vld [vmem:[%s5863_s7 + $0x4c8] sm:$0xff]  ;;  %v2901_v56 = vld [vmem:[%s5863_s7 + $0x4d8] sm:$0xff] }
 0x27f   : > { %3302 = vmatpush1.bf16.msra.mxu0 %v3301_v2  ;;  %v1642_v2 = vrot.slane %v1568_v57, 2  ;;  %v5274_v57 = vpack.c.bf16 %v2896_v52, %v2894_v50  ;;  %v2856_v50 = vld [vmem:[%s5863_s7 + $0x370] sm:$0xff]  ;;  %v2919_v52 = vld [vmem:[%s5863_s7 + $0x568] sm:$0xff] }
 0x280   : > { %3304 = vmatprep.subr.bf16.mxu0 %v3303_v3  ;;  %v2879_v3 = vld [vmem:[%s5863_s7 + $0x428] sm:$0xff] }
 0x281   : > { %v1644_v12 = vsel %vm1641_vm12, %v1642_v2, %v1643_v6  ;;  %v2903_v2 = vld [vmem:[%s5863_s7 + $0x4e8] sm:$0xff] }
 0x283   : > { %3306 = vmatpush1.bf16.msra.mxu0 %v3305_v9  ;;  %v5175_v9 = vpack.c.bf16 %v2881_v4, %v2879_v3  ;;  %v2905_v3 = vld [vmem:[%s5863_s7 + $0x4f8] sm:$0xff]  ;;  %v5292_v4 = vpack.c.bf16 %v2900_v1, %v2898_v60  ;;  %v2918_v60 = vld [vmem:[%s5863_s7 + $0x560] sm:$0xff]  ;;  %v2920_v1 = vld [vmem:[%s5863_s7 + $0x570] sm:$0xff] }
 0x284   : > { %3308 = vmatprep.subr.bf16.mxu0 %v3307_v10  ;;  %v2878_v10 = vld [vmem:[%s5863_s7 + $0x420] sm:$0xff] }
 0x285   : > { %v5196_v13 = vpack.c.bf16 %v2880_v11, %v2878_v10  ;;  %v2904_v10 = vld [vmem:[%s5863_s7 + $0x4f0] sm:$0xff]  ;;  %v2907_v11 = vld [vmem:[%s5863_s7 + $0x508] sm:$0xff] }
 0x287   : > { %3310 = vmatpush1.bf16.msra.mxu0 %v3309_v18  ;;  %v1654_v18 = vrot.slane %v4657_v34, 2  ;;  %v1649_v34 = vsel %vm1641_vm12, %v1643_v6, %v1648_v14  ;;  %v2902_v6 = vld [vmem:[%s5863_s7 + $0x4e0] sm:$0xff] }
 0x288   : > { %3312 = vmatprep.subr.bf16.mxu0 %v3311_v19  ;;  %v1571_v19 = vld [vmem:[#allocation2 + $0x48] sm:$0x3] }
 0x28b   : > { %3314 = vmatpush1.bf16.msra.mxu0 %v3313_v27  ;;  %v1655_v27 = vsel %vm1641_vm12, %v1650_v5, %v1654_v18  ;;  %v5295_v5 = vpack.c.bf16 %v2905_v3, %v2903_v2  ;;  %v5400_v3 = vpack.c.bf16 %v2920_v1, %v2918_v60  ;;  %v2868_v60 = vld [vmem:[%s5863_s7 + $0x3d0] sm:$0xff]  ;;  %v2931_v1 = vld [vmem:[%s5863_s7 + $0x5c8] sm:$0xff] }
 0x28c   : > { %3316 = vmatprep.subr.bf16.mxu0 %v3315_v28  ;;  %v1658_v28 = vrot.slane %v1571_v19, 2  ;;  %v2913_v19 = vld [vmem:[%s5863_s7 + $0x538] sm:$0xff] }
 0x28e   : > { %v1659_v40 = vsel %vm1641_vm12, %v1654_v18, %v1658_v28  ;;  %v2911_v18 = vld [vmem:[%s5863_s7 + $0x528] sm:$0xff] }
 0x28f   : > { %3318 = vmatpush1.bf16.msra.mxu0 %v3317_v35  ;;  %v1653_v35 = vsel %vm1641_vm12, %v1648_v14, %v1652_v25  ;;  %v5310_v14 = vpack.c.bf16 %v2904_v10, %v2902_v6  ;;  %v5331_v54 = vpack.c.bf16 %v2913_v19, %v2911_v18  ;;  %v2859_v6 = vld [vmem:[%s5863_s7 + $0x388] sm:$0xff]  ;;  %v2861_v10 = vld [vmem:[%s5863_s7 + $0x398] sm:$0xff] }
 0x290   : > { %3320 = vmatprep.subr.bf16.mxu0 %v3319_v37  ;;  %v1656_v37 = vrot.slane %v1570_v29, 2  ;;  %v2850_v29 = vld [vmem:[%s5863_s7 + $0x340] sm:$0xff]  ;;  %v2925_v19 = vld [vmem:[%s5863_s7 + $0x598] sm:$0xff] }
 0x292   : > { %v1657_v45 = vsel %vm1641_vm12, %v1652_v25, %v1656_v37  ;;  %v2912_v25 = vld [vmem:[%s5863_s7 + $0x530] sm:$0xff]  ;;  %v2917_v37 = vld [vmem:[%s5863_s7 + $0x558] sm:$0xff] }
 0x293   : > { %3322 = vmatpush1.bf16.msra.mxu0 %v3321_v42  ;;  %v5240_v42 = vpack.c.bf16 %v2893_v38, %v2891_v0  ;;  %v2914_v0 = vld [vmem:[%s5863_s7 + $0x540] sm:$0xff]  ;;  %v2916_v38 = vld [vmem:[%s5863_s7 + $0x550] sm:$0xff] }
 0x294   : > { %3324 = vmatprep.subr.bf16.mxu0 %v3323_v43  ;;  %v2890_v43 = vld [vmem:[%s5863_s7 + $0x480] sm:$0xff] }
 0x297   : > { %3326 = vmatpush1.bf16.msra.mxu0 %v3325_v48  ;;  %v5256_v48 = vpack.c.bf16 %v2892_v44, %v2890_v43  ;;  %v5370_v43 = vpack.c.bf16 %v2916_v38, %v2914_v0  ;;  %v2855_v44 = vld [vmem:[%s5863_s7 + $0x368] sm:$0xff]  ;;  %v2929_v38 = vld [vmem:[%s5863_s7 + $0x5b8] sm:$0xff] }
 0x298   : > { %3328 = vmatprep.subr.bf16.mxu0 %v3327_v49  ;;  %v5259_v49 = vpack.c.bf16 %v2897_v47, %v2895_v46  ;;  %v2854_v47 = vld [vmem:[%s5863_s7 + $0x360] sm:$0xff] }
 0x29b   : > { %3330 = vmatpush1.bf16.msra.mxu0 %v3329_v58  ;;  %v5277_v58 = vpack.c.bf16 %v2901_v56, %v2899_v53  ;;  %v3377_v53 = vpack.c.bf16 %v2856_v50, %v2854_v47  ;;  %v2921_v56 = vld [vmem:[%s5863_s7 + $0x578] sm:$0xff]  ;;  %v2867_v50 = vld [vmem:[%s5863_s7 + $0x3c8] sm:$0xff] }
 0x29c   : > { %3460 = vmatprep.subr.bf16.mxu0 %v5156_v59  ;;  %v5398_v2 = vpack.c.bf16 %v2921_v56, %v2919_v52  ;;  %v2869_v52 = vld [vmem:[%s5863_s7 + $0x3d8] sm:$0xff]  ;;  %v2866_v56 = vld [vmem:[%s5863_s7 + $0x3c0] sm:$0xff] }
 0x29e   : > { %1733 = vmatmul.mubr.f32.vlgmr.msra.gmra.mrb[32].mxu0 %v1644_v12  ;;  %v2909_v12 = vld [vmem:[%s5863_s7 + $0x518] sm:$0xff] }
 0x29f   : > { %1738 = vmatprep.mubr.f32.mxu0 %v1651_v17  ;;  %3462 = vmatpush1.bf16.msra.mxu0 %v5172_v8  ;;  %v5313_v62 = vpack.c.bf16 %v2909_v12, %v2907_v11  ;;  %v2908_v17 = vld [vmem:[%s5863_s7 + $0x510] sm:$0xff]  ;;  %v3379_v11 = vpack.c.bf16 %v2861_v10, %v2859_v6  ;;  %v2858_v12 = vld [vmem:[%s5863_s7 + $0x380] sm:$0xff]  ;;  %v3389_v6 = vpack.c.bf16 %v2868_v60, %v2866_v56  ;;  %v2933_v10 = vld [vmem:[%s5863_s7 + $0x5d8] sm:$0xff] }
 0x2a0   : > { %3464 = vmatprep.subr.bf16.mxu0 %v5175_v9  ;;  %v5328_v22 = vpack.c.bf16 %v2908_v17, %v2906_v16  ;;  %v2860_v16 = vld [vmem:[%s5863_s7 + $0x390] sm:$0xff]  ;;  %v2923_v17 = vld [vmem:[%s5863_s7 + $0x588] sm:$0xff] }
 0x2a1   : > { %v3381_v18 = vpack.c.bf16 %v2860_v16, %v2858_v12  ;;  %v2932_v12 = vld [vmem:[%s5863_s7 + $0x5d0] sm:$0xff]  ;;  %v5488_v16 = vpack.c.bf16 %v2933_v10, %v2931_v1  ;;  %v1793_v1 = vstv %s438_s16 }
 0x2a2   : > { %1739 = vmatmul.mubr.f32.gmra.mrb[34].mxu0 %v1649_v34  ;;  %v2910_v34 = vld [vmem:[%s5863_s7 + $0x520] sm:$0xff] }
 0x2a3   : > { %1744 = vmatprep.mubr.f32.mxu0 %v1655_v27  ;;  %3466 = vmatpush1.bf16.msra.mxu0 %v5196_v13  ;;  %v5340_v23 = vpack.c.bf16 %v2912_v25, %v2910_v34  ;;  %v2853_v27 = vld [vmem:[%s5863_s7 + $0x358] sm:$0xff]  ;;  %v2922_v34 = vld [vmem:[%s5863_s7 + $0x580] sm:$0xff]  ;;  %v2924_v25 = vld [vmem:[%s5863_s7 + $0x590] sm:$0xff] }
 0x2a4   : > { %3468 = vmatprep.subr.bf16.mxu0 %v5199_v21  ;;  %v3371_v28 = vpack.c.bf16 %v2853_v27, %v2851_v26  ;;  %v5428_v26 = vpack.c.bf16 %v2925_v19, %v2923_v17  ;;  %v5430_v27 = vpack.c.bf16 %v2924_v25, %v2922_v34  ;;  %v2873_v19 = vld [vmem:[%s5863_s7 + $0x3f8] sm:$0xff]  ;;  %v2870_v25 = vld [vmem:[%s5863_s7 + $0x3e0] sm:$0xff] }
 0x2a6   : > { %1745 = vmatmul.mubr.f32.gmra.mrb[36].mxu0 %v1653_v35  ;;  %v3373_v35 = vpack.c.bf16 %v2852_v31, %v2850_v29  ;;  %3372 = vmatprep.subr.bf16.mxu1 %v3371_v28  ;;  %v2863_v28 = vld [vmem:[%s5863_s7 + $0x3a8] sm:$0xff]  ;;  %v2865_v29 = vld [vmem:[%s5863_s7 + $0x3b8] sm:$0xff] }
 0x2a7   : > { %1750 = vmatprep.mubr.f32.mxu0 %v1659_v40  ;;  %3470 = vmatpush1.bf16.msra.mxu0 %v5217_v30  ;;  %v5368_v40 = vpack.c.bf16 %v2917_v37, %v2915_v32  ;;  %v3383_v31 = vpack.c.bf16 %v2865_v29, %v2863_v28  ;;  %v2862_v32 = vld [vmem:[%s5863_s7 + $0x3a0] sm:$0xff]  ;;  %v2927_v37 = vld [vmem:[%s5863_s7 + $0x5a8] sm:$0xff]  ;;  %v2872_v28 = vld [vmem:[%s5863_s7 + $0x3f0] sm:$0xff] }
 0x2a8   : > { %3472 = vmatprep.subr.bf16.mxu0 %v5220_v33  ;;  %3374 = vmatpush1.bf16.msra.mxu1 %v3373_v35  ;;  %v2864_v35 = vld [vmem:[%s5863_s7 + $0x3b0] sm:$0xff]  ;;  %v2935_v29 = vld [vmem:[%s5863_s7 + $0x5e8] sm:$0xff] }
 0x2a9   : > { %v3385_v0 = vpack.c.bf16 %v2864_v35, %v2862_v32  ;;  %v2937_v32 = vld [vmem:[%s5863_s7 + $0x5f8] sm:$0xff]  ;;  %v2934_v35 = vld [vmem:[%s5863_s7 + $0x5e0] sm:$0xff] }
 0x2aa   : > { %1751 = vmatmul.mubr.f32.gmra.mrb[38].mxu0 %v1657_v45  ;;  %v2857_v45 = vld [vmem:[%s5863_s7 + $0x378] sm:$0xff] }
 0x2ab   : > { %3474 = vmatpush1.bf16.msra.mxu0 %v5237_v41  ;;  %v3375_v46 = vpack.c.bf16 %v2857_v45, %v2855_v44  ;;  %v2926_v44 = vld [vmem:[%s5863_s7 + $0x5a0] sm:$0xff]  ;;  %v2928_v45 = vld [vmem:[%s5863_s7 + $0x5b0] sm:$0xff] }
 0x2ac   : > { %3476 = vmatprep.subr.bf16.mxu0 %v5240_v42  ;;  %v5460_v47 = vpack.c.bf16 %v2928_v45, %v2926_v44  ;;  %v1861_v44 = vld [vmem:[%s5863_s7 + $0x8] sm:$0xff]  ;;  %v1863_v45 = vld [vmem:[%s5863_s7 + $0x18] sm:$0xff] }
 0x2ad   : > { %3376 = vmatprep.subr.bf16.mxu1 %v3375_v46  ;;  %v5458_v46 = vpack.c.bf16 %v2929_v38, %v2927_v37  ;;  %v2936_v37 = vld [vmem:[%s5863_s7 + $0x5f0] sm:$0xff] }
 0x2ae   : > { %3378 = vmatpush1.bf16.msra.mxu1 %v3377_v53  ;;  %v3387_v53 = vpack.c.bf16 %v2869_v52, %v2867_v50  ;;  %v5520_v38 = vpack.c.bf16 %v2936_v37, %v2934_v35  ;;  %v3395_v50 = vpack.c.bf16 %v1863_v45, %v1861_v44  ;;  %v1765_v52 = vld [vmem:[%s5862_s6] sm:$0x3] }
 0x2af   : > { %3478 = vmatpush1.bf16.msra.mxu0 %v5256_v48  ;;  %3380 = vmatprep.subr.bf16.mxu1 %v3379_v11  ;;  %v2930_v11 = vld [vmem:[%s5863_s7 + $0x5c0] sm:$0xff]  ;;  %v1774_v56 = vrot.slane %v1765_v52, %v4555_v63 }
 0x2b0   : > { %3480 = vmatprep.subr.bf16.mxu0 %v5259_v49  ;;  %v5490_v17 = vpack.c.bf16 %v2932_v12, %v2930_v11 }
 0x2b2   : > { %3382 = vmatpush1.bf16.msra.mxu1 %v3381_v18  ;;  %v2871_v18 = vld [vmem:[%s5863_s7 + $0x3e8] sm:$0xff] }
 0x2b3   : > { %3482 = vmatpush1.bf16.msra.mxu0 %v5274_v57  ;;  %3384 = vmatprep.subr.bf16.mxu1 %v3383_v31  ;;  %v3391_v34 = vpack.c.bf16 %v2873_v19, %v2871_v18  ;;  %v3393_v31 = vpack.c.bf16 %v2872_v28, %v2870_v25 }
 0x2b4   : > { %3484 = vmatprep.subr.bf16.mxu0 %v5277_v58 }
 0x2b6   : > { %3386 = vmatpush1.bf16.msra.mxu1 %v3385_v0  ;;  %v5518_v0 = vpack.c.bf16 %v2937_v32, %v2935_v29 }
 0x2b7   : > { %3486 = vmatpush1.bf16.msra.mxu0 %v5292_v4  ;;  %3388 = vmatprep.subr.bf16.mxu1 %v3387_v53  ;;  %v1770_v53 = vrot.slane %v1765_v52, %v4550_v61 }
 0x2b8   : > { %3488 = vmatprep.subr.bf16.mxu0 %v5295_v5 }
 0x2ba   : > { %3390 = vmatpush1.bf16.msra.mxu1 %v3389_v6 }
 0x2bb   : > { %3490 = vmatpush1.bf16.msra.mxu0 %v5310_v14  ;;  %3392 = vmatprep.subr.bf16.mxu1 %v3391_v34 }
 0x2bc   : > { %3492 = vmatprep.subr.bf16.mxu0 %v5313_v62 }
 0x2be   : > { %3394 = vmatpush1.bf16.msra.mxu1 %v3393_v31 }
 0x2bf   : > { %3494 = vmatpush1.bf16.msra.mxu0 %v5328_v22  ;;  %3396 = vmatprep.subr.bf16.mxu1 %v3395_v50 }
 0x2c0   : > { %3496 = vmatprep.subr.bf16.mxu0 %v5331_v54 }
 0x2c3   : > { %3498 = vmatpush1.bf16.msra.mxu0 %v5340_v23 }
 0x2c4   : > { %3500 = vmatprep.subr.bf16.mxu0 %v5368_v40 }
 0x2c7   : > { %3502 = vmatpush1.bf16.msra.mxu0 %v5370_v43 }
 0x2c8   : > { %3504 = vmatprep.subr.bf16.mxu0 %v5398_v2 }
 0x2cb   : > { %3506 = vmatpush1.bf16.msra.mxu0 %v5400_v3 }
 0x2cc   : > { %3508 = vmatprep.subr.bf16.mxu0 %v5428_v26 }
 0x2cf   : > { %3510 = vmatpush1.bf16.msra.mxu0 %v5430_v27 }
 0x2d0   : > { %3512 = vmatprep.subr.bf16.mxu0 %v5458_v46 }
 0x2d3   : > { %3514 = vmatpush1.bf16.msra.mxu0 %v5460_v47 }
 0x2d4   : > { %3516 = vmatprep.subr.bf16.mxu0 %v5488_v16 }
 0x2d7   : > { %3518 = vmatpush1.bf16.msra.mxu0 %v5490_v17 }
 0x2d8   : > { %3520 = vmatprep.subr.bf16.mxu0 %v5518_v0 }
 0x2db   : > { %3522 = vmatpush1.bf16.msra.mxu0 %v5520_v38 }
 0x371   : > { %v1734_v60 = vpop.f32.mrb[32].mxu0 }
 0x372   : > { %v1777_v6 = vadd.f32 %v1770_v53, %v1734_v60  ;;  %v1736_v10 = vpop.f32.mrb[33].mxu0 }
 0x373   : > { %v1778_v11 = vadd.f32 %v1774_v56, %v1736_v10  ;;  %v5543_v10 = vld [vmem:[%s5863_s7 + $0x10] sm:$0xff] }
 0x374   : > { %vm1785_vm13 = vcmp.ge.f32.partialorder %v1777_v6, 0.0  ;;  %v1794_v12 = vmul.f32 %v1793_v1, %v1777_v6 }
 0x375   : > { %vm1786_vm14 = vcmp.ge.f32.partialorder %v1778_v11, 0.0  ;;  %v1795_v18 = vmul.f32 %v1793_v1, %v1778_v11  ;;  %v1740_v19 = vpop.f32.mrb[34].mxu0 }
 0x376   : > { %v1802_v34 = vsel %vm1785_vm13, %v1777_v6, %v1794_v12  ;;  %v1779_v25 = vadd.f32 %v1770_v53, %v1740_v19  ;;  %v1742_v28 = vpop.f32.mrb[35].mxu0  ;;  %v5538_v6 = vld [vmem:[%s5863_s7] sm:$0xff]  ;;  %v5548_v19 = vld [vmem:[%s5863_s7 + $0x28] sm:$0xff] }
 0x377   : > { %v1818_v29 = vrot.slane %v1802_v34, 7  ;;  %v1803_v31 = vsel %vm1786_vm14, %v1778_v11, %v1795_v18  ;;  %v1780_v32 = vadd.f32 %v1774_v56, %v1742_v28  ;;  %v5553_v34 = vld [vmem:[%s5863_s7 + $0x38] sm:$0xff] }
 0x378   : > { %v1819_v35 = vrot.slane %v1803_v31, 7  ;;  %vm1787_vm15 = vcmp.ge.f32.partialorder %v1779_v25, 0.0  ;;  %v1796_v37 = vmul.f32 %v1793_v1, %v1779_v25 }
 0x379   : > { %1842 = vst [vmem:[#allocation2] sm:$0xfe] %v1818_v29  ;;  %vm1788_vm0 = vcmp.ge.f32.partialorder %v1780_v32, 0.0  ;;  %v1797_v44 = vmul.f32 %v1793_v1, %v1780_v32  ;;  %v1746_v45 = vpop.f32.mrb[36].mxu0 }
 0x37a   : > { %1843 = vst [vmem:[#allocation2 + $0x8] sm:$0xfe] %v1819_v35  ;;  %v1804_v50 = vsel %vm1787_vm15, %v1779_v25, %v1796_v37  ;;  %v1781_v52 = vadd.f32 %v1770_v53, %v1746_v45  ;;  %v1748_v60 = vpop.f32.mrb[37].mxu0 }
 0x37b   : > { %v1820_v11 = vrot.slane %v1804_v50, 7  ;;  %v1805_v12 = vsel %vm1788_vm0, %v1780_v32, %v1797_v44  ;;  %v1782_v18 = vadd.f32 %v1774_v56, %v1748_v60  ;;  %v3397_v44 = vpack.c.bf16 %v5543_v10, %v5538_v6 }
 0x37c   : > { %v1822_v25 = vrot.slane %v1805_v12, 7  ;;  %vm1789_vm1 = vcmp.ge.f32.partialorder %v1781_v52, 0.0  ;;  %v1798_v28 = vmul.f32 %v1793_v1, %v1781_v52  ;;  %v3399_v12 = vpack.c.bf16 %v5553_v34, %v5548_v19 }
 0x37d   : > { %v5556_v31 = vsel %vm1177_vm7, %v1818_v29, %v1820_v11  ;;  %vm1790_vm2 = vcmp.ge.f32.partialorder %v1782_v18, 0.0  ;;  %v1799_v37 = vmul.f32 %v1793_v1, %v1782_v18  ;;  %v1752_v32 = vpop.f32.mrb[38].mxu0 }
 0x37e   : > { %v5561_v45 = vsel %vm1177_vm7, %v1819_v35, %v1822_v25  ;;  %v1806_v50 = vsel %vm1789_vm1, %v1781_v52, %v1798_v28  ;;  %v1783_v60 = vadd.f32 %v1770_v53, %v1752_v32  ;;  %v1754_v15 = vpop.f32.mrb[39].mxu0  ;;  %v2004_v32 = vrot.slane %v5556_v31, 1 }
 0x37f   : > { %v1824_v7 = vrot.slane %v1806_v50, 7  ;;  %v1807_v55 = vsel %vm1790_vm2, %v1782_v18, %v1799_v37  ;;  %v1784_v51 = vadd.f32 %v1774_v56, %v1754_v15  ;;  %v2007_v29 = vrot.slane %v5561_v45, 1 }
 0x380   : > { %v1826_v39 = vrot.slane %v1807_v55, 7  ;;  %vm1791_vm3 = vcmp.ge.f32.partialorder %v1783_v60, 0.0  ;;  %v1800_v36 = vmul.f32 %v1793_v1, %v1783_v60  ;;  %v1924_v6 = vld [vmem:[#allocation2] sm:$0xfe] }
 0x381   : > { %v5568_v35 = vsel %vm1177_vm7, %v1820_v11, %v1824_v7  ;;  %vm1792_vm4 = vcmp.ge.f32.partialorder %v1784_v51, 0.0  ;;  %v1801_v53 = vmul.f32 %v1793_v1, %v1784_v51  ;;  %v1925_v52 = vld [vmem:[#allocation2 + $0x8] sm:$0xfe]  ;;  %v2003_v28 = vrot.slane %v1924_v6, 1  ;;  %v2207_v55 = vld [vmem:[#allocation2] sm:$0xfc] }
 0x382   : > { %v2208_v10 = vld [vmem:[#allocation2 + $0x8] sm:$0xfc]  ;;  %v5571_v19 = vsel %vm1177_vm7, %v1822_v25, %v1826_v39  ;;  %v1808_v15 = vsel %vm1791_vm3, %v1783_v60, %v1800_v36  ;;  %v2006_v56 = vrot.slane %v1925_v52, 1  ;;  %v2280_v50 = vrot.slane %v2207_v55, 2  ;;  %v1864_v36 = vld [vmem:[%s5863_s7 + $0x20] sm:$0xff] }
 0x383   : > { %v2283_v18 = vrot.slane %v2208_v10, 2  ;;  %v1828_v34 = vrot.slane %v1808_v15, 7  ;;  %v1809_v37 = vsel %vm1792_vm4, %v1784_v51, %v1801_v53  ;;  %v5885_v1 = vrot.slane %v5561_v45, 2  ;;  %v1866_v51 = vld [vmem:[%s5863_s7 + $0x30] sm:$0xff]  ;;  %v1869_v10 = vld [vmem:[%s5863_s7 + $0x48] sm:$0xff]  ;;  %v1871_v15 = vld [vmem:[%s5863_s7 + $0x58] sm:$0xff] }
 0x384   : > { %v1830_v24 = vrot.slane %v1809_v37, 7  ;;  %v2008_v11 = vsel %vm1363_vm11, %v2006_v56, %v2007_v29  ;;  %v2281_v6 = vrot.slane %v5556_v31, 2  ;;  %v2005_v60 = vsel %vm1363_vm11, %v2003_v28, %v2004_v32  ;;  %v1873_v37 = vld [vmem:[%s5863_s7 + $0x68] sm:$0xff] }
 0x385   : > { %v2285_v20 = vsel %vm1641_vm12, %v2283_v18, %v5885_v1  ;;  %v5586_v25 = vsel %vm1177_vm7, %v1824_v7, %v1828_v34  ;;  %1850 = vst [vmem:[#allocation2 + $0x40] sm:$0x1] %v1828_v34  ;;  %2093 = vmatprep.mubr.f32.mxu1 %v2008_v11  ;;  %v2011_v53 = vrot.slane %v5571_v19, 1  ;;  %v2009_v52 = vrot.slane %v5568_v35, 1 }
 0x386   : > { %2370 = vmatprep.mubr.f32.mxu0 %v2285_v20  ;;  %v5598_v7 = vsel %vm1177_vm7, %v1826_v39, %v1830_v24  ;;  %1851 = vst [vmem:[#allocation2 + $0x48] sm:$0x1] %v1830_v24  ;;  %2094 = vmatmul.mubr.f32.vlgmr.msra.gmra.mrb[8].mxu1 %v2005_v60  ;;  %v2282_v20 = vsel %vm1641_vm12, %v2280_v50, %v2281_v6  ;;  %v1868_v39 = vld [vmem:[%s5863_s7 + $0x40] sm:$0xff]  ;;  %v1870_v24 = vld [vmem:[%s5863_s7 + $0x50] sm:$0xff] }
 0x387   : > { %3398 = vmatpush1.bf16.msra.mxu1 %v3397_v44  ;;  %2371 = vmatmul.mubr.f32.vlgmr.msra.gmra.mrb[40].mxu0 %v2282_v20  ;;  %v2012_v28 = vsel %vm1363_vm11, %v2007_v29, %v2011_v53  ;;  %v3401_v56 = vpack.c.bf16 %v1866_v51, %v1864_v36  ;;  %v2015_v18 = vrot.slane %v5598_v7, 1  ;;  %v3403_v55 = vpack.c.bf16 %v1871_v15, %v1869_v10  ;;  %v1874_v36 = vld [vmem:[%s5863_s7 + $0x70] sm:$0xff]  ;;  %v1877_v10 = vld [vmem:[%s5863_s7 + $0x88] sm:$0xff]  ;;  %v1879_v15 = vld [vmem:[%s5863_s7 + $0x98] sm:$0xff] }
 0x388   : > { %2099 = vmatprep.mubr.f32.mxu1 %v2012_v28  ;;  %3400 = vmatprep.subr.bf16.mxu1 %v3399_v12  ;;  %v2010_v34 = vsel %vm1363_vm11, %v2004_v32, %v2009_v52  ;;  %v2013_v29 = vrot.slane %v5586_v25, 1  ;;  %v1875_v12 = vld [vmem:[%s5863_s7 + $0x78] sm:$0xff]  ;;  %v3405_v50 = vpack.c.bf16 %v1870_v24, %v1868_v39  ;;  %v1872_v32 = vld [vmem:[%s5863_s7 + $0x60] sm:$0xff]  ;;  %v1878_v39 = vld [vmem:[%s5863_s7 + $0x90] sm:$0xff] }
 0x389   : > { %v2016_v44 = vsel %vm1363_vm11, %v2011_v53, %v2015_v18  ;;  %v3407_v11 = vpack.c.bf16 %v1875_v12, %v1873_v37  ;;  %v3409_v28 = vpack.c.bf16 %v1874_v36, %v1872_v32 }
 0x38a   : > { %2100 = vmatmul.mubr.f32.gmra.mrb[10].mxu1 %v2010_v34  ;;  %v2014_v51 = vsel %vm1363_vm11, %v2009_v52, %v2013_v29  ;;  %v1876_v52 = vld [vmem:[%s5863_s7 + $0x80] sm:$0xff]  ;;  %v1881_v34 = vld [vmem:[%s5863_s7 + $0xa8] sm:$0xff] }
 0x38b   : > { %3402 = vmatpush1.bf16.msra.mxu1 %v3401_v56  ;;  %2105 = vmatprep.mubr.f32.mxu1 %v2016_v44  ;;  %v1853_v44 = vld [vmem:[#allocation2 + $0x8] sm:$0xff]  ;;  %v3413_v37 = vpack.c.bf16 %v1878_v39, %v1876_v52  ;;  %v1895_v52 = vld [vmem:[%s5863_s7 + $0x118] sm:$0xff] }
 0x38c   : > { %3404 = vmatprep.subr.bf16.mxu1 %v3403_v55  ;;  %v1926_v1 = vld [vmem:[#allocation2 + $0x40] sm:$0x1]  ;;  %v3411_v55 = vpack.c.bf16 %v1879_v15, %v1877_v10  ;;  %v1891_v10 = vld [vmem:[%s5863_s7 + $0xf8] sm:$0xff] }
 0x38d   : > { %v1927_v60 = vld [vmem:[#allocation2 + $0x48] sm:$0x1]  ;;  %v2017_v53 = vrot.slane %v1926_v1, 1  ;;  %v1887_v1 = vld [vmem:[%s5863_s7 + $0xd8] sm:$0xff] }
 0x38e   : > { %2106 = vmatmul.mubr.f32.gmra.mrb[12].mxu1 %v2014_v51  ;;  %v2019_v20 = vrot.slane %v1927_v60, 1  ;;  %v1884_v51 = vld [vmem:[%s5863_s7 + $0xc0] sm:$0xff]  ;;  %v1886_v60 = vld [vmem:[%s5863_s7 + $0xd0] sm:$0xff] }
 0x38f   : > { %3406 = vmatpush1.bf16.msra.mxu1 %v3405_v50  ;;  %v2018_v24 = vsel %vm1363_vm11, %v2013_v29, %v2017_v53  ;;  %v1880_v50 = vld [vmem:[%s5863_s7 + $0xa0] sm:$0xff]  ;;  %v1882_v29 = vld [vmem:[%s5863_s7 + $0xb0] sm:$0xff]  ;;  %v1889_v53 = vld [vmem:[%s5863_s7 + $0xe8] sm:$0xff]  ;;  %v3421_v15 = vpack.c.bf16 %v1886_v60, %v1884_v51 }
 0x390   : > { %v2020_v56 = vsel %vm1363_vm11, %v2015_v18, %v2019_v20  ;;  %3408 = vmatprep.subr.bf16.mxu1 %v3407_v11  ;;  %v1883_v18 = vld [vmem:[%s5863_s7 + $0xb8] sm:$0xff]  ;;  %v1885_v11 = vld [vmem:[%s5863_s7 + $0xc8] sm:$0xff]  ;;  %v3417_v32 = vpack.c.bf16 %v1882_v29, %v1880_v50  ;;  %v3423_v20 = vpack.c.bf16 %v1891_v10, %v1889_v53  ;;  %v1896_v29 = vld [vmem:[%s5863_s7 + $0x120] sm:$0xff] }
 0x391   : > { %2111 = vmatprep.mubr.f32.mxu1 %v2020_v56  ;;  %v3415_v12 = vpack.c.bf16 %v1883_v18, %v1881_v34  ;;  %v3419_v36 = vpack.c.bf16 %v1887_v1, %v1885_v11  ;;  %v1890_v56 = vld [vmem:[%s5863_s7 + $0xf0] sm:$0xff]  ;;  %v1892_v34 = vld [vmem:[%s5863_s7 + $0x100] sm:$0xff]  ;;  %v1901_v1 = vld [vmem:[%s5863_s7 + $0x148] sm:$0xff] }
 0x392   : > { %2112 = vmatmul.mubr.f32.gmra.mrb[14].mxu1 %v2018_v24  ;;  %v1894_v18 = vld [vmem:[%s5863_s7 + $0x110] sm:$0xff]  ;;  %v1900_v60 = vld [vmem:[%s5863_s7 + $0x140] sm:$0xff]  ;;  %v1905_v10 = vld [vmem:[%s5863_s7 + $0x168] sm:$0xff] }
 0x393   : > { %3410 = vmatpush1.bf16.msra.mxu1 %v3409_v28  ;;  %2182 = vmatprep.mubr.f32.mxu1 %v1853_v44  ;;  %v1888_v28 = vld [vmem:[%s5863_s7 + $0xe0] sm:$0xff]  ;;  %v1897_v44 = vld [vmem:[%s5863_s7 + $0x128] sm:$0xff]  ;;  %v1898_v11 = vld [vmem:[%s5863_s7 + $0x130] sm:$0xff] }
 0x394   : > { %3412 = vmatprep.subr.bf16.mxu1 %v3411_v55  ;;  %v1893_v55 = vld [vmem:[%s5863_s7 + $0x108] sm:$0xff]  ;;  %v3425_v39 = vpack.c.bf16 %v1890_v56, %v1888_v28  ;;  %v1902_v53 = vld [vmem:[%s5863_s7 + $0x150] sm:$0xff]  ;;  %v1904_v56 = vld [vmem:[%s5863_s7 + $0x160] sm:$0xff] }
 0x395   : > { %v3427_v24 = vpack.c.bf16 %v1895_v52, %v1893_v55  ;;  %v1906_v55 = vld [vmem:[%s5863_s7 + $0x170] sm:$0xff]  ;;  %v1909_v52 = vld [vmem:[%s5863_s7 + $0x188] sm:$0xff] }
 0x397   : > { %3414 = vmatpush1.bf16.msra.mxu1 %v3413_v37  ;;  %v1899_v37 = vld [vmem:[%s5863_s7 + $0x138] sm:$0xff] }
 0x398   : > { %3416 = vmatprep.subr.bf16.mxu1 %v3415_v12  ;;  %v3429_v12 = vpack.c.bf16 %v1894_v18, %v1892_v34  ;;  %v3431_v50 = vpack.c.bf16 %v1899_v37, %v1897_v44  ;;  %v1908_v18 = vld [vmem:[%s5863_s7 + $0x180] sm:$0xff]  ;;  %v1910_v44 = vld [vmem:[%s5863_s7 + $0x190] sm:$0xff]  ;;  %v1913_v37 = vld [vmem:[%s5863_s7 + $0x1a8] sm:$0xff] }
 0x39b   : > { %3418 = vmatpush1.bf16.msra.mxu1 %v3417_v32  ;;  %v1903_v32 = vld [vmem:[%s5863_s7 + $0x158] sm:$0xff] }
 0x39c   : > { %3420 = vmatprep.subr.bf16.mxu1 %v3419_v36  ;;  %v3433_v36 = vpack.c.bf16 %v1898_v11, %v1896_v29  ;;  %v3435_v51 = vpack.c.bf16 %v1903_v32, %v1901_v1  ;;  %v1912_v11 = vld [vmem:[%s5863_s7 + $0x1a0] sm:$0xff]  ;;  %v1914_v1 = vld [vmem:[%s5863_s7 + $0x1b0] sm:$0xff]  ;;  %v1917_v32 = vld [vmem:[%s5863_s7 + $0x1c8] sm:$0xff] }
 0x39f   : > { %3422 = vmatpush1.bf16.msra.mxu1 %v3421_v15  ;;  %v1907_v15 = vld [vmem:[%s5863_s7 + $0x178] sm:$0xff] }
 0x3a0   : > { %3424 = vmatprep.subr.bf16.mxu1 %v3423_v20  ;;  %v3437_v20 = vpack.c.bf16 %v1902_v53, %v1900_v60  ;;  %v3439_v28 = vpack.c.bf16 %v1907_v15, %v1905_v10  ;;  %v1916_v53 = vld [vmem:[%s5863_s7 + $0x1c0] sm:$0xff]  ;;  %v1918_v10 = vld [vmem:[%s5863_s7 + $0x1d0] sm:$0xff]  ;;  %v1921_v15 = vld [vmem:[%s5863_s7 + $0x1e8] sm:$0xff] }
 0x3a3   : > { %3426 = vmatpush1.bf16.msra.mxu1 %v3425_v39  ;;  %v1911_v39 = vld [vmem:[%s5863_s7 + $0x198] sm:$0xff] }
 0x3a4   : > { %3428 = vmatprep.subr.bf16.mxu1 %v3427_v24  ;;  %v3441_v24 = vpack.c.bf16 %v1906_v55, %v1904_v56  ;;  %v3443_v34 = vpack.c.bf16 %v1911_v39, %v1909_v52  ;;  %v1920_v55 = vld [vmem:[%s5863_s7 + $0x1e0] sm:$0xff]  ;;  %v1922_v52 = vld [vmem:[%s5863_s7 + $0x1f0] sm:$0xff] }
 0x3a5   : > { %v3457_v39 = vpack.c.bf16 %v1922_v52, %v1920_v55 }
 0x3a7   : > { %3430 = vmatpush1.bf16.msra.mxu1 %v3429_v12  ;;  %v1915_v12 = vld [vmem:[%s5863_s7 + $0x1b8] sm:$0xff] }
 0x3a8   : > { %3432 = vmatprep.subr.bf16.mxu1 %v3431_v50  ;;  %v3445_v50 = vpack.c.bf16 %v1910_v44, %v1908_v18  ;;  %v3447_v29 = vpack.c.bf16 %v1915_v12, %v1913_v37 }
 0x3ab   : > { %3434 = vmatpush1.bf16.msra.mxu1 %v3433_v36  ;;  %v1919_v36 = vld [vmem:[%s5863_s7 + $0x1d8] sm:$0xff] }
 0x3ac   : > { %3436 = vmatprep.subr.bf16.mxu1 %v3435_v51  ;;  %v3449_v51 = vpack.c.bf16 %v1914_v1, %v1912_v11  ;;  %v3451_v60 = vpack.c.bf16 %v1919_v36, %v1917_v32  ;;  %v5891_v32 = vld [vmem:[#allocation10_spill] sm:$0xff] }
 0x3af   : > { %3438 = vmatpush1.bf16.msra.mxu1 %v3437_v20  ;;  %v1923_v20 = vld [vmem:[%s5863_s7 + $0x1f8] sm:$0xff] }
 0x3b0   : > { %3440 = vmatprep.subr.bf16.mxu1 %v3439_v28  ;;  %v3453_v28 = vpack.c.bf16 %v1918_v10, %v1916_v53  ;;  %v3455_v56 = vpack.c.bf16 %v1923_v20, %v1921_v15 }
 0x3b3   : > { %3442 = vmatpush1.bf16.msra.mxu1 %v3441_v24  ;;  %v1852_v24 = vld [vmem:[#allocation2] sm:$0xff] }
 0x3b4   : > { %3444 = vmatprep.subr.bf16.mxu1 %v3443_v34  ;;  %v5890_v34 = vld [vmem:[#allocation9_spill] sm:$0xff] }
 0x3b7   : > { %3446 = vmatpush1.bf16.msra.mxu1 %v3445_v50 }
 0x3b8   : > { %3448 = vmatprep.subr.bf16.mxu1 %v3447_v29 }
 0x3bb   : > { %3450 = vmatpush1.bf16.msra.mxu1 %v3449_v51 }
 0x3bc   : > { %3452 = vmatprep.subr.bf16.mxu1 %v3451_v60  ;;  %v5892_v60 = vld [vmem:[#allocation11_spill] sm:$0xff] }
 0x3bf   : > { %3454 = vmatpush1.bf16.msra.mxu1 %v3453_v28 }
 0x3c0   : > { %3456 = vmatprep.subr.bf16.mxu1 %v3455_v56 }
 0x3c3   : > { %3458 = vmatpush1.bf16.msra.mxu1 %v3457_v39  ;;  %v5893_v39 = vld [vmem:[#allocation12_spill] sm:$0xff] }
 0x3c4   : > { %3523 = vmatprep.subr.bf16.mxu1 %v5156_v59  ;;  %v2288_v59 = vrot.slane %v5571_v19, 2 }
 0x3c6   : > { %2183 = vmatmul.mubr.f32.vlgmr.msra.gmra.mrb[8].mxu1 %v1852_v24 }
 0x3c7   : > { %2188 = vmatprep.mubr.f32.mxu1 %v5561_v45  ;;  %3539 = vmatpush1.bf16.msra.mxu1 %v5172_v8  ;;  %v5886_v8 = vrot.slane %v5561_v45, 2 }
 0x3c8   : > { %3524 = vmatprep.subr.bf16.mxu1 %v5175_v9 }
 0x3c9   : > { %v2289_v9 = vsel %vm1641_vm12, %v5886_v8, %v2288_v59  ;;  %v5894_v8 = vld [vmem:[#allocation13_spill] sm:$0xff] }
 0x3ca   : > { %2189 = vmatmul.mubr.f32.gmra.mrb[10].mxu1 %v5556_v31 }
 0x3cb   : > { %2194 = vmatprep.mubr.f32.mxu1 %v5571_v19  ;;  %3540 = vmatpush1.bf16.msra.mxu1 %v5196_v13  ;;  %v2286_v13 = vrot.slane %v5568_v35, 2 }
 0x3cc   : > { %3525 = vmatprep.subr.bf16.mxu1 %v5199_v21  ;;  %v2292_v21 = vrot.slane %v5598_v7, 2 }
 0x3ce   : > { %2195 = vmatmul.mubr.f32.gmra.mrb[12].mxu1 %v5568_v35 }
 0x3cf   : > { %2200 = vmatprep.mubr.f32.mxu1 %v5598_v7  ;;  %3541 = vmatpush1.bf16.msra.mxu1 %v5217_v30  ;;  %v2210_v30 = vld [vmem:[#allocation2 + $0x48] sm:$0x3] }
 0x3d0   : > { %3526 = vmatprep.subr.bf16.mxu1 %v5220_v33  ;;  %v2287_v33 = vsel %vm1641_vm12, %v2281_v6, %v2286_v13 }
 0x3d2   : > { %2201 = vmatmul.mubr.f32.gmra.mrb[14].mxu1 %v5586_v25 }
 0x3d3   : > { %3542 = vmatpush1.bf16.msra.mxu1 %v5237_v41  ;;  %2376 = vmatprep.mubr.f32.mxu1 %v2289_v9  ;;  %v2290_v41 = vrot.slane %v5586_v25, 2  ;;  %v5889_v25 = vld [vmem:[#allocation8_spill] sm:$0xff] }
 0x3d4   : > { %3527 = vmatprep.subr.bf16.mxu1 %v5240_v42  ;;  %v2293_v42 = vsel %vm1641_vm12, %v2288_v59, %v2292_v21 }
 0x3d7   : > { %3543 = vmatpush1.bf16.msra.mxu1 %v5256_v48  ;;  %v2296_v48 = vrot.slane %v2210_v30, 2 }
 0x3d8   : > { %3528 = vmatprep.subr.bf16.mxu1 %v5259_v49  ;;  %v2209_v49 = vld [vmem:[#allocation2 + $0x40] sm:$0x3] }
 0x3db   : > { %3544 = vmatpush1.bf16.msra.mxu1 %v5274_v57  ;;  %v2291_v57 = vsel %vm1641_vm12, %v2286_v13, %v2290_v41 }
 0x3dc   : > { %3529 = vmatprep.subr.bf16.mxu1 %v5277_v58  ;;  %v2294_v58 = vrot.slane %v2209_v49, 2 }
 0x3df   : > { %3545 = vmatpush1.bf16.msra.mxu1 %v5292_v4  ;;  %v2297_v4 = vsel %vm1641_vm12, %v2292_v21, %v2296_v48 }
 0x3e0   : > { %3530 = vmatprep.subr.bf16.mxu1 %v5295_v5  ;;  %v2295_v5 = vsel %vm1641_vm12, %v2290_v41, %v2294_v58 }
 0x3e3   : > { %3546 = vmatpush1.bf16.msra.mxu1 %v5310_v14 }
 0x3e4   : > { %3531 = vmatprep.subr.bf16.mxu1 %v5313_v62 }
 0x3e7   : > { %3547 = vmatpush1.bf16.msra.mxu1 %v5328_v22  ;;  %v2403_v22 = vld [vmem:[%s5864_s8] sm:$0x3] }
 0x3e8   : > { %3532 = vmatprep.subr.bf16.mxu1 %v5331_v54  ;;  %v2408_v54 = vrot.slane %v2403_v22, %v4550_v61 }
 0x3eb   : > { %3548 = vmatpush1.bf16.msra.mxu1 %v5340_v23 }
 0x3ec   : > { %3533 = vmatprep.subr.bf16.mxu1 %v5368_v40  ;;  %v2412_v40 = vrot.slane %v2403_v22, %v4555_v63 }
 0x3ef   : > { %3549 = vmatpush1.bf16.msra.mxu1 %v5370_v43 }
 0x3f0   : > { %3534 = vmatprep.subr.bf16.mxu1 %v5398_v2 }
 0x3f3   : > { %3550 = vmatpush1.bf16.msra.mxu1 %v5400_v3 }
 0x3f4   : > { %3535 = vmatprep.subr.bf16.mxu1 %v5428_v26 }
 0x3f7   : > { %3551 = vmatpush1.bf16.msra.mxu1 %v5430_v27  ;;  %v2439_v27 = vstv %s439_s17 }
 0x3f8   : > { %3536 = vmatprep.subr.bf16.mxu1 %v5458_v46 }
 0x3fb   : > { %3552 = vmatpush1.bf16.msra.mxu1 %v5460_v47  ;;  %v5887_v47 = vld [vmem:[#allocation6_spill] sm:$0xff] }
 0x3fc   : > { %3537 = vmatprep.subr.bf16.mxu1 %v5488_v16 }
 0x3ff   : > { %3553 = vmatpush1.bf16.msra.mxu1 %v5490_v17  ;;  %v5888_v17 = vld [vmem:[#allocation7_spill] sm:$0xff] }
 0x400   : > { %3538 = vmatprep.subr.bf16.mxu1 %v5518_v0 }
 0x403   : > { %3554 = vmatpush1.bf16.msra.mxu1 %v5520_v38 }
 0x406   : > { %2377 = vmatmul.mubr.f32.vlgmr.msra.gmra.mrb[10].mxu1 %v2287_v33 }
 0x407   : > { %2382 = vmatprep.mubr.f32.mxu1 %v2293_v42 }
 0x40a   : > { %2383 = vmatmul.mubr.f32.gmra.mrb[12].mxu1 %v2291_v57 }
 0x40b   : > { %2388 = vmatprep.mubr.f32.mxu1 %v2297_v4 }
 0x40e   : > { %2389 = vmatmul.mubr.f32.gmra.mrb[14].mxu1 %v2295_v5 }
 0x45a   : > { %v2372_v14 = vpop.f32.mrb[40].mxu0 }
 0x45b   : > { %v2374_v62 = vpop.f32.mrb[41].mxu0 }
 0x499   : > { %v2184_v23 = vpop.f32.mrb[8].mxu1 }
 0x49a   : > { %v3563_v43 = vadd.f32 %v2372_v14, %v2184_v23  ;;  %v2186_v2 = vpop.f32.mrb[9].mxu1 }
 0x49b   : > { %v3564_v3 = vadd.f32 %v2374_v62, %v2186_v2 }
 0x49c   : > { %v2415_v26 = vadd.f32 %v3563_v43, %v2408_v54 }
 0x49d   : > { %v2416_v46 = vadd.f32 %v3564_v3, %v2412_v40 }
 0x49e   : > { %v2423_v16 = vadd.f32 %v2415_v26, %v5887_v47 }
 0x49f   : > { %v2424_v0 = vadd.f32 %v2416_v46, %v5888_v17 }
 0x4a0   : > { %vm2431_vm5 = vcmp.ge.f32.partialorder %v2423_v16, 0.0  ;;  %v2440_v61 = vmul.f32 %v2439_v27, %v2423_v16 }
 0x4a1   : > { %vm2432_vm6 = vcmp.ge.f32.partialorder %v2424_v0, 0.0  ;;  %v2441_v63 = vmul.f32 %v2439_v27, %v2424_v0 }
 0x4a2   : > { %v2448_v38 = vsel %vm2431_vm5, %v2423_v16, %v2440_v61 }
 0x4a3   : > { %2456 = vst [vmem:[%s5837_s22] sm:$0xff] %v2448_v38  ;;  %v2449_v31 = vsel %vm2432_vm6, %v2424_v0, %v2441_v63 }
 0x4a4   : > { %2457 = vst [vmem:[%s5837_s22 + $0x8] sm:$0xff] %v2449_v31 }
 0x4d9   : > { %v2378_v45 = vpop.f32.mrb[10].mxu1 }
 0x4da   : > { %v2417_v35 = vadd.f32 %v2408_v54, %v2378_v45  ;;  %v2380_v19 = vpop.f32.mrb[11].mxu1 }
 0x4db   : > { %v2418_v6 = vadd.f32 %v2412_v40, %v2380_v19 }
 0x4dc   : > { %v2425_v7 = vadd.f32 %v2417_v35, %v5889_v25 }
 0x4dd   : > { %v2426_v18 = vadd.f32 %v2418_v6, %v5890_v34  ;;  %v2384_v44 = vpop.f32.mrb[12].mxu1 }
 0x4de   : > { %vm2433_vm7 = vcmp.ge.f32.partialorder %v2425_v7, 0.0  ;;  %v2442_v37 = vmul.f32 %v2439_v27, %v2425_v7  ;;  %v2419_v12 = vadd.f32 %v2408_v54, %v2384_v44  ;;  %v2386_v50 = vpop.f32.mrb[13].mxu1 }
 0x4df   : > { %vm2434_vm8 = vcmp.ge.f32.partialorder %v2426_v18, 0.0  ;;  %v2443_v29 = vmul.f32 %v2439_v27, %v2426_v18  ;;  %v2420_v11 = vadd.f32 %v2412_v40, %v2386_v50 }
 0x4e0   : > { %v2450_v1 = vsel %vm2433_vm7, %v2425_v7, %v2442_v37  ;;  %v2427_v36 = vadd.f32 %v2419_v12, %v5891_v32 }
 0x4e1   : > { %2458 = vst [vmem:[%s5837_s22 + $0x10] sm:$0xff] %v2450_v1  ;;  %v2451_v51 = vsel %vm2434_vm8, %v2426_v18, %v2443_v29  ;;  %v2428_v53 = vadd.f32 %v2420_v11, %v5892_v60  ;;  %v2390_v10 = vpop.f32.mrb[14].mxu1 }
 0x4e2   : > { %2459 = vst [vmem:[%s5837_s22 + $0x18] sm:$0xff] %v2451_v51  ;;  %vm2435_vm9 = vcmp.ge.f32.partialorder %v2427_v36, 0.0  ;;  %v2444_v15 = vmul.f32 %v2439_v27, %v2427_v36  ;;  %v2421_v20 = vadd.f32 %v2408_v54, %v2390_v10  ;;  %v2392_v28 = vpop.f32.mrb[15].mxu1 }
 0x4e3   : > { %vm2436_vm10 = vcmp.ge.f32.partialorder %v2428_v53, 0.0  ;;  %v2445_v56 = vmul.f32 %v2439_v27, %v2428_v53  ;;  %v2422_v55 = vadd.f32 %v2412_v40, %v2392_v28 }
 0x4e4   : > { %v2452_v52 = vsel %vm2435_vm9, %v2427_v36, %v2444_v15  ;;  %v2429_v24 = vadd.f32 %v2421_v20, %v5893_v39 }
 0x4e5   : > { %2460 = vst [vmem:[%s5837_s22 + $0x20] sm:$0xff] %v2452_v52  ;;  %v2453_v59 = vsel %vm2436_vm10, %v2428_v53, %v2445_v56  ;;  %v2430_v9 = vadd.f32 %v2422_v55, %v5894_v8 }
 0x4e6   : > { %2461 = vst [vmem:[%s5837_s22 + $0x28] sm:$0xff] %v2453_v59  ;;  %vm2437_vm11 = vcmp.ge.f32.partialorder %v2429_v24, 0.0  ;;  %v2446_v13 = vmul.f32 %v2439_v27, %v2429_v24 }
 0x4e7   : > { %vm2438_vm12 = vcmp.ge.f32.partialorder %v2430_v9, 0.0  ;;  %v2447_v21 = vmul.f32 %v2439_v27, %v2430_v9 }
 0x4e8   : > { %v2454_v30 = vsel %vm2437_vm11, %v2429_v24, %v2446_v13 }
 0x4e9   : > { %2462 = vst [vmem:[%s5837_s22 + $0x30] sm:$0xff] %v2454_v30  ;;  %v2455_v33 = vsel %vm2438_vm12, %v2430_v9, %v2447_v21 }
 0x4ea   : > { %2463 = vst [vmem:[%s5837_s22 + $0x38] sm:$0xff] %v2455_v33 }
 0x4eb PF: > { %s25_s27 = sadd.s32 1, %s3618_s27  }
 0x4ec   : > { %p22_p4 = scmp.ge.s32.totalorder %s25_s27, 4  }
 0x4ee   :  { %24 = sbr.rel (!%p22_p4) target bundleno = 4 (0x4), region = 108 }

</bundles_post_ra>
